<compile_context>
chip_gen: v6e
topology: v6e:2x2x1
jax: 0.10.0
libtpu: 0.0.40
codegen_flags: <defaults>
</compile_context>

<pallas_src>
import jax
import jax.numpy as jnp
import numpy as np
from jax.experimental import pallas as pl
from jax.experimental.pallas import tpu as pltpu

INPUT_CH = 12
HIDDEN = 32
NUM_LAYERS = 2          # kernel wavefronts exactly 2 layers
NUM_CLASSES = 4
SEQ_LEN = 128
BATCH = 2
NEG_SLOPE = 0.01        # nn.LeakyReLU() default
OUT_PAD = 128           # lane-dense padded width for the output head

CONV_CFG = [(INPUT_CH, 64, 9), (64, 32, 5), (32, 32, 5), (32, 16, 5)]
LSTM_IN = CONV_CFG[-1][1]   # 16


def _pool_len(L):
    # MaxPool1d(kernel=2, stride=2, padding=1), floor mode
    return L // 2 + 1


def _round_up(n, m):
    return ((n + m - 1) // m) * m


def _make_pool_selector(L):
    """Fused 0/1 selector for MaxPool1d(2,2,padding=1) along axis 0.

    out[t] = max(x[2t-1], x[2t]) with implicit -inf padding; boundary rows
    duplicate the valid neighbour so no mask add is needed.  Returns a single
    (2*Pp, L) float32 matrix with Pp = round_up(P, 8): rows [0, P) select the
    left operand, rows [Pp, Pp+P) the right one, so the kernel does ONE matmul
    and an 8-aligned sublane split + maximum.
    """
    P = _pool_len(L)
    Pp = _round_up(P, 8)
    sel = np.zeros((2 * Pp, L), np.float32)
    for t in range(P):
        i0, i1 = 2 * t - 1, 2 * t
        if i0 < 0:
            i0 = i1              # left pad: both select x[0]
        if i1 > L - 1:
            i1 = i0              # right pad (even L): both select x[L-1]
        sel[t, i0] = 1.0
        sel[Pp + t, i1] = 1.0
    return sel


# ----------------------------- kernel helpers --------------------------------

def _leaky_relu(x):
    return jnp.where(x >= 0, x, NEG_SLOPE * x)


def _conv_taps(x, w_ref, bias):
    """x: (L, Cin); w_ref: (K, Cin, Cout); bias: (1, Cout) -> (L-K+1, Cout)."""
    K = w_ref.shape[0]
    L_out = x.shape[0] - K + 1
    acc = jnp.dot(x[0:L_out, :], w_ref[0], preferred_element_type=jnp.float32)
    for k in range(1, K):
        acc = acc + jnp.dot(x[k:k + L_out, :], w_ref[k],
                            preferred_element_type=jnp.float32)
    return acc + bias


def _maxpool_fused(y, sel_ref):
    """MaxPool1d(2,2,padding=1) via ONE fused 0/1-selector matmul + aligned split."""
    L = sel_ref.shape[1]
    P = _pool_len(L)
    Pp = sel_ref.shape[0] // 2
    r = jnp.dot(sel_ref[...], y, preferred_element_type=jnp.float32)
    return jnp.maximum(r[0:P, :], r[Pp:Pp + P, :])


def _lstm_gates(g):
    """Full-lane-width activations on (bb, 4H), then 32-lane slices (i,f,g,o)."""
    sig = jax.nn.sigmoid(g)
    tnh = jnp.tanh(g)
    H = HIDDEN
    return sig[:, 0:H], sig[:, H:2 * H], tnh[:, 2 * H:3 * H], sig[:, 3 * H:4 * H]


# --------------------------------- kernel ------------------------------------

def lstm_cnn_kernel(xcol_ref, w1_ref, w2_ref, w3_ref, w4_ref,
                    sel1_ref, sel2_ref, sel3_ref, sel4_ref,
                    lstm_w_ref, wout_ref, bias_ref, out_ref):
    bb = xcol_ref.shape[0]                  # batch elements handled this grid step
    H = HIDDEN
    biases = bias_ref[...]                  # (8, 128) packed biases

    # --- conv / leaky-relu / maxpool stack (per batch element, independent) ---
    w1 = w1_ref[...]                        # (K1*Cin, 64) im2col'ed conv1 weight
    seqs = []
    for b in range(bb):
        y = jnp.dot(xcol_ref[b], w1, preferred_element_type=jnp.float32)
        y = _maxpool_fused(_leaky_relu(y + biases[0:1, :CONV_CFG[0][1]]), sel1_ref)
        for i, (w_ref, sel_ref) in enumerate(
                ((w2_ref, sel2_ref), (w3_ref, sel3_ref), (w4_ref, sel4_ref))):
            cout = CONV_CFG[i + 1][1]
            y = _conv_taps(y, w_ref, biases[i + 1:i + 2, :cout])
            y = _maxpool_fused(_leaky_relu(y), sel_ref)
        seqs.append(y)                      # (T, 16)
    T = seqs[0].shape[0]

    # --- 2-layer LSTM (batch_first, zero init state, gate order i,f,g,o) -----
    lstm_w = lstm_w_ref[...]                # (16+32+32+32, 4H) packed weights
    o1, o2 = LSTM_IN, LSTM_IN + H
    wih1 = lstm_w[0:o1, :]                  # (16, 4H)
    whh1 = lstm_w[o1:o2, :]                 # (32, 4H)
    w2cat = lstm_w[o2:, :]                  # (64, 4H) = [Wih2; Whh2]
    b1 = biases[4:5, :]
    b2 = biases[5:6, :]

    # Hoisted layer-1 input projection for the whole (batch-blocked) sequence.
    x_all = seqs[0] if bb == 1 else jnp.concatenate(seqs, axis=0)   # (bb*T, 16)
    gx1 = jnp.dot(x_all, wih1, preferred_element_type=jnp.float32) + b1

    h1 = jnp.zeros((bb, H), jnp.float32)
    c1 = jnp.zeros((bb, H), jnp.float32)
    h2 = jnp.zeros((bb, H), jnp.float32)
    c2 = jnp.zeros((bb, H), jnp.float32)

    # Wavefront: step s runs layer1 at t=s and layer2 at t=s-1.  The two
    # recurrent matmuls within a step are data-independent, so the scheduler
    # overlaps their MXU latency; dependent chain ~T+1 instead of 2T.
    for s in range(T + 1):
        h1_prev = h1                        # layer-1 output at t = s-1
        if s < T:
            rows = [gx1[b * T + s:b * T + s + 1, :] for b in range(bb)]
            gx_t = rows[0] if bb == 1 else jnp.concatenate(rows, axis=0)
            g1 = gx_t + jnp.dot(h1, whh1, preferred_element_type=jnp.float32)
            i1, f1, gg1, og1 = _lstm_gates(g1)
            c1 = f1 * c1 + i1 * gg1
            h1 = og1 * jnp.tanh(c1)
        if s >= 1:
            hin = jnp.concatenate([h1_prev, h2], axis=1)            # (bb, 2H)
            g2 = jnp.dot(hin, w2cat, preferred_element_type=jnp.float32) + b2
            i2, f2, gg2, og2 = _lstm_gates(g2)
            c2 = f2 * c2 + i2 * gg2
            h2 = og2 * jnp.tanh(c2)

    # --- output head on the last timestep (lane-padded to 128) ---------------
    logits = jnp.dot(h2, wout_ref[...], preferred_element_type=jnp.float32)
    logits = logits + biases[6:7, :]
    out_ref[...] = logits[:, None, :]       # block (bb, 1, OUT_PAD), full-lane vst


# -------------------------------- wrapper -------------------------------------

def _tensorcores_per_device():
    """Best-effort detection of multi-TensorCore devices (v7x, v4/v5p megacore).

    Only affects the batch-blocking choice, never correctness.  Default 1
    (fold the whole batch into one grid step), optimal on single-TC v5e/v6e.
    """
    try:
        kind = jax.devices()[0].device_kind.lower()
    except Exception:
        return 1
    if any(tag in kind for tag in ("v7", "7x", "v4", "v5p")):
        return 2
    return 1


def lstm_cnn_forward(x, params_flat, batch_block=None):
    B, L, Cin = x.shape
    nconv = len(CONV_CFG)
    assert NUM_LAYERS == 2, "kernel wavefronts exactly two LSTM layers"
    assert 4 * HIDDEN <= OUT_PAD
    conv_p = params_flat[:2 * nconv]
    lstm_p = params_flat[2 * nconv:2 * nconv + 3 * NUM_LAYERS]
    wout, bout = params_flat[-2], params_flat[-1]

    # --- wrapper-side prep (layout only) --------------------------------------
    # conv1 im2col: (B, L1, K1*Cin) patches so conv1 is one 108-deep MXU matmul.
    K1, C1_out = CONV_CFG[0][2], CONV_CFG[0][1]
    L1 = L - K1 + 1
    x_col = jnp.concatenate([x[:, k:k + L1, :] for k in range(K1)], axis=2)
    w1_col = conv_p[0].reshape(K1 * Cin, C1_out)          # (k, cin) row order

    # Fused maxpool selectors, one per stage.
    sels = []
    Lc = L
    for (_, _, k) in CONV_CFG:
        Lc = Lc - k + 1
        sels.append(jnp.asarray(_make_pool_selector(Lc)))
        Lc = _pool_len(Lc)

    # Packed LSTM weights: [Wih1; Whh1; Wih2; Whh2] -> (16+32+32+32, 4H).
    lstm_w = jnp.concatenate([lstm_p[0], lstm_p[1], lstm_p[3], lstm_p[4]], axis=0)

    # Lane-dense output head (pad NUM_CLASSES -> 128 output lanes).
    wout_pad = jnp.zeros((HIDDEN, OUT_PAD), jnp.float32).at[:, :NUM_CLASSES].set(wout)

    # All biases packed into a single (8, 128) input (one DMA instead of 7).
    biases = jnp.zeros((8, OUT_PAD), jnp.float32)
    for i in range(nconv):
        cb = conv_p[2 * i + 1]                            # (1, Cout)
        biases = biases.at[i, :cb.shape[1]].set(cb[0])
    biases = biases.at[4, :4 * HIDDEN].set(lstm_p[2][0])  # b_ih1 + b_hh1
    biases = biases.at[5, :4 * HIDDEN].set(lstm_p[5][0])  # b_ih2 + b_hh2
    biases = biases.at[6, :NUM_CLASSES].set(bout[0])

    # Batch blocking: fold the batch into sublanes on single-TC chips (the LSTM
    # recurrence then runs once); keep a batch-parallel grid on multi-TC chips.
    if batch_block is None:
        batch_block = 1 if (_tensorcores_per_device() > 1 and B > 1) else B
    bb = batch_block
    assert B % bb == 0

    inputs = [x_col, w1_col, conv_p[2], conv_p[4], conv_p[6],
              sels[0], sels[1], sels[2], sels[3], lstm_w, wout_pad, biases]

    in_specs = [pl.BlockSpec((bb, L1, K1 * Cin), lambda i: (i, 0, 0))]
    for p in inputs[1:]:
        in_specs.append(pl.BlockSpec(p.shape, lambda i, _nd=p.ndim: (0,) * _nd))

    out = pl.pallas_call(
        lstm_cnn_kernel,
        out_shape=jax.ShapeDtypeStruct((B, 1, OUT_PAD), jnp.float32),
        grid=(B // bb,),
        in_specs=in_specs,
        out_specs=pl.BlockSpec((bb, 1, OUT_PAD), lambda i: (i, 0, 0)),
        compiler_params=pltpu.CompilerParams(
            dimension_semantics=("parallel",)),
    )(*inputs)
    return out[:, 0, :NUM_CLASSES]


# ----------------------------- params & reference ----------------------------

def init_params(key):
    """Deterministic synthetic parameters (PyTorch-like uniform ranges)."""
    params = []
    for (cin, cout, k) in CONV_CFG:
        key, k1, k2 = jax.random.split(key, 3)
        s = 1.0 / np.sqrt(cin * k)
        params.append(jax.random.uniform(k1, (k, cin, cout), jnp.float32, -s, s))
        params.append(jax.random.uniform(k2, (1, cout), jnp.float32, -s, s))
    in_dim = LSTM_IN
    for _ in range(NUM_LAYERS):
        key, k1, k2, k3, k4 = jax.random.split(key, 5)
        s = 1.0 / np.sqrt(HIDDEN)
        wih_t = jax.random.uniform(k1, (in_dim, 4 * HIDDEN), jnp.float32, -s, s)
        whh_t = jax.random.uniform(k2, (HIDDEN, 4 * HIDDEN), jnp.float32, -s, s)
        b_ih = jax.random.uniform(k3, (1, 4 * HIDDEN), jnp.float32, -s, s)
        b_hh = jax.random.uniform(k4, (1, 4 * HIDDEN), jnp.float32, -s, s)
        params += [wih_t, whh_t, b_ih + b_hh]
        in_dim = HIDDEN
    key, k1, k2 = jax.random.split(key, 3)
    s = 1.0 / np.sqrt(HIDDEN)
    params.append(jax.random.uniform(k1, (HIDDEN, NUM_CLASSES), jnp.float32, -s, s))
    params.append(jax.random.uniform(k2, (1, NUM_CLASSES), jnp.float32, -s, s))
    return params


def reference_forward(x, params_flat):
    """Pure-JAX reference mirroring the PyTorch forward (HIGHEST matmul precision)."""
    hi = jax.lax.Precision.HIGHEST
    nconv = len(CONV_CFG)
    conv_p = params_flat[:2 * nconv]
    lstm_p = params_flat[2 * nconv:2 * nconv + 3 * NUM_LAYERS]
    wout_t, bout = params_flat[-2], params_flat[-1]

    def one(xb):                      # xb: (L, 12)
        h = xb
        for i in range(nconv):
            w_t, b = conv_p[2 * i], conv_p[2 * i + 1]
            K = w_t.shape[0]
            L_out = h.shape[0] - K + 1
            win = jnp.stack([h[k:k + L_out] for k in range(K)], axis=0)
            h = jnp.einsum('kli,kio->lo', win, w_t, precision=hi) + b
            h = jnp.where(h >= 0, h, NEG_SLOPE * h)
            L, C = h.shape
            P = _pool_len(L)
            pad_top = jnp.full((1, C), -jnp.inf, h.dtype)
            pad_bot = jnp.full((2 * P - 1 - L, C), -jnp.inf, h.dtype)
            hp = jnp.concatenate([pad_top, h, pad_bot], axis=0)
            h = jnp.max(hp.reshape(P, 2, C), axis=1)
        Tn = h.shape[0]
        seq = h
        for l in range(NUM_LAYERS):
            wih_t, whh_t, b = lstm_p[3 * l], lstm_p[3 * l + 1], lstm_p[3 * l + 2]
            hl = jnp.zeros((HIDDEN,))
            cl = jnp.zeros((HIDDEN,))
            outs = []
            for t in range(Tn):
                g = (jnp.dot(seq[t], wih_t, precision=hi)
                     + jnp.dot(hl, whh_t, precision=hi) + b[0])
                i_g = jax.nn.sigmoid(g[0:HIDDEN])
                f_g = jax.nn.sigmoid(g[HIDDEN:2 * HIDDEN])
                g_g = jnp.tanh(g[2 * HIDDEN:3 * HIDDEN])
                o_g = jax.nn.sigmoid(g[3 * HIDDEN:4 * HIDDEN])
                cl = f_g * cl + i_g * g_g
                hl = o_g * jnp.tanh(cl)
                outs.append(hl)
            seq = jnp.stack(outs, axis=0)
        return jnp.dot(seq[-1], wout_t, precision=hi) + bout[0]

    return jnp.stack([one(x[b]) for b in range(x.shape[0])], axis=0)


if __name__ == "__main__":
    key = jax.random.PRNGKey(0)
    kx, kp = jax.random.split(key)
    x = jax.random.normal(kx, (BATCH, SEQ_LEN, INPUT_CH), jnp.float32)
    params = init_params(kp)

    out = lstm_cnn_forward(x, params)
    out = jax.block_until_ready(out)

    ref = reference_forward(x, params)
    err = float(jnp.max(jnp.abs(out - ref)))
    assert out.shape == (BATCH, NUM_CLASSES)
    assert np.isfinite(np.asarray(out)).all()
    assert err < 1e-3, f"max abs diff vs reference: {err}"
    print("KERNEL_OK")
</pallas_src>

<mosaic_0001>
module attributes {stable_mosaic.version = 11 : i64} {
  func.func @lstm_cnn_kernel(%arg0: i32, %arg1: memref<2x120x108xf32, #tpu.memory_space<vmem>>, %arg2: memref<108x64xf32, #tpu.memory_space<vmem>>, %arg3: memref<5x64x32xf32, #tpu.memory_space<vmem>>, %arg4: memref<5x32x32xf32, #tpu.memory_space<vmem>>, %arg5: memref<5x32x16xf32, #tpu.memory_space<vmem>>, %arg6: memref<128x120xf32, #tpu.memory_space<vmem>>, %arg7: memref<64x57xf32, #tpu.memory_space<vmem>>, %arg8: memref<32x25xf32, #tpu.memory_space<vmem>>, %arg9: memref<16x9xf32, #tpu.memory_space<vmem>>, %arg10: memref<112x128xf32, #tpu.memory_space<vmem>>, %arg11: memref<32x128xf32, #tpu.memory_space<vmem>>, %arg12: memref<8x128xf32, #tpu.memory_space<vmem>>, %arg13: memref<2x1x128xf32, #tpu.memory_space<vmem>>) attributes {dimension_semantics = [#tpu.dimension_semantics<parallel>], iteration_bounds = array<i64: 1>, scalar_prefetch = 0 : i64, scratch_operands = 0 : i64, tpu.core_type = #tpu.core_type<tc>, window_params = [{transform_indices = @transform_0, window_bounds = array<i64: 2, 120, 108>}, {pipeline_mode = #tpu.pipeline_mode<synchronous>, transform_indices = @transform_1, window_bounds = array<i64: 108, 64>}, {pipeline_mode = #tpu.pipeline_mode<synchronous>, transform_indices = @transform_2, window_bounds = array<i64: 5, 64, 32>}, {pipeline_mode = #tpu.pipeline_mode<synchronous>, transform_indices = @transform_3, window_bounds = array<i64: 5, 32, 32>}, {pipeline_mode = #tpu.pipeline_mode<synchronous>, transform_indices = @transform_4, window_bounds = array<i64: 5, 32, 16>}, {pipeline_mode = #tpu.pipeline_mode<synchronous>, transform_indices = @transform_5, window_bounds = array<i64: 128, 120>}, {pipeline_mode = #tpu.pipeline_mode<synchronous>, transform_indices = @transform_6, window_bounds = array<i64: 64, 57>}, {pipeline_mode = #tpu.pipeline_mode<synchronous>, transform_indices = @transform_7, window_bounds = array<i64: 32, 25>}, {pipeline_mode = #tpu.pipeline_mode<synchronous>, transform_indices = @transform_8, window_bounds = array<i64: 16, 9>}, {pipeline_mode = #tpu.pipeline_mode<synchronous>, transform_indices = @transform_9, window_bounds = array<i64: 112, 128>}, {pipeline_mode = #tpu.pipeline_mode<synchronous>, transform_indices = @transform_10, window_bounds = array<i64: 32, 128>}, {pipeline_mode = #tpu.pipeline_mode<synchronous>, transform_indices = @transform_11, window_bounds = array<i64: 8, 128>}, {transform_indices = @transform_12, window_bounds = array<i64: 2, 1, 128>}]} {
    %c0 = arith.constant 0 : index
    %c0_0 = arith.constant 0 : index
    %0 = vector.load %arg12[%c0, %c0_0] : memref<8x128xf32, #tpu.memory_space<vmem>>, vector<8x128xf32>
    %c0_1 = arith.constant 0 : index
    %c0_2 = arith.constant 0 : index
    %1 = vector.load %arg2[%c0_1, %c0_2] : memref<108x64xf32, #tpu.memory_space<vmem>>, vector<108x64xf32>
    %c0_3 = arith.constant 0 : index
    %c0_4 = arith.constant 0 : index
    %c0_5 = arith.constant 0 : index
    %2 = vector.load %arg1[%c0_3, %c0_4, %c0_5] : memref<2x120x108xf32, #tpu.memory_space<vmem>>, vector<1x120x108xf32>
    %3 = vector.shape_cast %2 : vector<1x120x108xf32> to vector<120x108xf32>
    %cst = arith.constant dense<0.000000e+00> : vector<120x64xf32>
    %4 = tpu.matmul %3, %1, %cst {dimension_numbers = #tpu.dot_dimension_numbers<[1], [0], [0], [1], [0, 0, 1, 1], [], []>} : vector<120x108xf32>, vector<108x64xf32>, vector<120x64xf32> -> vector<120x64xf32>
    %5 = vector.extract_strided_slice %0 {offsets = [0, 0], sizes = [1, 64], strides = [1, 1]} : vector<8x128xf32> to vector<1x64xf32>
    %6 = vector.broadcast %5 : vector<1x64xf32> to vector<120x64xf32>
    %7 = arith.addf %4, %6 : vector<120x64xf32>
    %cst_6 = arith.constant 0.000000e+00 : f32
    %8 = vector.broadcast %cst_6 : f32 to vector<120x64xf32>
    %9 = arith.cmpf oge, %7, %8 : vector<120x64xf32>
    %cst_7 = arith.constant 0.00999999977 : f32
    %10 = vector.broadcast %cst_7 : f32 to vector<120x64xf32>
    %11 = arith.mulf %10, %7 : vector<120x64xf32>
    %12 = arith.select %9, %7, %11 : vector<120x64xi1>, vector<120x64xf32>
    %c0_8 = arith.constant 0 : index
    %c0_9 = arith.constant 0 : index
    %13 = vector.load %arg6[%c0_8, %c0_9] : memref<128x120xf32, #tpu.memory_space<vmem>>, vector<128x120xf32>
    %cst_10 = arith.constant dense<0.000000e+00> : vector<128x64xf32>
    %14 = tpu.matmul %13, %12, %cst_10 {dimension_numbers = #tpu.dot_dimension_numbers<[1], [0], [0], [1], [0, 0, 1, 1], [], []>} : vector<128x120xf32>, vector<120x64xf32>, vector<128x64xf32> -> vector<128x64xf32>
    %15 = vector.extract_strided_slice %14 {offsets = [0, 0], sizes = [61, 64], strides = [1, 1]} : vector<128x64xf32> to vector<61x64xf32>
    %16 = vector.extract_strided_slice %14 {offsets = [64, 0], sizes = [61, 64], strides = [1, 1]} : vector<128x64xf32> to vector<61x64xf32>
    %17 = arith.maximumf %15, %16 : vector<61x64xf32>
    %18 = vector.extract_strided_slice %0 {offsets = [1, 0], sizes = [1, 32], strides = [1, 1]} : vector<8x128xf32> to vector<1x32xf32>
    %19 = vector.extract_strided_slice %17 {offsets = [0, 0], sizes = [57, 64], strides = [1, 1]} : vector<61x64xf32> to vector<57x64xf32>
    %c0_11 = arith.constant 0 : index
    %c0_12 = arith.constant 0 : index
    %c0_13 = arith.constant 0 : index
    %20 = vector.load %arg3[%c0_11, %c0_12, %c0_13] : memref<5x64x32xf32, #tpu.memory_space<vmem>>, vector<1x64x32xf32>
    %21 = vector.shape_cast %20 : vector<1x64x32xf32> to vector<64x32xf32>
    %cst_14 = arith.constant dense<0.000000e+00> : vector<57x32xf32>
    %22 = tpu.matmul %19, %21, %cst_14 {dimension_numbers = #tpu.dot_dimension_numbers<[1], [0], [0], [1], [0, 0, 1, 1], [], []>} : vector<57x64xf32>, vector<64x32xf32>, vector<57x32xf32> -> vector<57x32xf32>
    %23 = vector.extract_strided_slice %17 {offsets = [1, 0], sizes = [57, 64], strides = [1, 1]} : vector<61x64xf32> to vector<57x64xf32>
    %c1 = arith.constant 1 : index
    %c0_15 = arith.constant 0 : index
    %c0_16 = arith.constant 0 : index
    %24 = vector.load %arg3[%c1, %c0_15, %c0_16] : memref<5x64x32xf32, #tpu.memory_space<vmem>>, vector<1x64x32xf32>
    %25 = vector.shape_cast %24 : vector<1x64x32xf32> to vector<64x32xf32>
    %cst_17 = arith.constant dense<0.000000e+00> : vector<57x32xf32>
    %26 = tpu.matmul %23, %25, %cst_17 {dimension_numbers = #tpu.dot_dimension_numbers<[1], [0], [0], [1], [0, 0, 1, 1], [], []>} : vector<57x64xf32>, vector<64x32xf32>, vector<57x32xf32> -> vector<57x32xf32>
    %27 = arith.addf %22, %26 : vector<57x32xf32>
    %28 = vector.extract_strided_slice %17 {offsets = [2, 0], sizes = [57, 64], strides = [1, 1]} : vector<61x64xf32> to vector<57x64xf32>
    %c2 = arith.constant 2 : index
    %c0_18 = arith.constant 0 : index
    %c0_19 = arith.constant 0 : index
    %29 = vector.load %arg3[%c2, %c0_18, %c0_19] : memref<5x64x32xf32, #tpu.memory_space<vmem>>, vector<1x64x32xf32>
    %30 = vector.shape_cast %29 : vector<1x64x32xf32> to vector<64x32xf32>
    %cst_20 = arith.constant dense<0.000000e+00> : vector<57x32xf32>
    %31 = tpu.matmul %28, %30, %cst_20 {dimension_numbers = #tpu.dot_dimension_numbers<[1], [0], [0], [1], [0, 0, 1, 1], [], []>} : vector<57x64xf32>, vector<64x32xf32>, vector<57x32xf32> -> vector<57x32xf32>
    %32 = arith.addf %27, %31 : vector<57x32xf32>
    %33 = vector.extract_strided_slice %17 {offsets = [3, 0], sizes = [57, 64], strides = [1, 1]} : vector<61x64xf32> to vector<57x64xf32>
    %c3 = arith.constant 3 : index
    %c0_21 = arith.constant 0 : index
    %c0_22 = arith.constant 0 : index
    %34 = vector.load %arg3[%c3, %c0_21, %c0_22] : memref<5x64x32xf32, #tpu.memory_space<vmem>>, vector<1x64x32xf32>
    %35 = vector.shape_cast %34 : vector<1x64x32xf32> to vector<64x32xf32>
    %cst_23 = arith.constant dense<0.000000e+00> : vector<57x32xf32>
    %36 = tpu.matmul %33, %35, %cst_23 {dimension_numbers = #tpu.dot_dimension_numbers<[1], [0], [0], [1], [0, 0, 1, 1], [], []>} : vector<57x64xf32>, vector<64x32xf32>, vector<57x32xf32> -> vector<57x32xf32>
    %37 = arith.addf %32, %36 : vector<57x32xf32>
    %38 = vector.extract_strided_slice %17 {offsets = [4, 0], sizes = [57, 64], strides = [1, 1]} : vector<61x64xf32> to vector<57x64xf32>
    %c4 = arith.constant 4 : index
    %c0_24 = arith.constant 0 : index
    %c0_25 = arith.constant 0 : index
    %39 = vector.load %arg3[%c4, %c0_24, %c0_25] : memref<5x64x32xf32, #tpu.memory_space<vmem>>, vector<1x64x32xf32>
    %40 = vector.shape_cast %39 : vector<1x64x32xf32> to vector<64x32xf32>
    %cst_26 = arith.constant dense<0.000000e+00> : vector<57x32xf32>
    %41 = tpu.matmul %38, %40, %cst_26 {dimension_numbers = #tpu.dot_dimension_numbers<[1], [0], [0], [1], [0, 0, 1, 1], [], []>} : vector<57x64xf32>, vector<64x32xf32>, vector<57x32xf32> -> vector<57x32xf32>
    %42 = arith.addf %37, %41 : vector<57x32xf32>
    %43 = vector.broadcast %18 : vector<1x32xf32> to vector<57x32xf32>
    %44 = arith.addf %42, %43 : vector<57x32xf32>
    %cst_27 = arith.constant 0.000000e+00 : f32
    %45 = vector.broadcast %cst_27 : f32 to vector<57x32xf32>
    %46 = arith.cmpf oge, %44, %45 : vector<57x32xf32>
    %cst_28 = arith.constant 0.00999999977 : f32
    %47 = vector.broadcast %cst_28 : f32 to vector<57x32xf32>
    %48 = arith.mulf %47, %44 : vector<57x32xf32>
    %49 = arith.select %46, %44, %48 : vector<57x32xi1>, vector<57x32xf32>
    %c0_29 = arith.constant 0 : index
    %c0_30 = arith.constant 0 : index
    %50 = vector.load %arg7[%c0_29, %c0_30] : memref<64x57xf32, #tpu.memory_space<vmem>>, vector<64x57xf32>
    %cst_31 = arith.constant dense<0.000000e+00> : vector<64x32xf32>
    %51 = tpu.matmul %50, %49, %cst_31 {dimension_numbers = #tpu.dot_dimension_numbers<[1], [0], [0], [1], [0, 0, 1, 1], [], []>} : vector<64x57xf32>, vector<57x32xf32>, vector<64x32xf32> -> vector<64x32xf32>
    %52 = vector.extract_strided_slice %51 {offsets = [0, 0], sizes = [29, 32], strides = [1, 1]} : vector<64x32xf32> to vector<29x32xf32>
    %53 = vector.extract_strided_slice %51 {offsets = [32, 0], sizes = [29, 32], strides = [1, 1]} : vector<64x32xf32> to vector<29x32xf32>
    %54 = arith.maximumf %52, %53 : vector<29x32xf32>
    %55 = vector.extract_strided_slice %0 {offsets = [2, 0], sizes = [1, 32], strides = [1, 1]} : vector<8x128xf32> to vector<1x32xf32>
    %56 = vector.extract_strided_slice %54 {offsets = [0, 0], sizes = [25, 32], strides = [1, 1]} : vector<29x32xf32> to vector<25x32xf32>
    %c0_32 = arith.constant 0 : index
    %c0_33 = arith.constant 0 : index
    %c0_34 = arith.constant 0 : index
    %57 = vector.load %arg4[%c0_32, %c0_33, %c0_34] : memref<5x32x32xf32, #tpu.memory_space<vmem>>, vector<1x32x32xf32>
    %58 = vector.shape_cast %57 : vector<1x32x32xf32> to vector<32x32xf32>
    %cst_35 = arith.constant dense<0.000000e+00> : vector<25x32xf32>
    %59 = tpu.matmul %56, %58, %cst_35 {dimension_numbers = #tpu.dot_dimension_numbers<[1], [0], [0], [1], [0, 0, 1, 1], [], []>} : vector<25x32xf32>, vector<32x32xf32>, vector<25x32xf32> -> vector<25x32xf32>
    %60 = vector.extract_strided_slice %54 {offsets = [1, 0], sizes = [25, 32], strides = [1, 1]} : vector<29x32xf32> to vector<25x32xf32>
    %c1_36 = arith.constant 1 : index
    %c0_37 = arith.constant 0 : index
    %c0_38 = arith.constant 0 : index
    %61 = vector.load %arg4[%c1_36, %c0_37, %c0_38] : memref<5x32x32xf32, #tpu.memory_space<vmem>>, vector<1x32x32xf32>
    %62 = vector.shape_cast %61 : vector<1x32x32xf32> to vector<32x32xf32>
    %cst_39 = arith.constant dense<0.000000e+00> : vector<25x32xf32>
    %63 = tpu.matmul %60, %62, %cst_39 {dimension_numbers = #tpu.dot_dimension_numbers<[1], [0], [0], [1], [0, 0, 1, 1], [], []>} : vector<25x32xf32>, vector<32x32xf32>, vector<25x32xf32> -> vector<25x32xf32>
    %64 = arith.addf %59, %63 : vector<25x32xf32>
    %65 = vector.extract_strided_slice %54 {offsets = [2, 0], sizes = [25, 32], strides = [1, 1]} : vector<29x32xf32> to vector<25x32xf32>
    %c2_40 = arith.constant 2 : index
    %c0_41 = arith.constant 0 : index
    %c0_42 = arith.constant 0 : index
    %66 = vector.load %arg4[%c2_40, %c0_41, %c0_42] : memref<5x32x32xf32, #tpu.memory_space<vmem>>, vector<1x32x32xf32>
    %67 = vector.shape_cast %66 : vector<1x32x32xf32> to vector<32x32xf32>
    %cst_43 = arith.constant dense<0.000000e+00> : vector<25x32xf32>
    %68 = tpu.matmul %65, %67, %cst_43 {dimension_numbers = #tpu.dot_dimension_numbers<[1], [0], [0], [1], [0, 0, 1, 1], [], []>} : vector<25x32xf32>, vector<32x32xf32>, vector<25x32xf32> -> vector<25x32xf32>
    %69 = arith.addf %64, %68 : vector<25x32xf32>
    %70 = vector.extract_strided_slice %54 {offsets = [3, 0], sizes = [25, 32], strides = [1, 1]} : vector<29x32xf32> to vector<25x32xf32>
    %c3_44 = arith.constant 3 : index
    %c0_45 = arith.constant 0 : index
    %c0_46 = arith.constant 0 : index
    %71 = vector.load %arg4[%c3_44, %c0_45, %c0_46] : memref<5x32x32xf32, #tpu.memory_space<vmem>>, vector<1x32x32xf32>
    %72 = vector.shape_cast %71 : vector<1x32x32xf32> to vector<32x32xf32>
    %cst_47 = arith.constant dense<0.000000e+00> : vector<25x32xf32>
    %73 = tpu.matmul %70, %72, %cst_47 {dimension_numbers = #tpu.dot_dimension_numbers<[1], [0], [0], [1], [0, 0, 1, 1], [], []>} : vector<25x32xf32>, vector<32x32xf32>, vector<25x32xf32> -> vector<25x32xf32>
    %74 = arith.addf %69, %73 : vector<25x32xf32>
    %75 = vector.extract_strided_slice %54 {offsets = [4, 0], sizes = [25, 32], strides = [1, 1]} : vector<29x32xf32> to vector<25x32xf32>
    %c4_48 = arith.constant 4 : index
    %c0_49 = arith.constant 0 : index
    %c0_50 = arith.constant 0 : index
    %76 = vector.load %arg4[%c4_48, %c0_49, %c0_50] : memref<5x32x32xf32, #tpu.memory_space<vmem>>, vector<1x32x32xf32>
    %77 = vector.shape_cast %76 : vector<1x32x32xf32> to vector<32x32xf32>
    %cst_51 = arith.constant dense<0.000000e+00> : vector<25x32xf32>
    %78 = tpu.matmul %75, %77, %cst_51 {dimension_numbers = #tpu.dot_dimension_numbers<[1], [0], [0], [1], [0, 0, 1, 1], [], []>} : vector<25x32xf32>, vector<32x32xf32>, vector<25x32xf32> -> vector<25x32xf32>
    %79 = arith.addf %74, %78 : vector<25x32xf32>
    %80 = vector.broadcast %55 : vector<1x32xf32> to vector<25x32xf32>
    %81 = arith.addf %79, %80 : vector<25x32xf32>
    %cst_52 = arith.constant 0.000000e+00 : f32
    %82 = vector.broadcast %cst_52 : f32 to vector<25x32xf32>
    %83 = arith.cmpf oge, %81, %82 : vector<25x32xf32>
    %cst_53 = arith.constant 0.00999999977 : f32
    %84 = vector.broadcast %cst_53 : f32 to vector<25x32xf32>
    %85 = arith.mulf %84, %81 : vector<25x32xf32>
    %86 = arith.select %83, %81, %85 : vector<25x32xi1>, vector<25x32xf32>
    %c0_54 = arith.constant 0 : index
    %c0_55 = arith.constant 0 : index
    %87 = vector.load %arg8[%c0_54, %c0_55] : memref<32x25xf32, #tpu.memory_space<vmem>>, vector<32x25xf32>
    %cst_56 = arith.constant dense<0.000000e+00> : vector<32x32xf32>
    %88 = tpu.matmul %87, %86, %cst_56 {dimension_numbers = #tpu.dot_dimension_numbers<[1], [0], [0], [1], [0, 0, 1, 1], [], []>} : vector<32x25xf32>, vector<25x32xf32>, vector<32x32xf32> -> vector<32x32xf32>
    %89 = vector.extract_strided_slice %88 {offsets = [0, 0], sizes = [13, 32], strides = [1, 1]} : vector<32x32xf32> to vector<13x32xf32>
    %90 = vector.extract_strided_slice %88 {offsets = [16, 0], sizes = [13, 32], strides = [1, 1]} : vector<32x32xf32> to vector<13x32xf32>
    %91 = arith.maximumf %89, %90 : vector<13x32xf32>
    %92 = vector.extract_strided_slice %0 {offsets = [3, 0], sizes = [1, 16], strides = [1, 1]} : vector<8x128xf32> to vector<1x16xf32>
    %93 = vector.extract_strided_slice %91 {offsets = [0, 0], sizes = [9, 32], strides = [1, 1]} : vector<13x32xf32> to vector<9x32xf32>
    %c0_57 = arith.constant 0 : index
    %c0_58 = arith.constant 0 : index
    %c0_59 = arith.constant 0 : index
    %94 = vector.load %arg5[%c0_57, %c0_58, %c0_59] : memref<5x32x16xf32, #tpu.memory_space<vmem>>, vector<1x32x16xf32>
    %95 = vector.shape_cast %94 : vector<1x32x16xf32> to vector<32x16xf32>
    %cst_60 = arith.constant dense<0.000000e+00> : vector<9x16xf32>
    %96 = tpu.matmul %93, %95, %cst_60 {dimension_numbers = #tpu.dot_dimension_numbers<[1], [0], [0], [1], [0, 0, 1, 1], [], []>} : vector<9x32xf32>, vector<32x16xf32>, vector<9x16xf32> -> vector<9x16xf32>
    %97 = vector.extract_strided_slice %91 {offsets = [1, 0], sizes = [9, 32], strides = [1, 1]} : vector<13x32xf32> to vector<9x32xf32>
    %c1_61 = arith.constant 1 : index
    %c0_62 = arith.constant 0 : index
    %c0_63 = arith.constant 0 : index
    %98 = vector.load %arg5[%c1_61, %c0_62, %c0_63] : memref<5x32x16xf32, #tpu.memory_space<vmem>>, vector<1x32x16xf32>
    %99 = vector.shape_cast %98 : vector<1x32x16xf32> to vector<32x16xf32>
    %cst_64 = arith.constant dense<0.000000e+00> : vector<9x16xf32>
    %100 = tpu.matmul %97, %99, %cst_64 {dimension_numbers = #tpu.dot_dimension_numbers<[1], [0], [0], [1], [0, 0, 1, 1], [], []>} : vector<9x32xf32>, vector<32x16xf32>, vector<9x16xf32> -> vector<9x16xf32>
    %101 = arith.addf %96, %100 : vector<9x16xf32>
    %102 = vector.extract_strided_slice %91 {offsets = [2, 0], sizes = [9, 32], strides = [1, 1]} : vector<13x32xf32> to vector<9x32xf32>
    %c2_65 = arith.constant 2 : index
    %c0_66 = arith.constant 0 : index
    %c0_67 = arith.constant 0 : index
    %103 = vector.load %arg5[%c2_65, %c0_66, %c0_67] : memref<5x32x16xf32, #tpu.memory_space<vmem>>, vector<1x32x16xf32>
    %104 = vector.shape_cast %103 : vector<1x32x16xf32> to vector<32x16xf32>
    %cst_68 = arith.constant dense<0.000000e+00> : vector<9x16xf32>
    %105 = tpu.matmul %102, %104, %cst_68 {dimension_numbers = #tpu.dot_dimension_numbers<[1], [0], [0], [1], [0, 0, 1, 1], [], []>} : vector<9x32xf32>, vector<32x16xf32>, vector<9x16xf32> -> vector<9x16xf32>
    %106 = arith.addf %101, %105 : vector<9x16xf32>
    %107 = vector.extract_strided_slice %91 {offsets = [3, 0], sizes = [9, 32], strides = [1, 1]} : vector<13x32xf32> to vector<9x32xf32>
    %c3_69 = arith.constant 3 : index
    %c0_70 = arith.constant 0 : index
    %c0_71 = arith.constant 0 : index
    %108 = vector.load %arg5[%c3_69, %c0_70, %c0_71] : memref<5x32x16xf32, #tpu.memory_space<vmem>>, vector<1x32x16xf32>
    %109 = vector.shape_cast %108 : vector<1x32x16xf32> to vector<32x16xf32>
    %cst_72 = arith.constant dense<0.000000e+00> : vector<9x16xf32>
    %110 = tpu.matmul %107, %109, %cst_72 {dimension_numbers = #tpu.dot_dimension_numbers<[1], [0], [0], [1], [0, 0, 1, 1], [], []>} : vector<9x32xf32>, vector<32x16xf32>, vector<9x16xf32> -> vector<9x16xf32>
    %111 = arith.addf %106, %110 : vector<9x16xf32>
    %112 = vector.extract_strided_slice %91 {offsets = [4, 0], sizes = [9, 32], strides = [1, 1]} : vector<13x32xf32> to vector<9x32xf32>
    %c4_73 = arith.constant 4 : index
    %c0_74 = arith.constant 0 : index
    %c0_75 = arith.constant 0 : index
    %113 = vector.load %arg5[%c4_73, %c0_74, %c0_75] : memref<5x32x16xf32, #tpu.memory_space<vmem>>, vector<1x32x16xf32>
    %114 = vector.shape_cast %113 : vector<1x32x16xf32> to vector<32x16xf32>
    %cst_76 = arith.constant dense<0.000000e+00> : vector<9x16xf32>
    %115 = tpu.matmul %112, %114, %cst_76 {dimension_numbers = #tpu.dot_dimension_numbers<[1], [0], [0], [1], [0, 0, 1, 1], [], []>} : vector<9x32xf32>, vector<32x16xf32>, vector<9x16xf32> -> vector<9x16xf32>
    %116 = arith.addf %111, %115 : vector<9x16xf32>
    %117 = vector.broadcast %92 : vector<1x16xf32> to vector<9x16xf32>
    %118 = arith.addf %116, %117 : vector<9x16xf32>
    %cst_77 = arith.constant 0.000000e+00 : f32
    %119 = vector.broadcast %cst_77 : f32 to vector<9x16xf32>
    %120 = arith.cmpf oge, %118, %119 : vector<9x16xf32>
    %cst_78 = arith.constant 0.00999999977 : f32
    %121 = vector.broadcast %cst_78 : f32 to vector<9x16xf32>
    %122 = arith.mulf %121, %118 : vector<9x16xf32>
    %123 = arith.select %120, %118, %122 : vector<9x16xi1>, vector<9x16xf32>
    %c0_79 = arith.constant 0 : index
    %c0_80 = arith.constant 0 : index
    %124 = vector.load %arg9[%c0_79, %c0_80] : memref<16x9xf32, #tpu.memory_space<vmem>>, vector<16x9xf32>
    %cst_81 = arith.constant dense<0.000000e+00> : vector<16x16xf32>
    %125 = tpu.matmul %124, %123, %cst_81 {dimension_numbers = #tpu.dot_dimension_numbers<[1], [0], [0], [1], [0, 0, 1, 1], [], []>} : vector<16x9xf32>, vector<9x16xf32>, vector<16x16xf32> -> vector<16x16xf32>
    %126 = vector.extract_strided_slice %125 {offsets = [0, 0], sizes = [5, 16], strides = [1, 1]} : vector<16x16xf32> to vector<5x16xf32>
    %127 = vector.extract_strided_slice %125 {offsets = [8, 0], sizes = [5, 16], strides = [1, 1]} : vector<16x16xf32> to vector<5x16xf32>
    %128 = arith.maximumf %126, %127 : vector<5x16xf32>
    %c1_82 = arith.constant 1 : index
    %c0_83 = arith.constant 0 : index
    %c0_84 = arith.constant 0 : index
    %129 = vector.load %arg1[%c1_82, %c0_83, %c0_84] : memref<2x120x108xf32, #tpu.memory_space<vmem>>, vector<1x120x108xf32>
    %130 = vector.shape_cast %129 : vector<1x120x108xf32> to vector<120x108xf32>
    %cst_85 = arith.constant dense<0.000000e+00> : vector<120x64xf32>
    %131 = tpu.matmul %130, %1, %cst_85 {dimension_numbers = #tpu.dot_dimension_numbers<[1], [0], [0], [1], [0, 0, 1, 1], [], []>} : vector<120x108xf32>, vector<108x64xf32>, vector<120x64xf32> -> vector<120x64xf32>
    %132 = vector.extract_strided_slice %0 {offsets = [0, 0], sizes = [1, 64], strides = [1, 1]} : vector<8x128xf32> to vector<1x64xf32>
    %133 = vector.broadcast %132 : vector<1x64xf32> to vector<120x64xf32>
    %134 = arith.addf %131, %133 : vector<120x64xf32>
    %cst_86 = arith.constant 0.000000e+00 : f32
    %135 = vector.broadcast %cst_86 : f32 to vector<120x64xf32>
    %136 = arith.cmpf oge, %134, %135 : vector<120x64xf32>
    %cst_87 = arith.constant 0.00999999977 : f32
    %137 = vector.broadcast %cst_87 : f32 to vector<120x64xf32>
    %138 = arith.mulf %137, %134 : vector<120x64xf32>
    %139 = arith.select %136, %134, %138 : vector<120x64xi1>, vector<120x64xf32>
    %c0_88 = arith.constant 0 : index
    %c0_89 = arith.constant 0 : index
    %140 = vector.load %arg6[%c0_88, %c0_89] : memref<128x120xf32, #tpu.memory_space<vmem>>, vector<128x120xf32>
    %cst_90 = arith.constant dense<0.000000e+00> : vector<128x64xf32>
    %141 = tpu.matmul %140, %139, %cst_90 {dimension_numbers = #tpu.dot_dimension_numbers<[1], [0], [0], [1], [0, 0, 1, 1], [], []>} : vector<128x120xf32>, vector<120x64xf32>, vector<128x64xf32> -> vector<128x64xf32>
    %142 = vector.extract_strided_slice %141 {offsets = [0, 0], sizes = [61, 64], strides = [1, 1]} : vector<128x64xf32> to vector<61x64xf32>
    %143 = vector.extract_strided_slice %141 {offsets = [64, 0], sizes = [61, 64], strides = [1, 1]} : vector<128x64xf32> to vector<61x64xf32>
    %144 = arith.maximumf %142, %143 : vector<61x64xf32>
    %145 = vector.extract_strided_slice %0 {offsets = [1, 0], sizes = [1, 32], strides = [1, 1]} : vector<8x128xf32> to vector<1x32xf32>
    %146 = vector.extract_strided_slice %144 {offsets = [0, 0], sizes = [57, 64], strides = [1, 1]} : vector<61x64xf32> to vector<57x64xf32>
    %c0_91 = arith.constant 0 : index
    %c0_92 = arith.constant 0 : index
    %c0_93 = arith.constant 0 : index
    %147 = vector.load %arg3[%c0_91, %c0_92, %c0_93] : memref<5x64x32xf32, #tpu.memory_space<vmem>>, vector<1x64x32xf32>
    %148 = vector.shape_cast %147 : vector<1x64x32xf32> to vector<64x32xf32>
    %cst_94 = arith.constant dense<0.000000e+00> : vector<57x32xf32>
    %149 = tpu.matmul %146, %148, %cst_94 {dimension_numbers = #tpu.dot_dimension_numbers<[1], [0], [0], [1], [0, 0, 1, 1], [], []>} : vector<57x64xf32>, vector<64x32xf32>, vector<57x32xf32> -> vector<57x32xf32>
    %150 = vector.extract_strided_slice %144 {offsets = [1, 0], sizes = [57, 64], strides = [1, 1]} : vector<61x64xf32> to vector<57x64xf32>
    %c1_95 = arith.constant 1 : index
    %c0_96 = arith.constant 0 : index
    %c0_97 = arith.constant 0 : index
    %151 = vector.load %arg3[%c1_95, %c0_96, %c0_97] : memref<5x64x32xf32, #tpu.memory_space<vmem>>, vector<1x64x32xf32>
    %152 = vector.shape_cast %151 : vector<1x64x32xf32> to vector<64x32xf32>
    %cst_98 = arith.constant dense<0.000000e+00> : vector<57x32xf32>
    %153 = tpu.matmul %150, %152, %cst_98 {dimension_numbers = #tpu.dot_dimension_numbers<[1], [0], [0], [1], [0, 0, 1, 1], [], []>} : vector<57x64xf32>, vector<64x32xf32>, vector<57x32xf32> -> vector<57x32xf32>
    %154 = arith.addf %149, %153 : vector<57x32xf32>
    %155 = vector.extract_strided_slice %144 {offsets = [2, 0], sizes = [57, 64], strides = [1, 1]} : vector<61x64xf32> to vector<57x64xf32>
    %c2_99 = arith.constant 2 : index
    %c0_100 = arith.constant 0 : index
    %c0_101 = arith.constant 0 : index
    %156 = vector.load %arg3[%c2_99, %c0_100, %c0_101] : memref<5x64x32xf32, #tpu.memory_space<vmem>>, vector<1x64x32xf32>
    %157 = vector.shape_cast %156 : vector<1x64x32xf32> to vector<64x32xf32>
    %cst_102 = arith.constant dense<0.000000e+00> : vector<57x32xf32>
    %158 = tpu.matmul %155, %157, %cst_102 {dimension_numbers = #tpu.dot_dimension_numbers<[1], [0], [0], [1], [0, 0, 1, 1], [], []>} : vector<57x64xf32>, vector<64x32xf32>, vector<57x32xf32> -> vector<57x32xf32>
    %159 = arith.addf %154, %158 : vector<57x32xf32>
    %160 = vector.extract_strided_slice %144 {offsets = [3, 0], sizes = [57, 64], strides = [1, 1]} : vector<61x64xf32> to vector<57x64xf32>
    %c3_103 = arith.constant 3 : index
    %c0_104 = arith.constant 0 : index
    %c0_105 = arith.constant 0 : index
    %161 = vector.load %arg3[%c3_103, %c0_104, %c0_105] : memref<5x64x32xf32, #tpu.memory_space<vmem>>, vector<1x64x32xf32>
    %162 = vector.shape_cast %161 : vector<1x64x32xf32> to vector<64x32xf32>
    %cst_106 = arith.constant dense<0.000000e+00> : vector<57x32xf32>
    %163 = tpu.matmul %160, %162, %cst_106 {dimension_numbers = #tpu.dot_dimension_numbers<[1], [0], [0], [1], [0, 0, 1, 1], [], []>} : vector<57x64xf32>, vector<64x32xf32>, vector<57x32xf32> -> vector<57x32xf32>
    %164 = arith.addf %159, %163 : vector<57x32xf32>
    %165 = vector.extract_strided_slice %144 {offsets = [4, 0], sizes = [57, 64], strides = [1, 1]} : vector<61x64xf32> to vector<57x64xf32>
    %c4_107 = arith.constant 4 : index
    %c0_108 = arith.constant 0 : index
    %c0_109 = arith.constant 0 : index
    %166 = vector.load %arg3[%c4_107, %c0_108, %c0_109] : memref<5x64x32xf32, #tpu.memory_space<vmem>>, vector<1x64x32xf32>
    %167 = vector.shape_cast %166 : vector<1x64x32xf32> to vector<64x32xf32>
    %cst_110 = arith.constant dense<0.000000e+00> : vector<57x32xf32>
    %168 = tpu.matmul %165, %167, %cst_110 {dimension_numbers = #tpu.dot_dimension_numbers<[1], [0], [0], [1], [0, 0, 1, 1], [], []>} : vector<57x64xf32>, vector<64x32xf32>, vector<57x32xf32> -> vector<57x32xf32>
    %169 = arith.addf %164, %168 : vector<57x32xf32>
    %170 = vector.broadcast %145 : vector<1x32xf32> to vector<57x32xf32>
    %171 = arith.addf %169, %170 : vector<57x32xf32>
    %cst_111 = arith.constant 0.000000e+00 : f32
    %172 = vector.broadcast %cst_111 : f32 to vector<57x32xf32>
    %173 = arith.cmpf oge, %171, %172 : vector<57x32xf32>
    %cst_112 = arith.constant 0.00999999977 : f32
    %174 = vector.broadcast %cst_112 : f32 to vector<57x32xf32>
    %175 = arith.mulf %174, %171 : vector<57x32xf32>
    %176 = arith.select %173, %171, %175 : vector<57x32xi1>, vector<57x32xf32>
    %c0_113 = arith.constant 0 : index
    %c0_114 = arith.constant 0 : index
    %177 = vector.load %arg7[%c0_113, %c0_114] : memref<64x57xf32, #tpu.memory_space<vmem>>, vector<64x57xf32>
    %cst_115 = arith.constant dense<0.000000e+00> : vector<64x32xf32>
    %178 = tpu.matmul %177, %176, %cst_115 {dimension_numbers = #tpu.dot_dimension_numbers<[1], [0], [0], [1], [0, 0, 1, 1], [], []>} : vector<64x57xf32>, vector<57x32xf32>, vector<64x32xf32> -> vector<64x32xf32>
    %179 = vector.extract_strided_slice %178 {offsets = [0, 0], sizes = [29, 32], strides = [1, 1]} : vector<64x32xf32> to vector<29x32xf32>
    %180 = vector.extract_strided_slice %178 {offsets = [32, 0], sizes = [29, 32], strides = [1, 1]} : vector<64x32xf32> to vector<29x32xf32>
    %181 = arith.maximumf %179, %180 : vector<29x32xf32>
    %182 = vector.extract_strided_slice %0 {offsets = [2, 0], sizes = [1, 32], strides = [1, 1]} : vector<8x128xf32> to vector<1x32xf32>
    %183 = vector.extract_strided_slice %181 {offsets = [0, 0], sizes = [25, 32], strides = [1, 1]} : vector<29x32xf32> to vector<25x32xf32>
    %c0_116 = arith.constant 0 : index
    %c0_117 = arith.constant 0 : index
    %c0_118 = arith.constant 0 : index
    %184 = vector.load %arg4[%c0_116, %c0_117, %c0_118] : memref<5x32x32xf32, #tpu.memory_space<vmem>>, vector<1x32x32xf32>
    %185 = vector.shape_cast %184 : vector<1x32x32xf32> to vector<32x32xf32>
    %cst_119 = arith.constant dense<0.000000e+00> : vector<25x32xf32>
    %186 = tpu.matmul %183, %185, %cst_119 {dimension_numbers = #tpu.dot_dimension_numbers<[1], [0], [0], [1], [0, 0, 1, 1], [], []>} : vector<25x32xf32>, vector<32x32xf32>, vector<25x32xf32> -> vector<25x32xf32>
    %187 = vector.extract_strided_slice %181 {offsets = [1, 0], sizes = [25, 32], strides = [1, 1]} : vector<29x32xf32> to vector<25x32xf32>
    %c1_120 = arith.constant 1 : index
    %c0_121 = arith.constant 0 : index
    %c0_122 = arith.constant 0 : index
    %188 = vector.load %arg4[%c1_120, %c0_121, %c0_122] : memref<5x32x32xf32, #tpu.memory_space<vmem>>, vector<1x32x32xf32>
    %189 = vector.shape_cast %188 : vector<1x32x32xf32> to vector<32x32xf32>
    %cst_123 = arith.constant dense<0.000000e+00> : vector<25x32xf32>
    %190 = tpu.matmul %187, %189, %cst_123 {dimension_numbers = #tpu.dot_dimension_numbers<[1], [0], [0], [1], [0, 0, 1, 1], [], []>} : vector<25x32xf32>, vector<32x32xf32>, vector<25x32xf32> -> vector<25x32xf32>
    %191 = arith.addf %186, %190 : vector<25x32xf32>
    %192 = vector.extract_strided_slice %181 {offsets = [2, 0], sizes = [25, 32], strides = [1, 1]} : vector<29x32xf32> to vector<25x32xf32>
    %c2_124 = arith.constant 2 : index
    %c0_125 = arith.constant 0 : index
    %c0_126 = arith.constant 0 : index
    %193 = vector.load %arg4[%c2_124, %c0_125, %c0_126] : memref<5x32x32xf32, #tpu.memory_space<vmem>>, vector<1x32x32xf32>
    %194 = vector.shape_cast %193 : vector<1x32x32xf32> to vector<32x32xf32>
    %cst_127 = arith.constant dense<0.000000e+00> : vector<25x32xf32>
    %195 = tpu.matmul %192, %194, %cst_127 {dimension_numbers = #tpu.dot_dimension_numbers<[1], [0], [0], [1], [0, 0, 1, 1], [], []>} : vector<25x32xf32>, vector<32x32xf32>, vector<25x32xf32> -> vector<25x32xf32>
    %196 = arith.addf %191, %195 : vector<25x32xf32>
    %197 = vector.extract_strided_slice %181 {offsets = [3, 0], sizes = [25, 32], strides = [1, 1]} : vector<29x32xf32> to vector<25x32xf32>
    %c3_128 = arith.constant 3 : index
    %c0_129 = arith.constant 0 : index
    %c0_130 = arith.constant 0 : index
    %198 = vector.load %arg4[%c3_128, %c0_129, %c0_130] : memref<5x32x32xf32, #tpu.memory_space<vmem>>, vector<1x32x32xf32>
    %199 = vector.shape_cast %198 : vector<1x32x32xf32> to vector<32x32xf32>
    %cst_131 = arith.constant dense<0.000000e+00> : vector<25x32xf32>
    %200 = tpu.matmul %197, %199, %cst_131 {dimension_numbers = #tpu.dot_dimension_numbers<[1], [0], [0], [1], [0, 0, 1, 1], [], []>} : vector<25x32xf32>, vector<32x32xf32>, vector<25x32xf32> -> vector<25x32xf32>
    %201 = arith.addf %196, %200 : vector<25x32xf32>
    %202 = vector.extract_strided_slice %181 {offsets = [4, 0], sizes = [25, 32], strides = [1, 1]} : vector<29x32xf32> to vector<25x32xf32>
    %c4_132 = arith.constant 4 : index
    %c0_133 = arith.constant 0 : index
    %c0_134 = arith.constant 0 : index
    %203 = vector.load %arg4[%c4_132, %c0_133, %c0_134] : memref<5x32x32xf32, #tpu.memory_space<vmem>>, vector<1x32x32xf32>
    %204 = vector.shape_cast %203 : vector<1x32x32xf32> to vector<32x32xf32>
    %cst_135 = arith.constant dense<0.000000e+00> : vector<25x32xf32>
    %205 = tpu.matmul %202, %204, %cst_135 {dimension_numbers = #tpu.dot_dimension_numbers<[1], [0], [0], [1], [0, 0, 1, 1], [], []>} : vector<25x32xf32>, vector<32x32xf32>, vector<25x32xf32> -> vector<25x32xf32>
    %206 = arith.addf %201, %205 : vector<25x32xf32>
    %207 = vector.broadcast %182 : vector<1x32xf32> to vector<25x32xf32>
    %208 = arith.addf %206, %207 : vector<25x32xf32>
    %cst_136 = arith.constant 0.000000e+00 : f32
    %209 = vector.broadcast %cst_136 : f32 to vector<25x32xf32>
    %210 = arith.cmpf oge, %208, %209 : vector<25x32xf32>
    %cst_137 = arith.constant 0.00999999977 : f32
    %211 = vector.broadcast %cst_137 : f32 to vector<25x32xf32>
    %212 = arith.mulf %211, %208 : vector<25x32xf32>
    %213 = arith.select %210, %208, %212 : vector<25x32xi1>, vector<25x32xf32>
    %c0_138 = arith.constant 0 : index
    %c0_139 = arith.constant 0 : index
    %214 = vector.load %arg8[%c0_138, %c0_139] : memref<32x25xf32, #tpu.memory_space<vmem>>, vector<32x25xf32>
    %cst_140 = arith.constant dense<0.000000e+00> : vector<32x32xf32>
    %215 = tpu.matmul %214, %213, %cst_140 {dimension_numbers = #tpu.dot_dimension_numbers<[1], [0], [0], [1], [0, 0, 1, 1], [], []>} : vector<32x25xf32>, vector<25x32xf32>, vector<32x32xf32> -> vector<32x32xf32>
    %216 = vector.extract_strided_slice %215 {offsets = [0, 0], sizes = [13, 32], strides = [1, 1]} : vector<32x32xf32> to vector<13x32xf32>
    %217 = vector.extract_strided_slice %215 {offsets = [16, 0], sizes = [13, 32], strides = [1, 1]} : vector<32x32xf32> to vector<13x32xf32>
    %218 = arith.maximumf %216, %217 : vector<13x32xf32>
    %219 = vector.extract_strided_slice %0 {offsets = [3, 0], sizes = [1, 16], strides = [1, 1]} : vector<8x128xf32> to vector<1x16xf32>
    %220 = vector.extract_strided_slice %218 {offsets = [0, 0], sizes = [9, 32], strides = [1, 1]} : vector<13x32xf32> to vector<9x32xf32>
    %c0_141 = arith.constant 0 : index
    %c0_142 = arith.constant 0 : index
    %c0_143 = arith.constant 0 : index
    %221 = vector.load %arg5[%c0_141, %c0_142, %c0_143] : memref<5x32x16xf32, #tpu.memory_space<vmem>>, vector<1x32x16xf32>
    %222 = vector.shape_cast %221 : vector<1x32x16xf32> to vector<32x16xf32>
    %cst_144 = arith.constant dense<0.000000e+00> : vector<9x16xf32>
    %223 = tpu.matmul %220, %222, %cst_144 {dimension_numbers = #tpu.dot_dimension_numbers<[1], [0], [0], [1], [0, 0, 1, 1], [], []>} : vector<9x32xf32>, vector<32x16xf32>, vector<9x16xf32> -> vector<9x16xf32>
    %224 = vector.extract_strided_slice %218 {offsets = [1, 0], sizes = [9, 32], strides = [1, 1]} : vector<13x32xf32> to vector<9x32xf32>
    %c1_145 = arith.constant 1 : index
    %c0_146 = arith.constant 0 : index
    %c0_147 = arith.constant 0 : index
    %225 = vector.load %arg5[%c1_145, %c0_146, %c0_147] : memref<5x32x16xf32, #tpu.memory_space<vmem>>, vector<1x32x16xf32>
    %226 = vector.shape_cast %225 : vector<1x32x16xf32> to vector<32x16xf32>
    %cst_148 = arith.constant dense<0.000000e+00> : vector<9x16xf32>
    %227 = tpu.matmul %224, %226, %cst_148 {dimension_numbers = #tpu.dot_dimension_numbers<[1], [0], [0], [1], [0, 0, 1, 1], [], []>} : vector<9x32xf32>, vector<32x16xf32>, vector<9x16xf32> -> vector<9x16xf32>
    %228 = arith.addf %223, %227 : vector<9x16xf32>
    %229 = vector.extract_strided_slice %218 {offsets = [2, 0], sizes = [9, 32], strides = [1, 1]} : vector<13x32xf32> to vector<9x32xf32>
    %c2_149 = arith.constant 2 : index
    %c0_150 = arith.constant 0 : index
    %c0_151 = arith.constant 0 : index
    %230 = vector.load %arg5[%c2_149, %c0_150, %c0_151] : memref<5x32x16xf32, #tpu.memory_space<vmem>>, vector<1x32x16xf32>
    %231 = vector.shape_cast %230 : vector<1x32x16xf32> to vector<32x16xf32>
    %cst_152 = arith.constant dense<0.000000e+00> : vector<9x16xf32>
    %232 = tpu.matmul %229, %231, %cst_152 {dimension_numbers = #tpu.dot_dimension_numbers<[1], [0], [0], [1], [0, 0, 1, 1], [], []>} : vector<9x32xf32>, vector<32x16xf32>, vector<9x16xf32> -> vector<9x16xf32>
    %233 = arith.addf %228, %232 : vector<9x16xf32>
    %234 = vector.extract_strided_slice %218 {offsets = [3, 0], sizes = [9, 32], strides = [1, 1]} : vector<13x32xf32> to vector<9x32xf32>
    %c3_153 = arith.constant 3 : index
    %c0_154 = arith.constant 0 : index
    %c0_155 = arith.constant 0 : index
    %235 = vector.load %arg5[%c3_153, %c0_154, %c0_155] : memref<5x32x16xf32, #tpu.memory_space<vmem>>, vector<1x32x16xf32>
    %236 = vector.shape_cast %235 : vector<1x32x16xf32> to vector<32x16xf32>
    %cst_156 = arith.constant dense<0.000000e+00> : vector<9x16xf32>
    %237 = tpu.matmul %234, %236, %cst_156 {dimension_numbers = #tpu.dot_dimension_numbers<[1], [0], [0], [1], [0, 0, 1, 1], [], []>} : vector<9x32xf32>, vector<32x16xf32>, vector<9x16xf32> -> vector<9x16xf32>
    %238 = arith.addf %233, %237 : vector<9x16xf32>
    %239 = vector.extract_strided_slice %218 {offsets = [4, 0], sizes = [9, 32], strides = [1, 1]} : vector<13x32xf32> to vector<9x32xf32>
    %c4_157 = arith.constant 4 : index
    %c0_158 = arith.constant 0 : index
    %c0_159 = arith.constant 0 : index
    %240 = vector.load %arg5[%c4_157, %c0_158, %c0_159] : memref<5x32x16xf32, #tpu.memory_space<vmem>>, vector<1x32x16xf32>
    %241 = vector.shape_cast %240 : vector<1x32x16xf32> to vector<32x16xf32>
    %cst_160 = arith.constant dense<0.000000e+00> : vector<9x16xf32>
    %242 = tpu.matmul %239, %241, %cst_160 {dimension_numbers = #tpu.dot_dimension_numbers<[1], [0], [0], [1], [0, 0, 1, 1], [], []>} : vector<9x32xf32>, vector<32x16xf32>, vector<9x16xf32> -> vector<9x16xf32>
    %243 = arith.addf %238, %242 : vector<9x16xf32>
    %244 = vector.broadcast %219 : vector<1x16xf32> to vector<9x16xf32>
    %245 = arith.addf %243, %244 : vector<9x16xf32>
    %cst_161 = arith.constant 0.000000e+00 : f32
    %246 = vector.broadcast %cst_161 : f32 to vector<9x16xf32>
    %247 = arith.cmpf oge, %245, %246 : vector<9x16xf32>
    %cst_162 = arith.constant 0.00999999977 : f32
    %248 = vector.broadcast %cst_162 : f32 to vector<9x16xf32>
    %249 = arith.mulf %248, %245 : vector<9x16xf32>
    %250 = arith.select %247, %245, %249 : vector<9x16xi1>, vector<9x16xf32>
    %c0_163 = arith.constant 0 : index
    %c0_164 = arith.constant 0 : index
    %251 = vector.load %arg9[%c0_163, %c0_164] : memref<16x9xf32, #tpu.memory_space<vmem>>, vector<16x9xf32>
    %cst_165 = arith.constant dense<0.000000e+00> : vector<16x16xf32>
    %252 = tpu.matmul %251, %250, %cst_165 {dimension_numbers = #tpu.dot_dimension_numbers<[1], [0], [0], [1], [0, 0, 1, 1], [], []>} : vector<16x9xf32>, vector<9x16xf32>, vector<16x16xf32> -> vector<16x16xf32>
    %253 = vector.extract_strided_slice %252 {offsets = [0, 0], sizes = [5, 16], strides = [1, 1]} : vector<16x16xf32> to vector<5x16xf32>
    %254 = vector.extract_strided_slice %252 {offsets = [8, 0], sizes = [5, 16], strides = [1, 1]} : vector<16x16xf32> to vector<5x16xf32>
    %255 = arith.maximumf %253, %254 : vector<5x16xf32>
    %c0_166 = arith.constant 0 : index
    %c0_167 = arith.constant 0 : index
    %256 = vector.load %arg10[%c0_166, %c0_167] : memref<112x128xf32, #tpu.memory_space<vmem>>, vector<112x128xf32>
    %257 = vector.extract_strided_slice %256 {offsets = [0, 0], sizes = [16, 128], strides = [1, 1]} : vector<112x128xf32> to vector<16x128xf32>
    %258 = vector.extract_strided_slice %256 {offsets = [16, 0], sizes = [32, 128], strides = [1, 1]} : vector<112x128xf32> to vector<32x128xf32>
    %259 = vector.extract_strided_slice %256 {offsets = [48, 0], sizes = [64, 128], strides = [1, 1]} : vector<112x128xf32> to vector<64x128xf32>
    %260 = vector.extract_strided_slice %0 {offsets = [4, 0], sizes = [1, 128], strides = [1, 1]} : vector<8x128xf32> to vector<1x128xf32>
    %261 = vector.extract_strided_slice %0 {offsets = [5, 0], sizes = [1, 128], strides = [1, 1]} : vector<8x128xf32> to vector<1x128xf32>
    %262 = tpu.concatenate %128, %255 in 0 : vector<5x16xf32>, vector<5x16xf32> -> vector<10x16xf32>
    %cst_168 = arith.constant dense<0.000000e+00> : vector<10x128xf32>
    %263 = tpu.matmul %262, %257, %cst_168 {dimension_numbers = #tpu.dot_dimension_numbers<[1], [0], [0], [1], [0, 0, 1, 1], [], []>} : vector<10x16xf32>, vector<16x128xf32>, vector<10x128xf32> -> vector<10x128xf32>
    %264 = vector.broadcast %260 : vector<1x128xf32> to vector<10x128xf32>
    %265 = arith.addf %263, %264 : vector<10x128xf32>
    %cst_169 = arith.constant 0.000000e+00 : f32
    %266 = vector.broadcast %cst_169 : f32 to vector<2x32xf32>
    %cst_170 = arith.constant 0.000000e+00 : f32
    %267 = vector.broadcast %cst_170 : f32 to vector<2x32xf32>
    %cst_171 = arith.constant 0.000000e+00 : f32
    %268 = vector.broadcast %cst_171 : f32 to vector<2x32xf32>
    %cst_172 = arith.constant 0.000000e+00 : f32
    %269 = vector.broadcast %cst_172 : f32 to vector<2x32xf32>
    %270 = vector.extract_strided_slice %265 {offsets = [0, 0], sizes = [1, 128], strides = [1, 1]} : vector<10x128xf32> to vector<1x128xf32>
    %271 = vector.extract_strided_slice %265 {offsets = [5, 0], sizes = [1, 128], strides = [1, 1]} : vector<10x128xf32> to vector<1x128xf32>
    %272 = tpu.concatenate %270, %271 in 0 : vector<1x128xf32>, vector<1x128xf32> -> vector<2x128xf32>
    %cst_173 = arith.constant dense<0.000000e+00> : vector<2x128xf32>
    %273 = tpu.matmul %266, %258, %cst_173 {dimension_numbers = #tpu.dot_dimension_numbers<[1], [0], [0], [1], [0, 0, 1, 1], [], []>} : vector<2x32xf32>, vector<32x128xf32>, vector<2x128xf32> -> vector<2x128xf32>
    %274 = arith.addf %272, %273 : vector<2x128xf32>
    %275 = arith.negf %274 : vector<2x128xf32>
    %276 = math.exp %275 : vector<2x128xf32>
    %cst_174 = arith.constant 1.000000e+00 : f32
    %277 = vector.broadcast %cst_174 : f32 to vector<2x128xf32>
    %278 = arith.addf %277, %276 : vector<2x128xf32>
    %279 = arith.divf %277, %278 : vector<2x128xf32>
    %280 = math.tanh %274 : vector<2x128xf32>
    %281 = vector.extract_strided_slice %279 {offsets = [0, 0], sizes = [2, 32], strides = [1, 1]} : vector<2x128xf32> to vector<2x32xf32>
    %282 = vector.extract_strided_slice %279 {offsets = [0, 32], sizes = [2, 32], strides = [1, 1]} : vector<2x128xf32> to vector<2x32xf32>
    %283 = vector.extract_strided_slice %280 {offsets = [0, 64], sizes = [2, 32], strides = [1, 1]} : vector<2x128xf32> to vector<2x32xf32>
    %284 = vector.extract_strided_slice %279 {offsets = [0, 96], sizes = [2, 32], strides = [1, 1]} : vector<2x128xf32> to vector<2x32xf32>
    %285 = arith.mulf %282, %267 : vector<2x32xf32>
    %286 = arith.mulf %281, %283 : vector<2x32xf32>
    %287 = arith.addf %285, %286 : vector<2x32xf32>
    %288 = math.tanh %287 : vector<2x32xf32>
    %289 = arith.mulf %284, %288 : vector<2x32xf32>
    %290 = vector.extract_strided_slice %265 {offsets = [1, 0], sizes = [1, 128], strides = [1, 1]} : vector<10x128xf32> to vector<1x128xf32>
    %291 = vector.extract_strided_slice %265 {offsets = [6, 0], sizes = [1, 128], strides = [1, 1]} : vector<10x128xf32> to vector<1x128xf32>
    %292 = tpu.concatenate %290, %291 in 0 : vector<1x128xf32>, vector<1x128xf32> -> vector<2x128xf32>
    %cst_175 = arith.constant dense<0.000000e+00> : vector<2x128xf32>
    %293 = tpu.matmul %289, %258, %cst_175 {dimension_numbers = #tpu.dot_dimension_numbers<[1], [0], [0], [1], [0, 0, 1, 1], [], []>} : vector<2x32xf32>, vector<32x128xf32>, vector<2x128xf32> -> vector<2x128xf32>
    %294 = arith.addf %292, %293 : vector<2x128xf32>
    %295 = arith.negf %294 : vector<2x128xf32>
    %296 = math.exp %295 : vector<2x128xf32>
    %cst_176 = arith.constant 1.000000e+00 : f32
    %297 = vector.broadcast %cst_176 : f32 to vector<2x128xf32>
    %298 = arith.addf %297, %296 : vector<2x128xf32>
    %299 = arith.divf %297, %298 : vector<2x128xf32>
    %300 = math.tanh %294 : vector<2x128xf32>
    %301 = vector.extract_strided_slice %299 {offsets = [0, 0], sizes = [2, 32], strides = [1, 1]} : vector<2x128xf32> to vector<2x32xf32>
    %302 = vector.extract_strided_slice %299 {offsets = [0, 32], sizes = [2, 32], strides = [1, 1]} : vector<2x128xf32> to vector<2x32xf32>
    %303 = vector.extract_strided_slice %300 {offsets = [0, 64], sizes = [2, 32], strides = [1, 1]} : vector<2x128xf32> to vector<2x32xf32>
    %304 = vector.extract_strided_slice %299 {offsets = [0, 96], sizes = [2, 32], strides = [1, 1]} : vector<2x128xf32> to vector<2x32xf32>
    %305 = arith.mulf %302, %287 : vector<2x32xf32>
    %306 = arith.mulf %301, %303 : vector<2x32xf32>
    %307 = arith.addf %305, %306 : vector<2x32xf32>
    %308 = math.tanh %307 : vector<2x32xf32>
    %309 = arith.mulf %304, %308 : vector<2x32xf32>
    %310 = tpu.concatenate %289, %268 in 1 : vector<2x32xf32>, vector<2x32xf32> -> vector<2x64xf32>
    %cst_177 = arith.constant dense<0.000000e+00> : vector<2x128xf32>
    %311 = tpu.matmul %310, %259, %cst_177 {dimension_numbers = #tpu.dot_dimension_numbers<[1], [0], [0], [1], [0, 0, 1, 1], [], []>} : vector<2x64xf32>, vector<64x128xf32>, vector<2x128xf32> -> vector<2x128xf32>
    %312 = vector.broadcast %261 : vector<1x128xf32> to vector<2x128xf32>
    %313 = arith.addf %311, %312 : vector<2x128xf32>
    %314 = arith.negf %313 : vector<2x128xf32>
    %315 = math.exp %314 : vector<2x128xf32>
    %cst_178 = arith.constant 1.000000e+00 : f32
    %316 = vector.broadcast %cst_178 : f32 to vector<2x128xf32>
    %317 = arith.addf %316, %315 : vector<2x128xf32>
    %318 = arith.divf %316, %317 : vector<2x128xf32>
    %319 = math.tanh %313 : vector<2x128xf32>
    %320 = vector.extract_strided_slice %318 {offsets = [0, 0], sizes = [2, 32], strides = [1, 1]} : vector<2x128xf32> to vector<2x32xf32>
    %321 = vector.extract_strided_slice %318 {offsets = [0, 32], sizes = [2, 32], strides = [1, 1]} : vector<2x128xf32> to vector<2x32xf32>
    %322 = vector.extract_strided_slice %319 {offsets = [0, 64], sizes = [2, 32], strides = [1, 1]} : vector<2x128xf32> to vector<2x32xf32>
    %323 = vector.extract_strided_slice %318 {offsets = [0, 96], sizes = [2, 32], strides = [1, 1]} : vector<2x128xf32> to vector<2x32xf32>
    %324 = arith.mulf %321, %269 : vector<2x32xf32>
    %325 = arith.mulf %320, %322 : vector<2x32xf32>
    %326 = arith.addf %324, %325 : vector<2x32xf32>
    %327 = math.tanh %326 : vector<2x32xf32>
    %328 = arith.mulf %323, %327 : vector<2x32xf32>
    %329 = vector.extract_strided_slice %265 {offsets = [2, 0], sizes = [1, 128], strides = [1, 1]} : vector<10x128xf32> to vector<1x128xf32>
    %330 = vector.extract_strided_slice %265 {offsets = [7, 0], sizes = [1, 128], strides = [1, 1]} : vector<10x128xf32> to vector<1x128xf32>
    %331 = tpu.concatenate %329, %330 in 0 : vector<1x128xf32>, vector<1x128xf32> -> vector<2x128xf32>
    %cst_179 = arith.constant dense<0.000000e+00> : vector<2x128xf32>
    %332 = tpu.matmul %309, %258, %cst_179 {dimension_numbers = #tpu.dot_dimension_numbers<[1], [0], [0], [1], [0, 0, 1, 1], [], []>} : vector<2x32xf32>, vector<32x128xf32>, vector<2x128xf32> -> vector<2x128xf32>
    %333 = arith.addf %331, %332 : vector<2x128xf32>
    %334 = arith.negf %333 : vector<2x128xf32>
    %335 = math.exp %334 : vector<2x128xf32>
    %cst_180 = arith.constant 1.000000e+00 : f32
    %336 = vector.broadcast %cst_180 : f32 to vector<2x128xf32>
    %337 = arith.addf %336, %335 : vector<2x128xf32>
    %338 = arith.divf %336, %337 : vector<2x128xf32>
    %339 = math.tanh %333 : vector<2x128xf32>
    %340 = vector.extract_strided_slice %338 {offsets = [0, 0], sizes = [2, 32], strides = [1, 1]} : vector<2x128xf32> to vector<2x32xf32>
    %341 = vector.extract_strided_slice %338 {offsets = [0, 32], sizes = [2, 32], strides = [1, 1]} : vector<2x128xf32> to vector<2x32xf32>
    %342 = vector.extract_strided_slice %339 {offsets = [0, 64], sizes = [2, 32], strides = [1, 1]} : vector<2x128xf32> to vector<2x32xf32>
    %343 = vector.extract_strided_slice %338 {offsets = [0, 96], sizes = [2, 32], strides = [1, 1]} : vector<2x128xf32> to vector<2x32xf32>
    %344 = arith.mulf %341, %307 : vector<2x32xf32>
    %345 = arith.mulf %340, %342 : vector<2x32xf32>
    %346 = arith.addf %344, %345 : vector<2x32xf32>
    %347 = math.tanh %346 : vector<2x32xf32>
    %348 = arith.mulf %343, %347 : vector<2x32xf32>
    %349 = tpu.concatenate %309, %328 in 1 : vector<2x32xf32>, vector<2x32xf32> -> vector<2x64xf32>
    %cst_181 = arith.constant dense<0.000000e+00> : vector<2x128xf32>
    %350 = tpu.matmul %349, %259, %cst_181 {dimension_numbers = #tpu.dot_dimension_numbers<[1], [0], [0], [1], [0, 0, 1, 1], [], []>} : vector<2x64xf32>, vector<64x128xf32>, vector<2x128xf32> -> vector<2x128xf32>
    %351 = vector.broadcast %261 : vector<1x128xf32> to vector<2x128xf32>
    %352 = arith.addf %350, %351 : vector<2x128xf32>
    %353 = arith.negf %352 : vector<2x128xf32>
    %354 = math.exp %353 : vector<2x128xf32>
    %cst_182 = arith.constant 1.000000e+00 : f32
    %355 = vector.broadcast %cst_182 : f32 to vector<2x128xf32>
    %356 = arith.addf %355, %354 : vector<2x128xf32>
    %357 = arith.divf %355, %356 : vector<2x128xf32>
    %358 = math.tanh %352 : vector<2x128xf32>
    %359 = vector.extract_strided_slice %357 {offsets = [0, 0], sizes = [2, 32], strides = [1, 1]} : vector<2x128xf32> to vector<2x32xf32>
    %360 = vector.extract_strided_slice %357 {offsets = [0, 32], sizes = [2, 32], strides = [1, 1]} : vector<2x128xf32> to vector<2x32xf32>
    %361 = vector.extract_strided_slice %358 {offsets = [0, 64], sizes = [2, 32], strides = [1, 1]} : vector<2x128xf32> to vector<2x32xf32>
    %362 = vector.extract_strided_slice %357 {offsets = [0, 96], sizes = [2, 32], strides = [1, 1]} : vector<2x128xf32> to vector<2x32xf32>
    %363 = arith.mulf %360, %326 : vector<2x32xf32>
    %364 = arith.mulf %359, %361 : vector<2x32xf32>
    %365 = arith.addf %363, %364 : vector<2x32xf32>
    %366 = math.tanh %365 : vector<2x32xf32>
    %367 = arith.mulf %362, %366 : vector<2x32xf32>
    %368 = vector.extract_strided_slice %265 {offsets = [3, 0], sizes = [1, 128], strides = [1, 1]} : vector<10x128xf32> to vector<1x128xf32>
    %369 = vector.extract_strided_slice %265 {offsets = [8, 0], sizes = [1, 128], strides = [1, 1]} : vector<10x128xf32> to vector<1x128xf32>
    %370 = tpu.concatenate %368, %369 in 0 : vector<1x128xf32>, vector<1x128xf32> -> vector<2x128xf32>
    %cst_183 = arith.constant dense<0.000000e+00> : vector<2x128xf32>
    %371 = tpu.matmul %348, %258, %cst_183 {dimension_numbers = #tpu.dot_dimension_numbers<[1], [0], [0], [1], [0, 0, 1, 1], [], []>} : vector<2x32xf32>, vector<32x128xf32>, vector<2x128xf32> -> vector<2x128xf32>
    %372 = arith.addf %370, %371 : vector<2x128xf32>
    %373 = arith.negf %372 : vector<2x128xf32>
    %374 = math.exp %373 : vector<2x128xf32>
    %cst_184 = arith.constant 1.000000e+00 : f32
    %375 = vector.broadcast %cst_184 : f32 to vector<2x128xf32>
    %376 = arith.addf %375, %374 : vector<2x128xf32>
    %377 = arith.divf %375, %376 : vector<2x128xf32>
    %378 = math.tanh %372 : vector<2x128xf32>
    %379 = vector.extract_strided_slice %377 {offsets = [0, 0], sizes = [2, 32], strides = [1, 1]} : vector<2x128xf32> to vector<2x32xf32>
    %380 = vector.extract_strided_slice %377 {offsets = [0, 32], sizes = [2, 32], strides = [1, 1]} : vector<2x128xf32> to vector<2x32xf32>
    %381 = vector.extract_strided_slice %378 {offsets = [0, 64], sizes = [2, 32], strides = [1, 1]} : vector<2x128xf32> to vector<2x32xf32>
    %382 = vector.extract_strided_slice %377 {offsets = [0, 96], sizes = [2, 32], strides = [1, 1]} : vector<2x128xf32> to vector<2x32xf32>
    %383 = arith.mulf %380, %346 : vector<2x32xf32>
    %384 = arith.mulf %379, %381 : vector<2x32xf32>
    %385 = arith.addf %383, %384 : vector<2x32xf32>
    %386 = math.tanh %385 : vector<2x32xf32>
    %387 = arith.mulf %382, %386 : vector<2x32xf32>
    %388 = tpu.concatenate %348, %367 in 1 : vector<2x32xf32>, vector<2x32xf32> -> vector<2x64xf32>
    %cst_185 = arith.constant dense<0.000000e+00> : vector<2x128xf32>
    %389 = tpu.matmul %388, %259, %cst_185 {dimension_numbers = #tpu.dot_dimension_numbers<[1], [0], [0], [1], [0, 0, 1, 1], [], []>} : vector<2x64xf32>, vector<64x128xf32>, vector<2x128xf32> -> vector<2x128xf32>
    %390 = vector.broadcast %261 : vector<1x128xf32> to vector<2x128xf32>
    %391 = arith.addf %389, %390 : vector<2x128xf32>
    %392 = arith.negf %391 : vector<2x128xf32>
    %393 = math.exp %392 : vector<2x128xf32>
    %cst_186 = arith.constant 1.000000e+00 : f32
    %394 = vector.broadcast %cst_186 : f32 to vector<2x128xf32>
    %395 = arith.addf %394, %393 : vector<2x128xf32>
    %396 = arith.divf %394, %395 : vector<2x128xf32>
    %397 = math.tanh %391 : vector<2x128xf32>
    %398 = vector.extract_strided_slice %396 {offsets = [0, 0], sizes = [2, 32], strides = [1, 1]} : vector<2x128xf32> to vector<2x32xf32>
    %399 = vector.extract_strided_slice %396 {offsets = [0, 32], sizes = [2, 32], strides = [1, 1]} : vector<2x128xf32> to vector<2x32xf32>
    %400 = vector.extract_strided_slice %397 {offsets = [0, 64], sizes = [2, 32], strides = [1, 1]} : vector<2x128xf32> to vector<2x32xf32>
    %401 = vector.extract_strided_slice %396 {offsets = [0, 96], sizes = [2, 32], strides = [1, 1]} : vector<2x128xf32> to vector<2x32xf32>
    %402 = arith.mulf %399, %365 : vector<2x32xf32>
    %403 = arith.mulf %398, %400 : vector<2x32xf32>
    %404 = arith.addf %402, %403 : vector<2x32xf32>
    %405 = math.tanh %404 : vector<2x32xf32>
    %406 = arith.mulf %401, %405 : vector<2x32xf32>
    %407 = vector.extract_strided_slice %265 {offsets = [4, 0], sizes = [1, 128], strides = [1, 1]} : vector<10x128xf32> to vector<1x128xf32>
    %408 = vector.extract_strided_slice %265 {offsets = [9, 0], sizes = [1, 128], strides = [1, 1]} : vector<10x128xf32> to vector<1x128xf32>
    %409 = tpu.concatenate %407, %408 in 0 : vector<1x128xf32>, vector<1x128xf32> -> vector<2x128xf32>
    %cst_187 = arith.constant dense<0.000000e+00> : vector<2x128xf32>
    %410 = tpu.matmul %387, %258, %cst_187 {dimension_numbers = #tpu.dot_dimension_numbers<[1], [0], [0], [1], [0, 0, 1, 1], [], []>} : vector<2x32xf32>, vector<32x128xf32>, vector<2x128xf32> -> vector<2x128xf32>
    %411 = arith.addf %409, %410 : vector<2x128xf32>
    %412 = arith.negf %411 : vector<2x128xf32>
    %413 = math.exp %412 : vector<2x128xf32>
    %cst_188 = arith.constant 1.000000e+00 : f32
    %414 = vector.broadcast %cst_188 : f32 to vector<2x128xf32>
    %415 = arith.addf %414, %413 : vector<2x128xf32>
    %416 = arith.divf %414, %415 : vector<2x128xf32>
    %417 = math.tanh %411 : vector<2x128xf32>
    %418 = vector.extract_strided_slice %416 {offsets = [0, 0], sizes = [2, 32], strides = [1, 1]} : vector<2x128xf32> to vector<2x32xf32>
    %419 = vector.extract_strided_slice %416 {offsets = [0, 32], sizes = [2, 32], strides = [1, 1]} : vector<2x128xf32> to vector<2x32xf32>
    %420 = vector.extract_strided_slice %417 {offsets = [0, 64], sizes = [2, 32], strides = [1, 1]} : vector<2x128xf32> to vector<2x32xf32>
    %421 = vector.extract_strided_slice %416 {offsets = [0, 96], sizes = [2, 32], strides = [1, 1]} : vector<2x128xf32> to vector<2x32xf32>
    %422 = arith.mulf %419, %385 : vector<2x32xf32>
    %423 = arith.mulf %418, %420 : vector<2x32xf32>
    %424 = arith.addf %422, %423 : vector<2x32xf32>
    %425 = math.tanh %424 : vector<2x32xf32>
    %426 = arith.mulf %421, %425 : vector<2x32xf32>
    %427 = tpu.concatenate %387, %406 in 1 : vector<2x32xf32>, vector<2x32xf32> -> vector<2x64xf32>
    %cst_189 = arith.constant dense<0.000000e+00> : vector<2x128xf32>
    %428 = tpu.matmul %427, %259, %cst_189 {dimension_numbers = #tpu.dot_dimension_numbers<[1], [0], [0], [1], [0, 0, 1, 1], [], []>} : vector<2x64xf32>, vector<64x128xf32>, vector<2x128xf32> -> vector<2x128xf32>
    %429 = vector.broadcast %261 : vector<1x128xf32> to vector<2x128xf32>
    %430 = arith.addf %428, %429 : vector<2x128xf32>
    %431 = arith.negf %430 : vector<2x128xf32>
    %432 = math.exp %431 : vector<2x128xf32>
    %cst_190 = arith.constant 1.000000e+00 : f32
    %433 = vector.broadcast %cst_190 : f32 to vector<2x128xf32>
    %434 = arith.addf %433, %432 : vector<2x128xf32>
    %435 = arith.divf %433, %434 : vector<2x128xf32>
    %436 = math.tanh %430 : vector<2x128xf32>
    %437 = vector.extract_strided_slice %435 {offsets = [0, 0], sizes = [2, 32], strides = [1, 1]} : vector<2x128xf32> to vector<2x32xf32>
    %438 = vector.extract_strided_slice %435 {offsets = [0, 32], sizes = [2, 32], strides = [1, 1]} : vector<2x128xf32> to vector<2x32xf32>
    %439 = vector.extract_strided_slice %436 {offsets = [0, 64], sizes = [2, 32], strides = [1, 1]} : vector<2x128xf32> to vector<2x32xf32>
    %440 = vector.extract_strided_slice %435 {offsets = [0, 96], sizes = [2, 32], strides = [1, 1]} : vector<2x128xf32> to vector<2x32xf32>
    %441 = arith.mulf %438, %404 : vector<2x32xf32>
    %442 = arith.mulf %437, %439 : vector<2x32xf32>
    %443 = arith.addf %441, %442 : vector<2x32xf32>
    %444 = math.tanh %443 : vector<2x32xf32>
    %445 = arith.mulf %440, %444 : vector<2x32xf32>
    %446 = tpu.concatenate %426, %445 in 1 : vector<2x32xf32>, vector<2x32xf32> -> vector<2x64xf32>
    %cst_191 = arith.constant dense<0.000000e+00> : vector<2x128xf32>
    %447 = tpu.matmul %446, %259, %cst_191 {dimension_numbers = #tpu.dot_dimension_numbers<[1], [0], [0], [1], [0, 0, 1, 1], [], []>} : vector<2x64xf32>, vector<64x128xf32>, vector<2x128xf32> -> vector<2x128xf32>
    %448 = vector.broadcast %261 : vector<1x128xf32> to vector<2x128xf32>
    %449 = arith.addf %447, %448 : vector<2x128xf32>
    %450 = arith.negf %449 : vector<2x128xf32>
    %451 = math.exp %450 : vector<2x128xf32>
    %cst_192 = arith.constant 1.000000e+00 : f32
    %452 = vector.broadcast %cst_192 : f32 to vector<2x128xf32>
    %453 = arith.addf %452, %451 : vector<2x128xf32>
    %454 = arith.divf %452, %453 : vector<2x128xf32>
    %455 = math.tanh %449 : vector<2x128xf32>
    %456 = vector.extract_strided_slice %454 {offsets = [0, 0], sizes = [2, 32], strides = [1, 1]} : vector<2x128xf32> to vector<2x32xf32>
    %457 = vector.extract_strided_slice %454 {offsets = [0, 32], sizes = [2, 32], strides = [1, 1]} : vector<2x128xf32> to vector<2x32xf32>
    %458 = vector.extract_strided_slice %455 {offsets = [0, 64], sizes = [2, 32], strides = [1, 1]} : vector<2x128xf32> to vector<2x32xf32>
    %459 = vector.extract_strided_slice %454 {offsets = [0, 96], sizes = [2, 32], strides = [1, 1]} : vector<2x128xf32> to vector<2x32xf32>
    %460 = arith.mulf %457, %443 : vector<2x32xf32>
    %461 = arith.mulf %456, %458 : vector<2x32xf32>
    %462 = arith.addf %460, %461 : vector<2x32xf32>
    %463 = math.tanh %462 : vector<2x32xf32>
    %464 = arith.mulf %459, %463 : vector<2x32xf32>
    %c0_193 = arith.constant 0 : index
    %c0_194 = arith.constant 0 : index
    %465 = vector.load %arg11[%c0_193, %c0_194] : memref<32x128xf32, #tpu.memory_space<vmem>>, vector<32x128xf32>
    %cst_195 = arith.constant dense<0.000000e+00> : vector<2x128xf32>
    %466 = tpu.matmul %464, %465, %cst_195 {dimension_numbers = #tpu.dot_dimension_numbers<[1], [0], [0], [1], [0, 0, 1, 1], [], []>} : vector<2x32xf32>, vector<32x128xf32>, vector<2x128xf32> -> vector<2x128xf32>
    %467 = vector.extract_strided_slice %0 {offsets = [6, 0], sizes = [1, 128], strides = [1, 1]} : vector<8x128xf32> to vector<1x128xf32>
    %468 = vector.broadcast %467 : vector<1x128xf32> to vector<2x128xf32>
    %469 = arith.addf %466, %468 : vector<2x128xf32>
    %470 = vector.shape_cast %469 : vector<2x128xf32> to vector<2x1x128xf32>
    %c0_196 = arith.constant 0 : index
    %c0_197 = arith.constant 0 : index
    %c0_198 = arith.constant 0 : index
    %471 = vector.load %arg13[%c0_196, %c0_197, %c0_198] : memref<2x1x128xf32, #tpu.memory_space<vmem>>, vector<2x1x128xf32>
    tpu.vector_store %arg13[%c0_196, %c0_197, %c0_198], %470 {strides = array<i32>} : memref<2x1x128xf32, #tpu.memory_space<vmem>>, vector<2x1x128xf32>,
    return
  }
  func.func @transform_0(%arg0: i32) -> (i32, i32, i32) {
    %c0_i32 = arith.constant 0 : i32
    %c0_i32_0 = arith.constant 0 : i32
    %c0_i32_1 = arith.constant 0 : i32
    return %arg0, %c0_i32, %c0_i32_0 : i32, i32, i32
  }
  func.func @transform_1(%arg0: i32) -> (i32, i32) {
    %c0_i32 = arith.constant 0 : i32
    %c0_i32_0 = arith.constant 0 : i32
    %c0_i32_1 = arith.constant 0 : i32
    return %c0_i32, %c0_i32_0 : i32, i32
  }
  func.func @transform_2(%arg0: i32) -> (i32, i32, i32) {
    %c0_i32 = arith.constant 0 : i32
    %c0_i32_0 = arith.constant 0 : i32
    %c0_i32_1 = arith.constant 0 : i32
    %c0_i32_2 = arith.constant 0 : i32
    return %c0_i32, %c0_i32_0, %c0_i32_1 : i32, i32, i32
  }
  func.func @transform_3(%arg0: i32) -> (i32, i32, i32) {
    %c0_i32 = arith.constant 0 : i32
    %c0_i32_0 = arith.constant 0 : i32
    %c0_i32_1 = arith.constant 0 : i32
    %c0_i32_2 = arith.constant 0 : i32
    return %c0_i32, %c0_i32_0, %c0_i32_1 : i32, i32, i32
  }
  func.func @transform_4(%arg0: i32) -> (i32, i32, i32) {
    %c0_i32 = arith.constant 0 : i32
    %c0_i32_0 = arith.constant 0 : i32
    %c0_i32_1 = arith.constant 0 : i32
    %c0_i32_2 = arith.constant 0 : i32
    return %c0_i32, %c0_i32_0, %c0_i32_1 : i32, i32, i32
  }
  func.func @transform_5(%arg0: i32) -> (i32, i32) {
    %c0_i32 = arith.constant 0 : i32
    %c0_i32_0 = arith.constant 0 : i32
    %c0_i32_1 = arith.constant 0 : i32
    return %c0_i32, %c0_i32_0 : i32, i32
  }
  func.func @transform_6(%arg0: i32) -> (i32, i32) {
    %c0_i32 = arith.constant 0 : i32
    %c0_i32_0 = arith.constant 0 : i32
    %c0_i32_1 = arith.constant 0 : i32
    return %c0_i32, %c0_i32_0 : i32, i32
  }
  func.func @transform_7(%arg0: i32) -> (i32, i32) {
    %c0_i32 = arith.constant 0 : i32
    %c0_i32_0 = arith.constant 0 : i32
    %c0_i32_1 = arith.constant 0 : i32
    return %c0_i32, %c0_i32_0 : i32, i32
  }
  func.func @transform_8(%arg0: i32) -> (i32, i32) {
    %c0_i32 = arith.constant 0 : i32
    %c0_i32_0 = arith.constant 0 : i32
    %c0_i32_1 = arith.constant 0 : i32
    return %c0_i32, %c0_i32_0 : i32, i32
  }
  func.func @transform_9(%arg0: i32) -> (i32, i32) {
    %c0_i32 = arith.constant 0 : i32
    %c0_i32_0 = arith.constant 0 : i32
    %c0_i32_1 = arith.constant 0 : i32
    return %c0_i32, %c0_i32_0 : i32, i32
  }
  func.func @transform_10(%arg0: i32) -> (i32, i32) {
    %c0_i32 = arith.constant 0 : i32
    %c0_i32_0 = arith.constant 0 : i32
    %c0_i32_1 = arith.constant 0 : i32
    return %c0_i32, %c0_i32_0 : i32, i32
  }
  func.func @transform_11(%arg0: i32) -> (i32, i32) {
    %c0_i32 = arith.constant 0 : i32
    %c0_i32_0 = arith.constant 0 : i32
    %c0_i32_1 = arith.constant 0 : i32
    return %c0_i32, %c0_i32_0 : i32, i32
  }
  func.func @transform_12(%arg0: i32) -> (i32, i32, i32) {
    %c0_i32 = arith.constant 0 : i32
    %c0_i32_0 = arith.constant 0 : i32
    %c0_i32_1 = arith.constant 0 : i32
    return %arg0, %c0_i32, %c0_i32_0 : i32, i32, i32
  }
}

</mosaic_0001>

<bundles_post_ra>
// kernel: tpu_custom_call.1
= control target key start
LH: loop header
LB: loop body
LE: loop exit
PB: predicated region body
PF: predicated region fallthrough
CT: control target
= control target key end

     0   :  { %vm122_vm0 = vcmask 1043456   ;;  %v8461_v1 = vmov 0.0   ;;  %vm10460_vm1 = vmmov 0   ;;  %s10447_s0 = inlined_call_operand.vmem [shape: f32[2,120,108], index: 0, kind: input, shape index: {}]   ;;  %s10448_s1 = inlined_call_operand.vmem [shape: f32[108,64], index: 1, kind: input, shape index: {}]   ;;  %s10449_s2 = inlined_call_operand.vmem [shape: f32[5,64,32], index: 2, kind: input, shape index: {}]   ;;  %s10450_s3 = inlined_call_operand.vmem [shape: f32[5,32,32], index: 3, kind: input, shape index: {}]   ;;  %s10451_s4 = inlined_call_operand.vmem [shape: f32[5,32,16], index: 4, kind: input, shape index: {}]   ;;  %s10452_s5 = inlined_call_operand.vmem [shape: f32[128,120], index: 5, kind: input, shape index: {}]   ;;  %s10453_s6 = inlined_call_operand.vmem [shape: f32[64,57], index: 6, kind: input, shape index: {}]   ;;  %s10454_s7 = inlined_call_operand.vmem [shape: f32[32,25], index: 7, kind: input, shape index: {}]   ;;  %s10455_s8 = inlined_call_operand.vmem [shape: f32[16,9], index: 8, kind: input, shape index: {}]   ;;  %s10456_s9 = inlined_call_operand.vmem [shape: f32[112,128], index: 9, kind: input, shape index: {}]   ;;  %s10457_s10 = inlined_call_operand.vmem [shape: f32[32,128], index: 10, kind: input, shape index: {}]   ;;  %s10458_s11 = inlined_call_operand.vmem [shape: f32[8,128], index: 11, kind: input, shape index: {}]   ;;  %s10459_s12 = inlined_call_operand.hbm [shape: f32[2,1,128], index: 12, kind: output, shape index: {}]  }
   0x1   :  { %v56_v0 = vld [vmem:[%s10448_s1 + $0x68] sm:$0xf]  ;;  %7175 = vmatprep.subr.mxu0 %v8461_v1  ;;  %v55_v2 = vld [vmem:[%s10448_s1 + $0x60] sm:$0xff]  ;;  %7203 = vmatprep.mubr.msk.f32.mxu0 %vm10460_vm1, %v8461_v1  ;;  %v54_v3 = vld [vmem:[%s10448_s1 + $0x58] sm:$0xff] }
   0x2   :  { %7176 = vmatpush3.msk.msra.mxu0 %vm122_vm0, %v56_v0  ;;  %v53_v4 = vld [vmem:[%s10448_s1 + $0x50] sm:$0xff]  ;;  %v52_v5 = vld [vmem:[%s10448_s1 + $0x48] sm:$0xff]  ;;  %v51_v6 = vld [vmem:[%s10448_s1 + $0x40] sm:$0xff] }
   0x3   :  { %7177 = vmatprep.subr.mxu0 %v8461_v1 }
   0x4   :  { %7178 = vmatpush3.msra.mxu0 %v55_v2 }
   0x5   :  { %7179 = vmatprep.subr.mxu0 %v8461_v1 }
   0x6   :  { %7180 = vmatpush3.msra.mxu0 %v54_v3 }
   0x7   :  { %7181 = vmatprep.subr.mxu0 %v8461_v1 }
   0x8   :  { %7182 = vmatpush3.msra.mxu0 %v53_v4 }
   0x9   :  { %7183 = vmatprep.subr.mxu0 %v8461_v1 }
   0xa   :  { %7184 = vmatpush3.msra.mxu0 %v52_v5 }
   0xb   :  { %17 = vsyncpa [#allocation3], 0  ;;  %7185 = vmatprep.subr.mxu0 %v8461_v1  ;;  %v50_v7 = vld [vmem:[%s10448_s1 + $0x38] sm:$0xff]  ;;  %v49_v8 = vld [vmem:[%s10448_s1 + $0x30] sm:$0xff]  ;;  %vm76_vm2 = vcmask 883712   ;;  %vm327_vm3 = vcmask 982016   ;;  %v72_v54 = vlaneseq }
   0xc   :  { %7186 = vmatpush3.msra.mxu0 %v51_v6  ;;  %v48_v9 = vld [vmem:[%s10448_s1 + $0x28] sm:$0xff]  ;;  %v47_v10 = vld [vmem:[%s10448_s1 + $0x20] sm:$0xff]  ;;  %v46_v11 = vld [vmem:[%s10448_s1 + $0x18] sm:$0xff]  ;;  %s8464_s27 = smov 32  }
   0xd   :  { %7187 = vmatprep.subr.mxu0 %v8461_v1  ;;  %v45_v12 = vld [vmem:[%s10448_s1 + $0x10] sm:$0xff]  ;;  %v44_v13 = vld [vmem:[%s10448_s1 + $0x8] sm:$0xff]  ;;  %v43_v14 = vld [vmem:[%s10448_s1] sm:$0xff]  ;;  %v8701_v57 = vshrl.u32 %v72_v54, 7 }
   0xe   :  { %7188 = vmatpush3.msra.mxu0 %v50_v7  ;;  %v57_v15 = vld [vmem:[%s10447_s0] sm:$0xff]  ;;  %v58_v16 = vld [vmem:[%s10447_s0 + $0x8] sm:$0xff]  ;;  %v59_v17 = vld [vmem:[%s10447_s0 + $0x10] sm:$0xff] }
   0xf   :  { %7189 = vmatprep.subr.mxu0 %v8461_v1  ;;  %v60_v18 = vld [vmem:[%s10447_s0 + $0x18] sm:$0xff]  ;;  %v61_v19 = vld [vmem:[%s10447_s0 + $0x20] sm:$0xff]  ;;  %v62_v20 = vld [vmem:[%s10447_s0 + $0x28] sm:$0xff]  ;;  %v74_v60 = vsub.s32 0, %v8701_v57 }
  0x10   :  { %7190 = vmatpush3.msra.mxu0 %v49_v8  ;;  %v63_v21 = vld [vmem:[%s10447_s0 + $0x30] sm:$0xff]  ;;  %v64_v22 = vld [vmem:[%s10447_s0 + $0x38] sm:$0xff]  ;;  %v65_v23 = vld [vmem:[%s10447_s0 + $0x40] sm:$0xff] }
  0x11   :  { %7191 = vmatprep.subr.mxu0 %v8461_v1  ;;  %v66_v24 = vld [vmem:[%s10447_s0 + $0x48] sm:$0xff]  ;;  %v67_v25 = vld [vmem:[%s10447_s0 + $0x50] sm:$0xff]  ;;  %v68_v26 = vld [vmem:[%s10447_s0 + $0x58] sm:$0xff] }
  0x12   :  { %7192 = vmatpush3.msra.mxu0 %v48_v9  ;;  %v69_v27 = vld [vmem:[%s10447_s0 + $0x60] sm:$0xff]  ;;  %v70_v28 = vld [vmem:[%s10447_s0 + $0x68] sm:$0xff]  ;;  %v71_v29 = vld [vmem:[%s10447_s0 + $0x70] sm:$0xff] }
  0x13   :  { %7193 = vmatprep.subr.mxu0 %v8461_v1  ;;  %v311_v30 = vld [vmem:[%s10452_s5] sm:$0xff]  ;;  %v6342_v31 = vld [vmem:[%s10449_s2 + $0xb8] sm:$0xff]  ;;  %v6341_v32 = vld [vmem:[%s10449_s2 + $0xb0] sm:$0xff] }
  0x14   :  { %7194 = vmatpush3.msra.mxu0 %v47_v10  ;;  %7278 = vmatprep.mubr.msk.f32.mxu1 %vm327_vm3, %v311_v30  ;;  %v8707_v61 = vld [vmem:[%s10458_s11] sm:$0xff] }
  0x15   :  { %7195 = vmatprep.subr.mxu0 %v8461_v1  ;;  %v8710_v0 = vrot.slane %v8707_v61, %v74_v60  ;;  %v315_v54 = vld [vmem:[%s10452_s5 + $0x20] sm:$0xff]  ;;  %v320_v60 = vld [vmem:[%s10452_s5 + $0x48] sm:$0xff] }
  0x16   :  { %7196 = vmatpush3.msra.mxu0 %v46_v11 }
  0x17   :  { %7197 = vmatprep.subr.mxu0 %v8461_v1 }
  0x18   :  { %7198 = vmatpush3.msra.mxu0 %v45_v12 }
  0x19   :  { %7199 = vmatprep.subr.mxu0 %v8461_v1 }
  0x1a   :  { %7200 = vmatpush3.msra.mxu0 %v44_v13 }
  0x1b   :  { %7201 = vmatprep.subr.mxu0 %v8461_v1 }
  0x1c   :  { %7202 = vmatpush3.msra.mxu0 %v43_v14 }
  0x1d   :  { %7204 = vmatmul.mubr.msk.f32.vlgmr.msra.gmra.mxu0 %vm76_vm2, %v57_v15  ;;  %7358 = vmatprep.subr.mxu0 %v6342_v31 }
  0x1e   :  { %7206 = vmatprep.mubr.msk.f32.mxu0 %vm10460_vm1, %v8461_v1  ;;  %7359 = vmatpush3.msra.mxu0 %v6342_v31 }
  0x1f   :  { %7360 = vmatprep.subr.mxu0 %v6341_v32 }
  0x20   :  { %7361 = vmatpush3.msra.mxu0 %v6341_v32 }
  0x21   :  { %7207 = vmatmul.mubr.msk.f32.gmra.mxu0 %vm76_vm2, %v58_v16 }
  0x22   :  { %7209 = vmatprep.mubr.msk.f32.mxu0 %vm10460_vm1, %v8461_v1 }
  0x25   :  { %7210 = vmatmul.mubr.msk.f32.gmra.mxu0 %vm76_vm2, %v59_v17 }
  0x26   :  { %7212 = vmatprep.mubr.msk.f32.mxu0 %vm10460_vm1, %v8461_v1 }
  0x29   :  { %7213 = vmatmul.mubr.msk.f32.gmra.mxu0 %vm76_vm2, %v60_v18 }
  0x2a   :  { %7215 = vmatprep.mubr.msk.f32.mxu0 %vm10460_vm1, %v8461_v1 }
  0x2d   :  { %7216 = vmatmul.mubr.msk.f32.gmra.mxu0 %vm76_vm2, %v61_v19 }
  0x2e   :  { %7218 = vmatprep.mubr.msk.f32.mxu0 %vm10460_vm1, %v8461_v1 }
  0x31   :  { %7219 = vmatmul.mubr.msk.f32.gmra.mxu0 %vm76_vm2, %v62_v20 }
  0x32   :  { %7221 = vmatprep.mubr.msk.f32.mxu0 %vm10460_vm1, %v8461_v1 }
  0x35   :  { %7222 = vmatmul.mubr.msk.f32.gmra.mxu0 %vm76_vm2, %v63_v21 }
  0x36   :  { %7224 = vmatprep.mubr.msk.f32.mxu0 %vm10460_vm1, %v8461_v1 }
  0x39   :  { %7225 = vmatmul.mubr.msk.f32.gmra.mxu0 %vm76_vm2, %v64_v22 }
  0x3a   :  { %7227 = vmatprep.mubr.msk.f32.mxu0 %vm10460_vm1, %v8461_v1 }
  0x3d   :  { %7228 = vmatmul.mubr.msk.f32.gmra.mxu0 %vm76_vm2, %v65_v23 }
  0x3e   :  { %7230 = vmatprep.mubr.msk.f32.mxu0 %vm10460_vm1, %v8461_v1 }
  0x41   :  { %7231 = vmatmul.mubr.msk.f32.gmra.mxu0 %vm76_vm2, %v66_v24 }
  0x42   :  { %7233 = vmatprep.mubr.msk.f32.mxu0 %vm10460_vm1, %v8461_v1 }
  0x45   :  { %7234 = vmatmul.mubr.msk.f32.gmra.mxu0 %vm76_vm2, %v67_v25 }
  0x46   :  { %7236 = vmatprep.mubr.msk.f32.mxu0 %vm10460_vm1, %v8461_v1 }
  0x49   :  { %7237 = vmatmul.mubr.msk.f32.gmra.mxu0 %vm76_vm2, %v68_v26 }
  0x4a   :  { %7239 = vmatprep.mubr.msk.f32.mxu0 %vm10460_vm1, %v8461_v1 }
  0x4d   :  { %7240 = vmatmul.mubr.msk.f32.gmra.mxu0 %vm76_vm2, %v69_v27 }
  0x4e   :  { %7242 = vmatprep.mubr.msk.f32.mxu0 %vm10460_vm1, %v8461_v1 }
  0x51   :  { %7243 = vmatmul.mubr.msk.f32.gmra.mxu0 %vm76_vm2, %v70_v28 }
  0x52   :  { %7245 = vmatprep.mubr.msk.f32.mxu0 %vm10460_vm1, %v8461_v1 }
  0x55   :  { %7246 = vmatmul.mubr.msk.f32.gmra.mxu0 %vm76_vm2, %v71_v29 }
  0xdd   :  { %v8691_v33 = vpop.f32.mrf.mxu0 }
  0xdf   :  { %v7205_v34 = vpop.f32.mrf.mxu0 }
  0xe1   :  { %v8693_v35 = vpop.f32.mrf.mxu0 }
  0xe3   :  { %v7208_v36 = vpop.f32.mrf.mxu0 }
  0xe5   :  { %v8695_v37 = vpop.f32.mrf.mxu0 }
  0xe7   :  { %v7211_v38 = vpop.f32.mrf.mxu0 }
  0xe8   :  { %v203_v38 = vadd.f32 %v8695_v37, %v8710_v0 }
  0xe9   :  { %v8697_v39 = vpop.f32.mrf.mxu0 }
  0xea   :  { %v208_v32 = vadd.f32 %v8697_v39, %v8710_v0  ;;  %v193_v39 = vadd.f32 %v8691_v33, %v8710_v0 }
  0xeb   :  { %v7214_v40 = vpop.f32.mrf.mxu0 }
  0xec   :  { %vm269_vm15 = vcmp.ge.f32.partialorder %v208_v32, 0.0 }
  0xed   :  { %v8699_v41 = vpop.f32.mrf.mxu0 }
  0xee   :  { %v213_v29 = vadd.f32 %v8699_v41, %v8710_v0  ;;  %v198_v41 = vadd.f32 %v8693_v35, %v8710_v0 }
  0xef   :  { %v7217_v42 = vpop.f32.mrf.mxu0 }
  0xf0   :  { %v285_v40 = vmul.f32 0.01, %v213_v29  ;;  %vm270_vm14 = vcmp.ge.f32.partialorder %v213_v29, 0.0  ;;  %v282_v37 = vmul.f32 0.01, %v198_v41 }
  0xf1   :  { %v217_v43 = vpop.f32.mrf.mxu0 }
  0xf2   :  { %v218_v26 = vadd.f32 %v217_v43, %v8710_v0  ;;  %v284_v43 = vmul.f32 0.01, %v208_v32 }
  0xf3   :  { %v7220_v44 = vpop.f32.mrf.mxu0 }
  0xf4   :  { %v286_v34 = vmul.f32 0.01, %v218_v26  ;;  %vm271_vm13 = vcmp.ge.f32.partialorder %v218_v26, 0.0 }
  0xf5   :  { %v222_v45 = vpop.f32.mrf.mxu0 }
  0xf6   :  { %v223_v23 = vadd.f32 %v222_v45, %v8710_v0  ;;  %v301_v44 = vsel %vm271_vm13, %v218_v26, %v286_v34  ;;  %v283_v45 = vmul.f32 0.01, %v203_v38 }
  0xf7   :  { %v7223_v46 = vpop.f32.mrf.mxu0 }
  0xf8   :  { %v287_v30 = vmul.f32 0.01, %v223_v23  ;;  %vm272_vm12 = vcmp.ge.f32.partialorder %v223_v23, 0.0  ;;  %v300_v46 = vsel %vm270_vm14, %v213_v29, %v285_v40 }
  0xf9   :  { %v227_v47 = vpop.f32.mrf.mxu0 }
  0xfa   :  { %v228_v20 = vadd.f32 %v227_v47, %v8710_v0  ;;  %v302_v42 = vsel %vm272_vm12, %v223_v23, %v287_v30  ;;  %v299_v47 = vsel %vm269_vm15, %v208_v32, %v284_v43  ;;  %vm1343_vm12 = vcmask 1040384  }
  0xfb   :  { %v7226_v48 = vpop.f32.mrf.mxu0 }
  0xfc   :  { %v288_v27 = vmul.f32 0.01, %v228_v20  ;;  %vm273_vm11 = vcmp.ge.f32.partialorder %v228_v20, 0.0  ;;  %v281_v48 = vmul.f32 0.01, %v193_v39 }
  0xfd   :  { %v232_v49 = vpop.f32.mrf.mxu0 }
  0xfe   :  { %v233_v17 = vadd.f32 %v232_v49, %v8710_v0  ;;  %v303_v36 = vsel %vm273_vm11, %v228_v20, %v288_v27  ;;  %v6374_v20 = vld [vmem:[%s10449_s2 + $0x138] sm:$0xff]  ;;  %vm1318_vm11 = vcmask 465920  }
  0xff   :  { %v7229_v50 = vpop.f32.mrf.mxu0 }
 0x100   :  { %v289_v24 = vmul.f32 0.01, %v233_v17  ;;  %vm274_vm10 = vcmp.ge.f32.partialorder %v233_v17, 0.0  ;;  %v312_v50 = vld [vmem:[%s10452_s5 + $0x8] sm:$0xff] }
 0x101   :  { %v237_v51 = vpop.f32.mrf.mxu0 }
 0x102   :  { %v238_v14 = vadd.f32 %v237_v51, %v8710_v0  ;;  %v304_v31 = vsel %vm274_vm10, %v233_v17, %v289_v24  ;;  %v6318_v51 = vld [vmem:[%s10449_s2 + $0x78] sm:$0xff]  ;;  %v6311_v17 = vld [vmem:[%s10449_s2 + $0x40] sm:$0xff]  ;;  %vm976_vm10 = vcmask 1044480  }
 0x103   :  { %v7232_v52 = vpop.f32.mrf.mxu0 }
 0x104   :  { %v290_v21 = vmul.f32 0.01, %v238_v14  ;;  %vm275_vm9 = vcmp.ge.f32.partialorder %v238_v14, 0.0  ;;  %v313_v52 = vld [vmem:[%s10452_s5 + $0x10] sm:$0xff] }
 0x105   :  { %v242_v53 = vpop.f32.mrf.mxu0 }
 0x106   :  { %v243_v11 = vadd.f32 %v242_v53, %v8710_v0  ;;  %v305_v28 = vsel %vm275_vm9, %v238_v14, %v290_v21  ;;  %v314_v53 = vld [vmem:[%s10452_s5 + $0x18] sm:$0xff]  ;;  %v6312_v14 = vld [vmem:[%s10449_s2 + $0x48] sm:$0xff]  ;;  %vm822_vm9 = vcmask 1045504  }
 0x107   :  { %v7235_v55 = vpop.f32.mrf.mxu0 }
 0x108   :  { %v291_v18 = vmul.f32 0.01, %v243_v11  ;;  %vm276_vm8 = vcmp.ge.f32.partialorder %v243_v11, 0.0  ;;  %v316_v55 = vld [vmem:[%s10452_s5 + $0x28] sm:$0xff] }
 0x109   :  { %v247_v56 = vpop.f32.mrf.mxu0 }
 0x10a   :  { %v248_v8 = vadd.f32 %v247_v56, %v8710_v0  ;;  %v306_v25 = vsel %vm276_vm8, %v243_v11, %v291_v18  ;;  %v317_v56 = vld [vmem:[%s10452_s5 + $0x30] sm:$0xff]  ;;  %v6314_v11 = vld [vmem:[%s10449_s2 + $0x58] sm:$0xff]  ;;  %v6335_v18 = vld [vmem:[%s10449_s2 + $0x80] sm:$0xff]  ;;  %vm570_vm8 = vcmask 523264  }
 0x10b   :  { %v7238_v58 = vpop.f32.mrf.mxu0 }
 0x10c   :  { %v292_v15 = vmul.f32 0.01, %v248_v8  ;;  %vm277_vm7 = vcmp.ge.f32.partialorder %v248_v8, 0.0  ;;  %v318_v58 = vld [vmem:[%s10452_s5 + $0x38] sm:$0xff] }
 0x10d   :  { %v252_v59 = vpop.f32.mrf.mxu0 }
 0x10e   :  { %v253_v5 = vadd.f32 %v252_v59, %v8710_v0  ;;  %v307_v22 = vsel %vm277_vm7, %v248_v8, %v292_v15  ;;  %v319_v59 = vld [vmem:[%s10452_s5 + $0x40] sm:$0xff]  ;;  %v6316_v8 = vld [vmem:[%s10449_s2 + $0x68] sm:$0xff]  ;;  %v6337_v15 = vld [vmem:[%s10449_s2 + $0x90] sm:$0xff]  ;;  %vm554_vm7 = vcmask 1046528  }
 0x10f   :  { %v7241_v62 = vpop.f32.mrf.mxu0 }
 0x110   :  { %v293_v12 = vmul.f32 0.01, %v253_v5  ;;  %vm278_vm6 = vcmp.ge.f32.partialorder %v253_v5, 0.0  ;;  %v321_v62 = vld [vmem:[%s10452_s5 + $0x50] sm:$0xff] }
 0x111   :  { %v257_v63 = vpop.f32.mrf.mxu0 }
 0x112   :  { %v258_v3 = vadd.f32 %v257_v63, %v8710_v0  ;;  %v308_v19 = vsel %vm278_vm6, %v253_v5, %v293_v12  ;;  %vm266_vm6 = vcmp.ge.f32.partialorder %v193_v39, 0.0  ;;  %v322_v63 = vld [vmem:[%s10452_s5 + $0x58] sm:$0xff]  ;;  %v6313_v12 = vld [vmem:[%s10449_s2 + $0x50] sm:$0xff] }
 0x113   :  { %v7244_v2 = vpop.f32.mrf.mxu0  ;;  %v296_v33 = vsel %vm266_vm6, %v193_v39, %v281_v48  ;;  %v326_v5 = vld [vmem:[%s10452_s5 + $0x78] sm:$0xff] }
 0x114   :  { %v294_v9 = vmul.f32 0.01, %v258_v3  ;;  %vm279_vm5 = vcmp.ge.f32.partialorder %v258_v3, 0.0  ;;  %v323_v2 = vld [vmem:[%s10452_s5 + $0x60] sm:$0xff] }
 0x115   :  { %v262_v4 = vpop.f32.mrf.mxu0 }
 0x116   :  { %v263_v6 = vadd.f32 %v262_v4, %v8710_v0  ;;  %v309_v16 = vsel %vm279_vm5, %v258_v3, %v294_v9  ;;  %vm267_vm5 = vcmp.ge.f32.partialorder %v198_v41, 0.0  ;;  %v324_v3 = vld [vmem:[%s10452_s5 + $0x68] sm:$0xff]  ;;  %v325_v4 = vld [vmem:[%s10452_s5 + $0x70] sm:$0xff]  ;;  %v6315_v9 = vld [vmem:[%s10449_s2 + $0x60] sm:$0xff] }
 0x117   :  { %v7247_v7 = vpop.f32.mrf.mxu0  ;;  %v297_v49 = vsel %vm267_vm5, %v198_v41, %v282_v37 }
 0x118   :  { %vm280_vm4 = vcmp.ge.f32.partialorder %v263_v6, 0.0  ;;  %v295_v10 = vmul.f32 0.01, %v263_v6  ;;  %v6340_v7 = vld [vmem:[%s10449_s2 + $0xa8] sm:$0xff] }
 0x119   :  { %7362 = vmatprep.subr.mxu0 %v6340_v7 }
 0x11a   :  { %v310_v13 = vsel %vm280_vm4, %v263_v6, %v295_v10  ;;  %vm268_vm4 = vcmp.ge.f32.partialorder %v203_v38, 0.0  ;;  %v6317_v6 = vld [vmem:[%s10449_s2 + $0x70] sm:$0xff]  ;;  %7363 = vmatpush3.msra.mxu0 %v6340_v7  ;;  %v6339_v10 = vld [vmem:[%s10449_s2 + $0xa0] sm:$0xff] }
 0x11b   :  { %7248 = vmatprep.subr.mxu1 %v310_v13  ;;  %v298_v35 = vsel %vm268_vm4, %v203_v38, %v283_v45  ;;  %7364 = vmatprep.subr.mxu0 %v6339_v10 }
 0x11c   :  { %7249 = vmatpush3.msra.mxu1 %v310_v13  ;;  %7365 = vmatpush3.msra.mxu0 %v6339_v10  ;;  %v6338_v13 = vld [vmem:[%s10449_s2 + $0x98] sm:$0xff] }
 0x11d   :  { %7250 = vmatprep.subr.mxu1 %v309_v16  ;;  %7366 = vmatprep.subr.mxu0 %v6338_v13 }
 0x11e   :  { %7251 = vmatpush3.msra.mxu1 %v309_v16  ;;  %7367 = vmatpush3.msra.mxu0 %v6338_v13  ;;  %v6336_v16 = vld [vmem:[%s10449_s2 + $0x88] sm:$0xff]  ;;  %v533_v13 = vld [vmem:[%s10449_s2 + $0x20] sm:$0xff] }
 0x11f   :  { %7252 = vmatprep.subr.mxu1 %v308_v19  ;;  %7368 = vmatprep.subr.mxu0 %v6337_v15 }
 0x120   :  { %7253 = vmatpush3.msra.mxu1 %v308_v19  ;;  %7369 = vmatpush3.msra.mxu0 %v6337_v15  ;;  %v536_v19 = vld [vmem:[%s10449_s2 + $0x38] sm:$0xff] }
 0x121   :  { %7254 = vmatprep.subr.mxu1 %v307_v22  ;;  %7370 = vmatprep.subr.mxu0 %v6336_v16 }
 0x122   :  { %7255 = vmatpush3.msra.mxu1 %v307_v22  ;;  %7371 = vmatpush3.msra.mxu0 %v6336_v16  ;;  %v532_v16 = vld [vmem:[%s10449_s2 + $0x18] sm:$0xff] }
 0x123   :  { %7256 = vmatprep.subr.mxu1 %v306_v25  ;;  %7372 = vmatprep.subr.mxu0 %v6335_v18 }
 0x124   :  { %7257 = vmatpush3.msra.mxu1 %v306_v25  ;;  %7373 = vmatpush3.msra.mxu0 %v6335_v18 }
 0x125   :  { %7258 = vmatprep.subr.mxu1 %v305_v28  ;;  %7414 = vmatprep.subr.mxu0 %v6374_v20 }
 0x126   :  { %7259 = vmatpush3.msra.mxu1 %v305_v28 }
 0x127   :  { %7260 = vmatprep.subr.mxu1 %v304_v31 }
 0x128   :  { %7261 = vmatpush3.msra.mxu1 %v304_v31 }
 0x129   :  { %7262 = vmatprep.subr.mxu1 %v303_v36 }
 0x12a   :  { %7263 = vmatpush3.msra.mxu1 %v303_v36 }
 0x12b   :  { %7264 = vmatprep.subr.mxu1 %v302_v42 }
 0x12c   :  { %7265 = vmatpush3.msra.mxu1 %v302_v42 }
 0x12d   :  { %7266 = vmatprep.subr.mxu1 %v301_v44 }
 0x12e   :  { %7267 = vmatpush3.msra.mxu1 %v301_v44 }
 0x12f   :  { %7268 = vmatprep.subr.mxu1 %v300_v46 }
 0x130   :  { %7269 = vmatpush3.msra.mxu1 %v300_v46 }
 0x131   :  { %7270 = vmatprep.subr.mxu1 %v299_v47 }
 0x132   :  { %7271 = vmatpush3.msra.mxu1 %v299_v47 }
 0x133   :  { %7272 = vmatprep.subr.mxu1 %v298_v35 }
 0x134   :  { %7273 = vmatpush3.msra.mxu1 %v298_v35 }
 0x135   :  { %7274 = vmatprep.subr.mxu1 %v297_v49 }
 0x136   :  { %7275 = vmatpush3.msra.mxu1 %v297_v49 }
 0x137   :  { %7276 = vmatprep.subr.mxu1 %v296_v33 }
 0x138   :  { %7277 = vmatpush3.msra.mxu1 %v296_v33 }
 0x139   :  { %7279 = vmatmul.mubr.msk.f32.vlgmr.msra.gmra.mxu1 %vm327_vm3, %v312_v50  ;;  %7302 = vmatprep.subr.mxu1 %v6318_v51 }
 0x13a   :  { %7281 = vmatprep.mubr.msk.f32.mxu1 %vm327_vm3, %v313_v52  ;;  %7303 = vmatpush3.msra.mxu1 %v6318_v51 }
 0x13b   :  { %7304 = vmatprep.subr.mxu1 %v6317_v6 }
 0x13c   :  { %7305 = vmatpush3.msra.mxu1 %v6317_v6  ;;  %v6372_v6 = vld [vmem:[%s10449_s2 + $0x128] sm:$0xff] }
 0x13d   :  { %7282 = vmatmul.mubr.msk.f32.gmra.mxu1 %vm327_vm3, %v314_v53  ;;  %7306 = vmatprep.subr.mxu1 %v6316_v8 }
 0x13e   :  { %7284 = vmatprep.mubr.msk.f32.mxu1 %vm327_vm3, %v315_v54  ;;  %7307 = vmatpush3.msra.mxu1 %v6316_v8 }
 0x13f   :  { %7308 = vmatprep.subr.mxu1 %v6315_v9 }
 0x140   :  { %7309 = vmatpush3.msra.mxu1 %v6315_v9 }
 0x141   :  { %7285 = vmatmul.mubr.msk.f32.gmra.mxu1 %vm327_vm3, %v316_v55  ;;  %7310 = vmatprep.subr.mxu1 %v6314_v11 }
 0x142   :  { %7287 = vmatprep.mubr.msk.f32.mxu1 %vm327_vm3, %v317_v56  ;;  %7311 = vmatpush3.msra.mxu1 %v6314_v11  ;;  %v535_v56 = vld [vmem:[%s10449_s2 + $0x30] sm:$0xff] }
 0x143   :  { %7312 = vmatprep.subr.mxu1 %v6313_v12 }
 0x144   :  { %7313 = vmatpush3.msra.mxu1 %v6313_v12 }
 0x145   :  { %7288 = vmatmul.mubr.msk.f32.gmra.mxu1 %vm327_vm3, %v318_v58  ;;  %7314 = vmatprep.subr.mxu1 %v6312_v14  ;;  %v6373_v58 = vld [vmem:[%s10449_s2 + $0x130] sm:$0xff] }
 0x146   :  { %7290 = vmatprep.mubr.msk.f32.mxu1 %vm327_vm3, %v319_v59  ;;  %7315 = vmatpush3.msra.mxu1 %v6312_v14  ;;  %v6371_v14 = vld [vmem:[%s10449_s2 + $0x120] sm:$0xff] }
 0x147   :  { %7316 = vmatprep.subr.mxu1 %v6311_v17 }
 0x148   :  { %7317 = vmatpush3.msra.mxu1 %v6311_v17 }
 0x149   :  { %7291 = vmatmul.mubr.msk.f32.gmra.mxu1 %vm327_vm3, %v320_v60  ;;  %7330 = vmatprep.subr.mxu1 %v536_v19 }
 0x14a   :  { %7293 = vmatprep.mubr.msk.f32.mxu1 %vm327_vm3, %v321_v62 }
 0x14d   :  { %7294 = vmatmul.mubr.msk.f32.gmra.mxu1 %vm327_vm3, %v322_v63  ;;  %v534_v63 = vld [vmem:[%s10449_s2 + $0x28] sm:$0xff] }
 0x14e   :  { %7296 = vmatprep.mubr.msk.f32.mxu1 %vm327_vm3, %v323_v2 }
 0x151   :  { %7297 = vmatmul.mubr.msk.f32.gmra.mxu1 %vm327_vm3, %v324_v3 }
 0x152   :  { %7299 = vmatprep.mubr.msk.f32.mxu1 %vm327_vm3, %v325_v4 }
 0x155   :  { %7300 = vmatmul.mubr.msk.f32.gmra.mxu1 %vm327_vm3, %v326_v5 }
 0x1f9   :  { %v7280_v21 = vpop.f32.mrf.mxu1 }
 0x1fb   :  { %v442_v22 = vpop.f32.mrf.mxu1 }
 0x1fd   :  { %v7283_v23 = vpop.f32.mrf.mxu1 }
 0x1ff   :  { %v452_v24 = vpop.f32.mrf.mxu1 }
 0x201   :  { %v7286_v25 = vpop.f32.mrf.mxu1 }
 0x203   :  { %v462_v26 = vpop.f32.mrf.mxu1 }
 0x205   :  { %v7289_v27 = vpop.f32.mrf.mxu1 }
 0x207   :  { %v472_v28 = vpop.f32.mrf.mxu1 }
 0x209   :  { %v7292_v29 = vpop.f32.mrf.mxu1 }
 0x20a   :  { %v8840_v30 = vmax.f32 %v7280_v21, %v7292_v29  ;;  %v529_v29 = vld [vmem:[%s10449_s2] sm:$0xff] }
 0x20b   :  { %v482_v31 = vpop.f32.mrf.mxu1 }
 0x20c   :  { %v8842_v32 = vmax.f32 %v442_v22, %v482_v31  ;;  %v556_v36 = vrot.slane %v8840_v30, 1  ;;  %v824_v41 = vrot.slane %v8840_v30, 2  ;;  %v6367_v31 = vld [vmem:[%s10449_s2 + $0x100] sm:$0xff] }
 0x20d   :  { %v7295_v34 = vpop.f32.mrf.mxu1 }
 0x20e   :  { %v8845_v38 = vmax.f32 %v7283_v23, %v7295_v34  ;;  %v555_v40 = vrot.slane %v8842_v32, 1  ;;  %v823_v42 = vrot.slane %v8842_v32, 2  ;;  %v531_v23 = vld [vmem:[%s10449_s2 + $0x10] sm:$0xff] }
 0x20f   :  { %v492_v43 = vpop.f32.mrf.mxu1 }
 0x210   :  { %v8850_v44 = vmax.f32 %v452_v24, %v492_v43  ;;  %v557_v39 = vsel %vm554_vm7, %v555_v40, %v556_v36  ;;  %v825_v45 = vsel %vm822_vm9, %v823_v42, %v824_v41  ;;  %v560_v48 = vrot.slane %v8845_v38, 1  ;;  %v6369_v24 = vld [vmem:[%s10449_s2 + $0x110] sm:$0xff]  ;;  %v6358_v40 = vld [vmem:[%s10449_s2 + $0xf8] sm:$0xff] }
 0x211   :  { %v7298_v46 = vpop.f32.mrf.mxu1  ;;  %7318 = vmatprep.mubr.msk.f32.mxu1 %vm570_vm8, %v557_v39  ;;  %7374 = vmatprep.mubr.msk.f32.mxu0 %vm570_vm8, %v825_v45  ;;  %v828_v33 = vrot.slane %v8845_v38, 2  ;;  %v1135_v42 = vrot.slane %v8845_v38, 4  ;;  %v6357_v43 = vld [vmem:[%s10449_s2 + $0xf0] sm:$0xff] }
 0x212   :  { %v558_v37 = vrot.slane %v8850_v44, 1  ;;  %v826_v47 = vrot.slane %v8850_v44, 2  ;;  %v8859_v35 = vmax.f32 %v7286_v25, %v7298_v46  ;;  %v530_v25 = vld [vmem:[%s10449_s2 + $0x8] sm:$0xff] }
 0x213   :  { %v502_v49 = vpop.f32.mrf.mxu1  ;;  %v6356_v46 = vld [vmem:[%s10449_s2 + $0xe8] sm:$0xff] }
 0x214   :  { %v8862_v50 = vmax.f32 %v462_v26, %v502_v49  ;;  %v559_v51 = vsel %vm554_vm7, %v556_v36, %v558_v37  ;;  %v827_v52 = vsel %vm822_vm9, %v824_v41, %v826_v47  ;;  %v561_v53 = vsel %vm554_vm7, %v558_v37, %v560_v48  ;;  %v6368_v26 = vld [vmem:[%s10449_s2 + $0x108] sm:$0xff] }
 0x215   :  { %v7301_v54 = vpop.f32.mrf.mxu1  ;;  %7319 = vmatmul.mubr.msk.f32.vlgmr.msra.gmra.mxu1 %vm570_vm8, %v559_v51  ;;  %7375 = vmatmul.mubr.msk.f32.vlgmr.msra.gmra.mxu0 %vm570_vm8, %v827_v52  ;;  %v829_v55 = vsel %vm822_vm9, %v826_v47, %v828_v33  ;;  %v564_v2 = vrot.slane %v8859_v35, 1  ;;  %v832_v7 = vrot.slane %v8859_v35, 2  ;;  %v1133_v36 = vrot.slane %v8850_v44, 4  ;;  %v6354_v51 = vld [vmem:[%s10449_s2 + $0xd8] sm:$0xff] }
 0x216   :  { %7321 = vmatprep.mubr.msk.f32.mxu1 %vm570_vm8, %v561_v53  ;;  %7331 = vmatpush3.msra.mxu1 %v536_v19  ;;  %v562_v59 = vrot.slane %v8862_v50, 1  ;;  %v830_v60 = vrot.slane %v8862_v50, 2  ;;  %v8892_v8 = vmax.f32 %v7289_v27, %v7301_v54  ;;  %v6370_v19 = vld [vmem:[%s10449_s2 + $0x118] sm:$0xff]  ;;  %v1130_v27 = vrot.slane %v8842_v32, 4  ;;  %v6353_v54 = vld [vmem:[%s10449_s2 + $0xd0] sm:$0xff] }
 0x217   :  { %7377 = vmatprep.mubr.msk.f32.mxu0 %vm570_vm8, %v829_v55  ;;  %7415 = vmatpush3.msra.mxu0 %v6374_v20  ;;  %v512_v62 = vpop.f32.mrf.mxu1  ;;  %v1136_v39 = vsel %vm122_vm0, %v1133_v36, %v1135_v42  ;;  %v1137_v45 = vrot.slane %v8862_v50, 4  ;;  %v1139_v37 = vrot.slane %v8859_v35, 4 }
 0x218   :  { %v8884_v3 = vmax.f32 %v472_v28, %v512_v62  ;;  %7332 = vmatprep.subr.mxu1 %v535_v56  ;;  %7416 = vmatprep.subr.mxu0 %v6373_v58  ;;  %v563_v4 = vsel %vm554_vm7, %v560_v48, %v562_v59  ;;  %v831_v5 = vsel %vm822_vm9, %v828_v33, %v830_v60  ;;  %v568_v17 = vrot.slane %v8892_v8, 1  ;;  %v6355_v48 = vld [vmem:[%s10449_s2 + $0xe0] sm:$0xff] }
 0x219   :  { %7333 = vmatpush3.msra.mxu1 %v535_v56  ;;  %7417 = vmatpush3.msra.mxu0 %v6373_v58  ;;  %v565_v9 = vsel %vm554_vm7, %v562_v59, %v564_v2  ;;  %v833_v10 = vsel %vm822_vm9, %v830_v60, %v832_v7  ;;  %v836_v20 = vrot.slane %v8892_v8, 2  ;;  %v1131_v28 = vrot.slane %v8840_v30, 4  ;;  %v6352_v56 = vld [vmem:[%s10449_s2 + $0xc8] sm:$0xff]  ;;  %v6351_v60 = vld [vmem:[%s10449_s2 + $0xc0] sm:$0xff] }
 0x21a   :  { %7322 = vmatmul.mubr.msk.f32.gmra.mxu1 %vm570_vm8, %v563_v4  ;;  %7334 = vmatprep.subr.mxu1 %v534_v63  ;;  %v566_v11 = vrot.slane %v8884_v3, 1  ;;  %v834_v12 = vrot.slane %v8884_v3, 2  ;;  %v1138_v47 = vsel %vm122_vm0, %v1135_v42, %v1137_v45  ;;  %v1140_v49 = vsel %vm122_vm0, %v1137_v45, %v1139_v37 }
 0x21b   :  { %7378 = vmatmul.mubr.msk.f32.gmra.mxu0 %vm570_vm8, %v831_v5  ;;  %7418 = vmatprep.subr.mxu0 %v6372_v6  ;;  %v1132_v34 = vsel %vm122_vm0, %v1130_v27, %v1131_v28  ;;  %v1134_v41 = vsel %vm122_vm0, %v1131_v28, %v1133_v36  ;;  %v1141_v33 = vrot.slane %v8884_v3, 4  ;;  %v1143_v52 = vrot.slane %v8892_v8, 4 }
 0x21c   :  { %7324 = vmatprep.mubr.msk.f32.mxu1 %vm570_vm8, %v565_v9  ;;  %7335 = vmatpush3.msra.mxu1 %v534_v63  ;;  %v567_v15 = vsel %vm554_vm7, %v564_v2, %v566_v11  ;;  %v835_v18 = vsel %vm822_vm9, %v832_v7, %v834_v12  ;;  %v569_v21 = vsel %vm554_vm7, %v566_v11, %v568_v17  ;;  %v977_v58 = vrot.slane %v8842_v32, 3 }
 0x21d   :  { %7380 = vmatprep.mubr.msk.f32.mxu0 %vm570_vm8, %v833_v10  ;;  %7419 = vmatpush3.msra.mxu0 %v6372_v6  ;;  %v837_v22 = vsel %vm822_vm9, %v834_v12, %v836_v20  ;;  %v1142_v53 = vsel %vm122_vm0, %v1139_v37, %v1141_v33  ;;  %v1144_v55 = vsel %vm122_vm0, %v1141_v33, %v1143_v52  ;;  %v978_v59 = vrot.slane %v8840_v30, 3 }
 0x21e   :  { %7336 = vmatprep.subr.mxu1 %v533_v13  ;;  %7420 = vmatprep.subr.mxu0 %v6371_v14  ;;  %v980_v62 = vrot.slane %v8850_v44, 3  ;;  %v984_v2 = vrot.slane %v8862_v50, 3  ;;  %v986_v4 = vrot.slane %v8859_v35, 3  ;;  %v988_v6 = vrot.slane %v8884_v3, 3 }
 0x21f   :  { %7337 = vmatpush3.msra.mxu1 %v533_v13  ;;  %7421 = vmatpush3.msra.mxu0 %v6371_v14 }
 0x220   :  { %7325 = vmatmul.mubr.msk.f32.gmra.mxu1 %vm570_vm8, %v567_v15  ;;  %7338 = vmatprep.subr.mxu1 %v532_v16  ;;  %v981_v63 = vsel %vm976_vm10, %v978_v59, %v980_v62  ;;  %v989_v7 = vsel %vm976_vm10, %v986_v4, %v988_v6 }
 0x221   :  { %7381 = vmatmul.mubr.msk.f32.gmra.mxu0 %vm570_vm8, %v835_v18  ;;  %7422 = vmatprep.subr.mxu0 %v6370_v19 }
 0x222   :  { %7327 = vmatprep.mubr.msk.f32.mxu1 %vm570_vm8, %v569_v21  ;;  %7339 = vmatpush3.msra.mxu1 %v532_v16 }
 0x223   :  { %7383 = vmatprep.mubr.msk.f32.mxu0 %vm570_vm8, %v837_v22  ;;  %7423 = vmatpush3.msra.mxu0 %v6370_v19 }
 0x224   :  { %7340 = vmatprep.subr.mxu1 %v531_v23  ;;  %7424 = vmatprep.subr.mxu0 %v6369_v24 }
 0x225   :  { %7341 = vmatpush3.msra.mxu1 %v531_v23  ;;  %7425 = vmatpush3.msra.mxu0 %v6369_v24 }
 0x226   :  { %7328 = vmatmul.mubr.msk.f32.gmra.mxu1 %vm570_vm8, %v568_v17  ;;  %7342 = vmatprep.subr.mxu1 %v530_v25 }
 0x227   :  { %7384 = vmatmul.mubr.msk.f32.gmra.mxu0 %vm570_vm8, %v836_v20  ;;  %7426 = vmatprep.subr.mxu0 %v6368_v26 }
 0x228   :  { %7343 = vmatpush3.msra.mxu1 %v530_v25  ;;  %7346 = vmatprep.mubr.msk.f32.mxu1 %vm570_vm8, %v8842_v32  ;;  %v979_v32 = vsel %vm976_vm10, %v977_v58, %v978_v59 }
 0x229   :  { %7427 = vmatpush3.msra.mxu0 %v6368_v26  ;;  %7430 = vmatprep.mubr.msk.f32.mxu0 %vm570_vm8, %v1132_v34 }
 0x22a   :  { %7344 = vmatprep.subr.mxu1 %v529_v29  ;;  %7428 = vmatprep.subr.mxu0 %v6367_v31 }
 0x22b   :  { %7345 = vmatpush3.msra.mxu1 %v529_v29  ;;  %7429 = vmatpush3.msra.mxu0 %v6367_v31 }
 0x22c   :  { %7347 = vmatmul.mubr.msk.f32.vlgmr.msra.gmra.mxu1 %vm570_vm8, %v8840_v30  ;;  %7386 = vmatprep.subr.mxu1 %v6358_v40  ;;  %v982_v30 = vrot.slane %v8845_v38, 3 }
 0x22d   :  { %7431 = vmatmul.mubr.msk.f32.vlgmr.msra.gmra.mxu0 %vm570_vm8, %v1134_v41  ;;  %7349 = vmatprep.mubr.msk.f32.mxu1 %vm570_vm8, %v8850_v44 }
 0x22e   :  { %7387 = vmatpush3.msra.mxu1 %v6358_v40  ;;  %7433 = vmatprep.mubr.msk.f32.mxu0 %vm570_vm8, %v1136_v39  ;;  %v983_v44 = vsel %vm976_vm10, %v980_v62, %v982_v30  ;;  %v985_v5 = vsel %vm976_vm10, %v982_v30, %v984_v2 }
 0x22f   :  { %7388 = vmatprep.subr.mxu1 %v6357_v43 }
 0x230   :  { %7389 = vmatpush3.msra.mxu1 %v6357_v43 }
 0x231   :  { %7350 = vmatmul.mubr.msk.f32.gmra.mxu1 %vm570_vm8, %v8845_v38  ;;  %7390 = vmatprep.subr.mxu1 %v6356_v46  ;;  %v987_v38 = vsel %vm976_vm10, %v984_v2, %v986_v4 }
 0x232   :  { %7434 = vmatmul.mubr.msk.f32.gmra.mxu0 %vm570_vm8, %v1138_v47  ;;  %7352 = vmatprep.mubr.msk.f32.mxu1 %vm570_vm8, %v8862_v50  ;;  %v990_v50 = vrot.slane %v8892_v8, 3 }
 0x233   :  { %7391 = vmatpush3.msra.mxu1 %v6356_v46  ;;  %7436 = vmatprep.mubr.msk.f32.mxu0 %vm570_vm8, %v1140_v49 }
 0x234   :  { %7392 = vmatprep.subr.mxu1 %v6355_v48  ;;  %v991_v9 = vsel %vm976_vm10, %v988_v6, %v990_v50 }
 0x235   :  { %7393 = vmatpush3.msra.mxu1 %v6355_v48 }
 0x236   :  { %7353 = vmatmul.mubr.msk.f32.gmra.mxu1 %vm570_vm8, %v8859_v35  ;;  %7394 = vmatprep.subr.mxu1 %v6354_v51  ;;  %v1310_v35 = vld [vmem:[%s10453_s6] sm:$0xff] }
 0x237   :  { %7437 = vmatmul.mubr.msk.f32.gmra.mxu0 %vm570_vm8, %v1142_v53  ;;  %7355 = vmatprep.mubr.msk.f32.mxu1 %vm570_vm8, %v8884_v3 }
 0x238   :  { %7395 = vmatpush3.msra.mxu1 %v6354_v51  ;;  %7439 = vmatprep.mubr.msk.f32.mxu0 %vm570_vm8, %v1144_v55 }
 0x239   :  { %7396 = vmatprep.subr.mxu1 %v6353_v54 }
 0x23a   :  { %7397 = vmatpush3.msra.mxu1 %v6353_v54 }
 0x23b   :  { %7356 = vmatmul.mubr.msk.f32.gmra.mxu1 %vm570_vm8, %v8892_v8  ;;  %7398 = vmatprep.subr.mxu1 %v6352_v56 }
 0x23c   :  { %7440 = vmatmul.mubr.msk.f32.gmra.mxu0 %vm570_vm8, %v1143_v52  ;;  %7399 = vmatpush3.msra.mxu1 %v6352_v56 }
 0x23d   :  { %7402 = vmatprep.mubr.msk.f32.mxu1 %vm570_vm8, %v979_v32  ;;  %7400 = vmatprep.subr.mxu1 %v6351_v60  ;;  %v1276_v32 = vsub.s32 1, %v8701_v57 }
 0x23e   :  { %7401 = vmatpush3.msra.mxu1 %v6351_v60 }
 0x23f   :  { %7403 = vmatmul.mubr.msk.f32.vlgmr.msra.gmra.mxu1 %vm570_vm8, %v981_v63 }
 0x240   :  { %7405 = vmatprep.mubr.msk.f32.mxu1 %vm570_vm8, %v983_v44 }
 0x243   :  { %7406 = vmatmul.mubr.msk.f32.gmra.mxu1 %vm570_vm8, %v985_v5 }
 0x244   :  { %7408 = vmatprep.mubr.msk.f32.mxu1 %vm570_vm8, %v987_v38 }
 0x247   :  { %7409 = vmatmul.mubr.msk.f32.gmra.mxu1 %vm570_vm8, %v989_v7 }
 0x248   :  { %7411 = vmatprep.mubr.msk.f32.mxu1 %vm570_vm8, %v991_v9 }
 0x24b   :  { %7412 = vmatmul.mubr.msk.f32.gmra.mxu1 %vm570_vm8, %v990_v50 }
 0x24c   :  { %7458 = vmatprep.mubr.msk.f32.mxu1 %vm1318_vm11, %v1310_v35 }
 0x2d5   :  { %v7320_v3 = vpop.f32.mrf.mxu1  ;;  %v7376_v10 = vpop.f32.mrf.mxu0 }
 0x2d7   :  { %v653_v8 = vpop.f32.mrf.mxu1  ;;  %v9034_v11 = vpop.f32.mrf.mxu0 }
 0x2da   :  { %v7323_v12 = vpop.f32.mrf.mxu1 }
 0x2db   :  { %v7379_v13 = vpop.f32.mrf.mxu0 }
 0x2dc   :  { %v663_v14 = vpop.f32.mrf.mxu1 }
 0x2dd   :  { %v930_v15 = vpop.f32.mrf.mxu0 }
 0x2e0   :  { %v7326_v16 = vpop.f32.mrf.mxu1 }
 0x2e1   :  { %v7382_v18 = vpop.f32.mrf.mxu0 }
 0x2e2   :  { %v673_v17 = vpop.f32.mrf.mxu1 }
 0x2e3   :  { %v940_v20 = vpop.f32.mrf.mxu0 }
 0x2e6   :  { %v7329_v19 = vpop.f32.mrf.mxu1 }
 0x2e7   :  { %v7385_v22 = vpop.f32.mrf.mxu0 }
 0x2e8   :  { %v683_v21 = vpop.f32.mrf.mxu1 }
 0x2e9   :  { %v950_v25 = vpop.f32.mrf.mxu0 }
 0x2ec   :  { %v7348_v23 = vpop.f32.mrf.mxu1 }
 0x2ed   :  { %v7432_v27 = vpop.f32.mrf.mxu0  ;;  %v780_v59 = vadd.f32 %v7348_v23, %v7320_v3 }
 0x2ee   :  { %v774_v24 = vpop.f32.mrf.mxu1 }
 0x2ef   :  { %v9036_v31 = vpop.f32.mrf.mxu0  ;;  %v775_v2 = vadd.f32 %v774_v24, %v653_v8  ;;  %v960_v9 = vadd.f32 %v7376_v10, %v780_v59  ;;  %v6395_v59 = vld [vmem:[%s10450_s3 + $0x38] sm:$0xff] }
 0x2f0   :  { %7470 = vmatprep.subr.mxu0 %v6395_v59 }
 0x2f1   :  { %v7351_v26 = vpop.f32.mrf.mxu1  ;;  %v959_v8 = vadd.f32 %v9034_v11, %v775_v2  ;;  %7471 = vmatpush3.msra.mxu0 %v6395_v59  ;;  %v6393_v2 = vld [vmem:[%s10450_s3 + $0x28] sm:$0xff]  ;;  %v2010_v59 = vld [vmem:[%s10454_s7] sm:$0xff] }
 0x2f2   :  { %v7435_v36 = vpop.f32.mrf.mxu0  ;;  %v790_v48 = vadd.f32 %v7351_v26, %v7323_v12 }
 0x2f3   :  { %v784_v28 = vpop.f32.mrf.mxu1 }
 0x2f4   :  { %v1237_v41 = vpop.f32.mrf.mxu0  ;;  %v785_v52 = vadd.f32 %v784_v28, %v663_v14  ;;  %v962_v60 = vadd.f32 %v7379_v13, %v790_v48  ;;  %v9040_v14 = vrot.slane %v8707_v61, %v1276_v32  ;;  %v6394_v32 = vld [vmem:[%s10450_s3 + $0x30] sm:$0xff] }
 0x2f5   :  { %7472 = vmatprep.subr.mxu0 %v6394_v32 }
 0x2f6   :  { %v7354_v29 = vpop.f32.mrf.mxu1  ;;  %v961_v5 = vadd.f32 %v930_v15, %v785_v52  ;;  %v1312_v52 = vld [vmem:[%s10453_s6 + $0x10] sm:$0xff]  ;;  %7473 = vmatpush3.msra.mxu0 %v6394_v32 }
 0x2f7   :  { %v800_v45 = vadd.f32 %v7354_v29, %v7326_v16  ;;  %v7438_v46 = vpop.f32.mrf.mxu0  ;;  %7474 = vmatprep.subr.mxu0 %v6393_v2 }
 0x2f8   :  { %v794_v34 = vpop.f32.mrf.mxu1  ;;  %7475 = vmatpush3.msra.mxu0 %v6393_v2 }
 0x2f9   :  { %v795_v47 = vadd.f32 %v794_v34, %v673_v17  ;;  %v964_v51 = vadd.f32 %v7382_v18, %v800_v45  ;;  %v1247_v53 = vpop.f32.mrf.mxu0 }
 0x2fb   :  { %v7357_v40 = vpop.f32.mrf.mxu1  ;;  %v963_v58 = vadd.f32 %v940_v20, %v795_v47 }
 0x2fc   :  { %v810_v33 = vadd.f32 %v7357_v40, %v7329_v19  ;;  %v7441_v44 = vpop.f32.mrf.mxu0 }
 0x2fd   :  { %v804_v42 = vpop.f32.mrf.mxu1 }
 0x2fe   :  { %v805_v55 = vadd.f32 %v804_v42, %v683_v21  ;;  %v966_v63 = vadd.f32 %v7385_v22, %v810_v33  ;;  %v1257_v17 = vpop.f32.mrf.mxu0 }
 0x2ff   :  { %v7404_v43 = vpop.f32.mrf.mxu1 }
 0x300   :  { %v965_v7 = vadd.f32 %v950_v25, %v805_v55  ;;  %v1114_v18 = vadd.f32 %v7404_v43, %v960_v9  ;;  %v1315_v55 = vld [vmem:[%s10453_s6 + $0x28] sm:$0xff] }
 0x301   :  { %v1074_v39 = vpop.f32.mrf.mxu1 }
 0x302   :  { %v1113_v22 = vadd.f32 %v1074_v39, %v959_v8  ;;  %v1267_v25 = vadd.f32 %v7432_v27, %v1114_v18  ;;  %v6414_v8 = vld [vmem:[%s10450_s3 + $0x70] sm:$0xff] }
 0x303   :  { %v7407_v37 = vpop.f32.mrf.mxu1 }
 0x304   :  { %v1116_v4 = vadd.f32 %v7407_v37, %v962_v60  ;;  %v1266_v34 = vadd.f32 %v9036_v31, %v1113_v22  ;;  %v1279_v27 = vadd.f32 %v9040_v14, %v1267_v25  ;;  %v1459_v60 = vld [vmem:[%s10450_s3 + $0x18] sm:$0xff]  ;;  %v6413_v22 = vld [vmem:[%s10450_s3 + $0x68] sm:$0xff] }
 0x305   :  { %v1084_v49 = vpop.f32.mrf.mxu1 }
 0x306   :  { %v1115_v35 = vadd.f32 %v1084_v49, %v961_v5  ;;  %v1269_v19 = vadd.f32 %v7435_v36, %v1116_v4  ;;  %v1278_v39 = vadd.f32 %v9040_v14, %v1266_v34  ;;  %v1295_v37 = vmul.f32 0.01, %v1279_v27  ;;  %v6392_v4 = vld [vmem:[%s10450_s3 + $0x20] sm:$0xff]  ;;  %v6407_v5 = vld [vmem:[%s10450_s3 + $0x58] sm:$0xff] }
 0x307   :  { %v7410_v54 = vpop.f32.mrf.mxu1  ;;  %7476 = vmatprep.subr.mxu0 %v6392_v4 }
 0x308   :  { %v1118_v56 = vadd.f32 %v7410_v54, %v964_v51  ;;  %v1268_v10 = vadd.f32 %v1237_v41, %v1115_v35  ;;  %v1281_v26 = vadd.f32 %v9040_v14, %v1269_v19  ;;  %v1294_v48 = vmul.f32 0.01, %v1278_v39  ;;  %v1311_v51 = vld [vmem:[%s10453_s6 + $0x8] sm:$0xff]  ;;  %v1314_v54 = vld [vmem:[%s10453_s6 + $0x20] sm:$0xff]  ;;  %7477 = vmatpush3.msra.mxu0 %v6392_v4 }
 0x309   :  { %v1094_v62 = vpop.f32.mrf.mxu1  ;;  %7498 = vmatprep.subr.mxu0 %v6407_v5 }
 0x30a   :  { %v1117_v30 = vadd.f32 %v1094_v62, %v963_v58  ;;  %v1271_v38 = vadd.f32 %v7438_v46, %v1118_v56  ;;  %v1280_v36 = vadd.f32 %v9040_v14, %v1268_v10  ;;  %v1297_v43 = vmul.f32 0.01, %v1281_v26  ;;  %v1316_v56 = vld [vmem:[%s10453_s6 + $0x30] sm:$0xff]  ;;  %v1317_v58 = vld [vmem:[%s10453_s6 + $0x38] sm:$0xff] }
 0x30b   :  { %v7413_v6 = vpop.f32.mrf.mxu1  ;;  %vm1289_vm5 = vcmp.ge.f32.partialorder %v1281_v26, 0.0  ;;  %v1458_v62 = vld [vmem:[%s10450_s3 + $0x10] sm:$0xff] }
 0x30c   :  { %v1120_v50 = vadd.f32 %v7413_v6, %v966_v63  ;;  %v1270_v3 = vadd.f32 %v1247_v53, %v1117_v30  ;;  %v1283_v15 = vadd.f32 %v9040_v14, %v1271_v38  ;;  %v1296_v31 = vmul.f32 0.01, %v1280_v36  ;;  %v1313_v53 = vld [vmem:[%s10453_s6 + $0x18] sm:$0xff]  ;;  %v1457_v30 = vld [vmem:[%s10450_s3 + $0x8] sm:$0xff]  ;;  %v1456_v63 = vld [vmem:[%s10450_s3] sm:$0xff] }
 0x30d   :  { %v1104_v12 = vpop.f32.mrf.mxu1  ;;  %vm1288_vm6 = vcmp.ge.f32.partialorder %v1280_v36, 0.0  ;;  %v1305_v46 = vsel %vm1289_vm5, %v1281_v26, %v1297_v43 }
 0x30e   :  { %v1273_v13 = vadd.f32 %v7441_v44, %v1120_v50  ;;  %v1119_v16 = vadd.f32 %v1104_v12, %v965_v7  ;;  %v1282_v23 = vadd.f32 %v9040_v14, %v1270_v3  ;;  %v1299_v29 = vmul.f32 0.01, %v1283_v15  ;;  %v6415_v44 = vld [vmem:[%s10450_s3 + $0x78] sm:$0xff] }
 0x30f   :  { %vm1291_vm15 = vcmp.ge.f32.partialorder %v1283_v15, 0.0  ;;  %v1304_v47 = vsel %vm1288_vm6, %v1280_v36, %v1296_v31  ;;  %v6423_v31 = vld [vmem:[%s10450_s3 + $0x98] sm:$0xff] }
 0x310   :  { %v1285_v20 = vadd.f32 %v9040_v14, %v1273_v13  ;;  %v1272_v21 = vadd.f32 %v1257_v17, %v1119_v16  ;;  %v1298_v42 = vmul.f32 0.01, %v1282_v23  ;;  %vm1290_vm4 = vcmp.ge.f32.partialorder %v1282_v23, 0.0 }
 0x311   :  { %v1307_v41 = vsel %vm1291_vm15, %v1283_v15, %v1299_v29  ;;  %vm1476_vm15 = vcmask 261120   ;;  %v6406_v29 = vld [vmem:[%s10450_s3 + $0x50] sm:$0xff] }
 0x312   :  { %v1284_v61 = vadd.f32 %v9040_v14, %v1272_v21  ;;  %vm1293_vm13 = vcmp.ge.f32.partialorder %v1285_v20, 0.0  ;;  %v1301_v24 = vmul.f32 0.01, %v1285_v20  ;;  %v1306_v45 = vsel %vm1290_vm4, %v1282_v23, %v1298_v42  ;;  %v6405_v42 = vld [vmem:[%s10450_s3 + $0x48] sm:$0xff] }
 0x313   :  { %vm2014_vm4 = vcmask 203776  }
 0x314   :  { %v1309_v28 = vsel %vm1293_vm13, %v1285_v20, %v1301_v24  ;;  %vm1292_vm14 = vcmp.ge.f32.partialorder %v1284_v61, 0.0  ;;  %v1300_v11 = vmul.f32 0.01, %v1284_v61  ;;  %vm1287_vm13 = vcmp.ge.f32.partialorder %v1279_v27, 0.0 }
 0x315   :  { %7442 = vmatprep.subr.msk.mxu1 %vm1343_vm12, %v1309_v28  ;;  %v1303_v49 = vsel %vm1287_vm13, %v1279_v27, %v1295_v37 }
 0x316   :  { %7443 = vmatpush3.msk.msra.mxu1 %vm1343_vm12, %v1309_v28  ;;  %v1308_v40 = vsel %vm1292_vm14, %v1284_v61, %v1300_v11  ;;  %vm1286_vm14 = vcmp.ge.f32.partialorder %v1278_v39, 0.0  ;;  %v6412_v61 = vld [vmem:[%s10450_s3 + $0x60] sm:$0xff] }
 0x317   :  { %7444 = vmatprep.subr.mxu1 %v1308_v40  ;;  %v1302_v33 = vsel %vm1286_vm14, %v1278_v39, %v1294_v48  ;;  %v6404_v39 = vld [vmem:[%s10450_s3 + $0x40] sm:$0xff] }
 0x318   :  { %7445 = vmatpush3.msra.mxu1 %v1308_v40 }
 0x319   :  { %7446 = vmatprep.subr.mxu1 %v1307_v41 }
 0x31a   :  { %7447 = vmatpush3.msra.mxu1 %v1307_v41 }
 0x31b   :  { %7448 = vmatprep.subr.mxu1 %v1306_v45 }
 0x31c   :  { %7449 = vmatpush3.msra.mxu1 %v1306_v45 }
 0x31d   :  { %7450 = vmatprep.subr.mxu1 %v1305_v46 }
 0x31e   :  { %7451 = vmatpush3.msra.mxu1 %v1305_v46 }
 0x31f   :  { %7452 = vmatprep.subr.mxu1 %v1304_v47 }
 0x320   :  { %7453 = vmatpush3.msra.mxu1 %v1304_v47  ;;  %v6422_v47 = vld [vmem:[%s10450_s3 + $0x90] sm:$0xff] }
 0x321   :  { %7454 = vmatprep.subr.mxu1 %v1303_v49 }
 0x322   :  { %7455 = vmatpush3.msra.mxu1 %v1303_v49 }
 0x323   :  { %7456 = vmatprep.subr.mxu1 %v1302_v33 }
 0x324   :  { %7457 = vmatpush3.msra.mxu1 %v1302_v33  ;;  %v6421_v33 = vld [vmem:[%s10450_s3 + $0x88] sm:$0xff] }
 0x325   :  { %7459 = vmatmul.mubr.msk.f32.vlgmr.msra.gmra.mxu1 %vm1318_vm11, %v1311_v51  ;;  %7484 = vmatprep.subr.mxu1 %v1459_v60 }
 0x326   :  { %7461 = vmatprep.mubr.msk.f32.mxu1 %vm1318_vm11, %v1312_v52  ;;  %7485 = vmatpush3.msra.mxu1 %v1459_v60  ;;  %v6420_v52 = vld [vmem:[%s10450_s3 + $0x80] sm:$0xff] }
 0x327   :  { %7486 = vmatprep.subr.mxu1 %v1458_v62 }
 0x328   :  { %7487 = vmatpush3.msra.mxu1 %v1458_v62 }
 0x329   :  { %7462 = vmatmul.mubr.msk.f32.gmra.mxu1 %vm1318_vm11, %v1313_v53  ;;  %7488 = vmatprep.subr.mxu1 %v1457_v30 }
 0x32a   :  { %7464 = vmatprep.mubr.msk.f32.mxu1 %vm1318_vm11, %v1314_v54  ;;  %7489 = vmatpush3.msra.mxu1 %v1457_v30 }
 0x32b   :  { %7490 = vmatprep.subr.mxu1 %v1456_v63 }
 0x32c   :  { %7491 = vmatpush3.msra.mxu1 %v1456_v63 }
 0x32d   :  { %7465 = vmatmul.mubr.msk.f32.gmra.mxu1 %vm1318_vm11, %v1315_v55  ;;  %7512 = vmatprep.subr.mxu1 %v6415_v44 }
 0x32e   :  { %7467 = vmatprep.mubr.msk.f32.mxu1 %vm1318_vm11, %v1316_v56 }
 0x331   :  { %7468 = vmatmul.mubr.msk.f32.gmra.mxu1 %vm1318_vm11, %v1317_v58 }
 0x3e5   :  { %v7460_v6 = vpop.f32.mrf.mxu1 }
 0x3e7   :  { %v1413_v38 = vpop.f32.mrf.mxu1 }
 0x3e9   :  { %v7463_v50 = vpop.f32.mrf.mxu1 }
 0x3eb   :  { %v1423_v7 = vpop.f32.mrf.mxu1 }
 0x3ed   :  { %v7466_v9 = vpop.f32.mrf.mxu1 }
 0x3ee   :  { %v9112_v35 = vmax.f32 %v7460_v6, %v7466_v9 }
 0x3ef   :  { %v1433_v12 = vpop.f32.mrf.mxu1 }
 0x3f0   :  { %v9114_v3 = vmax.f32 %v1413_v38, %v1433_v12  ;;  %v1470_v18 = vrot.slane %v9112_v35, 1  ;;  %v1778_v10 = vrot.slane %v9112_v35, 3  ;;  %v1669_v27 = vrot.slane %v9112_v35, 2 }
 0x3f1   :  { %v7469_v13 = vpop.f32.mrf.mxu1  ;;  %v1887_v51 = vrot.slane %v9112_v35, 4 }
 0x3f2   :  { %v9116_v16 = vmax.f32 %v7463_v50, %v7469_v13  ;;  %7492 = vmatprep.mubr.msk.f32.mxu1 %vm1476_vm15, %v9114_v3  ;;  %v1469_v17 = vrot.slane %v9114_v3, 1  ;;  %v1777_v15 = vrot.slane %v9114_v3, 3  ;;  %v1668_v34 = vrot.slane %v9114_v3, 2 }
 0x3f3   :  { %v1443_v19 = vpop.f32.mrf.mxu1  ;;  %7493 = vmatmul.mubr.msk.f32.vlgmr.msra.gmra.mxu1 %vm1476_vm15, %v9112_v35  ;;  %v1886_v49 = vrot.slane %v9114_v3, 4 }
 0x3f4   :  { %v9128_v20 = vmax.f32 %v1423_v7, %v1443_v19  ;;  %7513 = vmatpush3.msra.mxu1 %v6415_v44  ;;  %v1471_v21 = vsel %vm554_vm7, %v1469_v17, %v1470_v18  ;;  %v1474_v24 = vrot.slane %v9116_v16, 1  ;;  %v1779_v25 = vsel %vm976_vm10, %v1777_v15, %v1778_v10 }
 0x3f5   :  { %7478 = vmatprep.mubr.msk.f32.mxu0 %vm1476_vm15, %v1471_v21  ;;  %7514 = vmatprep.subr.mxu1 %v6414_v8  ;;  %v1782_v36 = vrot.slane %v9116_v16, 3  ;;  %v1670_v43 = vsel %vm822_vm9, %v1668_v34, %v1669_v27  ;;  %v1673_v46 = vrot.slane %v9116_v16, 2  ;;  %v1888_v54 = vsel %vm122_vm0, %v1886_v49, %v1887_v51 }
 0x3f6   :  { %7495 = vmatprep.mubr.msk.f32.mxu1 %vm1476_vm15, %v9128_v20  ;;  %7515 = vmatpush3.msra.mxu1 %v6414_v8  ;;  %v1472_v23 = vrot.slane %v9128_v20, 1  ;;  %v1780_v26 = vrot.slane %v9128_v20, 3  ;;  %v1671_v45 = vrot.slane %v9128_v20, 2  ;;  %v1889_v53 = vrot.slane %v9128_v20, 4 }
 0x3f7   :  { %7496 = vmatmul.mubr.msk.f32.gmra.mxu1 %vm1476_vm15, %v9116_v16  ;;  %7516 = vmatprep.subr.mxu1 %v6413_v22  ;;  %v1891_v55 = vrot.slane %v9116_v16, 4  ;;  %v1992_v8 = vsub.s32 2, %v8701_v57 }
 0x3f8   :  { %7517 = vmatpush3.msra.mxu1 %v6413_v22  ;;  %7520 = vmatprep.mubr.msk.f32.mxu1 %vm1476_vm15, %v1779_v25  ;;  %v1473_v28 = vsel %vm554_vm7, %v1470_v18, %v1472_v23  ;;  %v1475_v11 = vsel %vm554_vm7, %v1472_v23, %v1474_v24  ;;  %v1781_v40 = vsel %vm976_vm10, %v1778_v10, %v1780_v26  ;;  %v9210_v23 = vld [vmem:[%s10458_s11] sm:$0xff] }
 0x3f9   :  { %7479 = vmatmul.mubr.msk.f32.vlgmr.msra.gmra.mxu0 %vm1476_vm15, %v1473_v28  ;;  %7518 = vmatprep.subr.mxu1 %v6412_v61  ;;  %v1783_v41 = vsel %vm976_vm10, %v1780_v26, %v1782_v36  ;;  %v1672_v37 = vsel %vm822_vm9, %v1669_v27, %v1671_v45  ;;  %v1674_v48 = vsel %vm822_vm9, %v1671_v45, %v1673_v46 }
 0x3fa   :  { %7481 = vmatprep.mubr.msk.f32.mxu0 %vm1476_vm15, %v1475_v11  ;;  %7499 = vmatpush3.msra.mxu0 %v6407_v5  ;;  %v1890_v56 = vsel %vm122_vm0, %v1887_v51, %v1889_v53  ;;  %v1892_v58 = vsel %vm122_vm0, %v1889_v53, %v1891_v55  ;;  %v2012_v51 = vld [vmem:[%s10454_s7 + $0x10] sm:$0xff]  ;;  %v2120_v53 = vld [vmem:[%s10451_s4 + $0x18] sm:$0xff] }
 0x3fb   :  { %7519 = vmatpush3.msra.mxu1 %v6412_v61  ;;  %7500 = vmatprep.subr.mxu0 %v6406_v29  ;;  %v9213_v61 = vrot.slane %v9210_v23, %v1992_v8 }
 0x3fc   :  { %7521 = vmatmul.mubr.msk.f32.vlgmr.msra.gmra.mxu1 %vm1476_vm15, %v1781_v40  ;;  %7501 = vmatpush3.msra.mxu0 %v6406_v29 }
 0x3fd   :  { %7523 = vmatprep.mubr.msk.f32.mxu1 %vm1476_vm15, %v1783_v41  ;;  %7482 = vmatmul.mubr.msk.f32.gmra.mxu0 %vm1476_vm15, %v1474_v24 }
 0x3fe   :  { %7502 = vmatprep.subr.mxu0 %v6405_v42  ;;  %7506 = vmatprep.mubr.msk.f32.mxu0 %vm1476_vm15, %v1670_v43 }
 0x3ff   :  { %7503 = vmatpush3.msra.mxu0 %v6405_v42 }
 0x400   :  { %7504 = vmatprep.subr.mxu0 %v6404_v39  ;;  %7524 = vmatmul.mubr.msk.f32.gmra.mxu1 %vm1476_vm15, %v1782_v36 }
 0x401   :  { %7505 = vmatpush3.msra.mxu0 %v6404_v39  ;;  %7548 = vmatprep.mubr.msk.f32.mxu1 %vm2014_vm4, %v2010_v59  ;;  %v2117_v59 = vld [vmem:[%s10451_s4] sm:$0xff] }
 0x402   :  { %7507 = vmatmul.mubr.msk.f32.vlgmr.msra.gmra.mxu0 %vm1476_vm15, %v1672_v37  ;;  %7526 = vmatprep.subr.mxu0 %v6423_v31 }
 0x403   :  { %7509 = vmatprep.mubr.msk.f32.mxu0 %vm1476_vm15, %v1674_v48  ;;  %7527 = vmatpush3.msra.mxu0 %v6423_v31 }
 0x404   :  { %7528 = vmatprep.subr.mxu0 %v6422_v47 }
 0x405   :  { %7529 = vmatpush3.msra.mxu0 %v6422_v47 }
 0x406   :  { %7510 = vmatmul.mubr.msk.f32.gmra.mxu0 %vm1476_vm15, %v1673_v46  ;;  %7530 = vmatprep.subr.mxu0 %v6421_v33 }
 0x407   :  { %7531 = vmatpush3.msra.mxu0 %v6421_v33  ;;  %7534 = vmatprep.mubr.msk.f32.mxu0 %vm1476_vm15, %v1888_v54  ;;  %v2011_v33 = vld [vmem:[%s10454_s7 + $0x8] sm:$0xff]  ;;  %v2119_v54 = vld [vmem:[%s10451_s4 + $0x10] sm:$0xff] }
 0x408   :  { %7532 = vmatprep.subr.mxu0 %v6420_v52 }
 0x409   :  { %7533 = vmatpush3.msra.mxu0 %v6420_v52  ;;  %v2013_v52 = vld [vmem:[%s10454_s7 + $0x18] sm:$0xff] }
 0x40a   :  { %7535 = vmatmul.mubr.msk.f32.vlgmr.msra.gmra.mxu0 %vm1476_vm15, %v1890_v56  ;;  %v2118_v56 = vld [vmem:[%s10451_s4 + $0x8] sm:$0xff] }
 0x40b   :  { %7537 = vmatprep.mubr.msk.f32.mxu0 %vm1476_vm15, %v1892_v58  ;;  %v6435_v58 = vld [vmem:[%s10451_s4 + $0x30] sm:$0xff] }
 0x40e   :  { %7538 = vmatmul.mubr.msk.f32.gmra.mxu0 %vm1476_vm15, %v1891_v55  ;;  %v6436_v55 = vld [vmem:[%s10451_s4 + $0x38] sm:$0xff] }
 0x40f   :  { %7554 = vmatprep.subr.mxu0 %v6436_v55 }
 0x410   :  { %7555 = vmatpush3.msra.mxu0 %v6436_v55  ;;  %v6465_v55 = vld [vmem:[%s10447_s0 + $0x90] sm:$0xff] }
 0x411   :  { %7556 = vmatprep.subr.mxu0 %v6435_v58 }
 0x412   :  { %7557 = vmatpush3.msra.mxu0 %v6435_v58  ;;  %v8334_v58 = vld [vmem:[%s10449_s2 + $0x88] sm:$0xff] }
 0x4b3   :  { %v7494_v60 = vpop.f32.mrf.mxu1 }
 0x4b5   :  { %v1644_v62 = vpop.f32.mrf.mxu1 }
 0x4b7   :  { %v7497_v30 = vpop.f32.mrf.mxu1 }
 0x4b9   :  { %v7480_v32 = vpop.f32.mrf.mxu0  ;;  %v1654_v44 = vpop.f32.mrf.mxu1 }
 0x4ba   :  { %v1650_v50 = vadd.f32 %v7494_v60, %v7480_v32  ;;  %v6434_v60 = vld [vmem:[%s10451_s4 + $0x28] sm:$0xff]  ;;  %v6433_v32 = vld [vmem:[%s10451_s4 + $0x20] sm:$0xff] }
 0x4bb   :  { %v1551_v63 = vpop.f32.mrf.mxu0  ;;  %7558 = vmatprep.subr.mxu0 %v6434_v60 }
 0x4bc   :  { %v7522_v5 = vpop.f32.mrf.mxu1  ;;  %v1645_v35 = vadd.f32 %v1644_v62, %v1551_v63  ;;  %v6450_v62 = vld [vmem:[%s10451_s4 + $0x78] sm:$0xff]  ;;  %7559 = vmatpush3.msra.mxu0 %v6434_v60  ;;  %v8335_v60 = vld [vmem:[%s10449_s2 + $0x80] sm:$0xff] }
 0x4bd   :  { %v7483_v2 = vpop.f32.mrf.mxu0  ;;  %7560 = vmatprep.subr.mxu0 %v6433_v32 }
 0x4be   :  { %v1858_v7 = vpop.f32.mrf.mxu1  ;;  %v1660_v12 = vadd.f32 %v7497_v30, %v7483_v2  ;;  %v6444_v30 = vld [vmem:[%s10451_s4 + $0x58] sm:$0xff]  ;;  %7561 = vmatpush3.msra.mxu0 %v6433_v32  ;;  %v6467_v32 = vld [vmem:[%s10447_s0 + $0xa0] sm:$0xff] }
 0x4bf   :  { %v1561_v4 = vpop.f32.mrf.mxu0  ;;  %7576 = vmatprep.subr.mxu0 %v6444_v30 }
 0x4c0   :  { %v1655_v16 = vadd.f32 %v1654_v44, %v1561_v4  ;;  %v7525_v19 = vpop.f32.mrf.mxu1 }
 0x4c2   :  { %v7508_v6 = vpop.f32.mrf.mxu0  ;;  %v1868_v26 = vpop.f32.mrf.mxu1 }
 0x4c3   :  { %v1769_v3 = vadd.f32 %v7508_v6, %v1650_v50 }
 0x4c4   :  { %v1749_v38 = vpop.f32.mrf.mxu0 }
 0x4c5   :  { %v1768_v17 = vadd.f32 %v1749_v38, %v1645_v35  ;;  %v1878_v21 = vadd.f32 %v7522_v5, %v1769_v3  ;;  %v6449_v38 = vld [vmem:[%s10451_s4 + $0x70] sm:$0xff] }
 0x4c6   :  { %v7511_v9 = vpop.f32.mrf.mxu0 }
 0x4c7   :  { %v1771_v18 = vadd.f32 %v7511_v9, %v1660_v12  ;;  %v1877_v24 = vadd.f32 %v1858_v7, %v1768_v17 }
 0x4c8   :  { %v1759_v13 = vpop.f32.mrf.mxu0 }
 0x4c9   :  { %v1770_v20 = vadd.f32 %v1759_v13, %v1655_v16  ;;  %v1880_v25 = vadd.f32 %v7525_v19, %v1771_v18  ;;  %v6448_v16 = vld [vmem:[%s10451_s4 + $0x68] sm:$0xff]  ;;  %v6443_v18 = vld [vmem:[%s10451_s4 + $0x50] sm:$0xff]  ;;  %v6447_v19 = vld [vmem:[%s10451_s4 + $0x60] sm:$0xff] }
 0x4ca   :  { %v7536_v15 = vpop.f32.mrf.mxu0 }
 0x4cb   :  { %v1987_v10 = vadd.f32 %v7536_v15, %v1878_v21  ;;  %v1879_v34 = vadd.f32 %v1868_v26, %v1770_v20  ;;  %v6442_v15 = vld [vmem:[%s10451_s4 + $0x48] sm:$0xff]  ;;  %v6441_v20 = vld [vmem:[%s10451_s4 + $0x40] sm:$0xff] }
 0x4cc   :  { %v1967_v22 = vpop.f32.mrf.mxu0  ;;  %v6454_v26 = vld [vmem:[%s10451_s4 + $0x88] sm:$0xff] }
 0x4cd   :  { %v1986_v11 = vadd.f32 %v1967_v22, %v1877_v24  ;;  %v1995_v40 = vadd.f32 %v9213_v61, %v1987_v10  ;;  %v6456_v22 = vld [vmem:[%s10451_s4 + $0x98] sm:$0xff]  ;;  %v6455_v24 = vld [vmem:[%s10451_s4 + $0x90] sm:$0xff] }
 0x4ce   :  { %v7539_v28 = vpop.f32.mrf.mxu0 }
 0x4cf   :  { %v1989_v29 = vadd.f32 %v7539_v28, %v1880_v25  ;;  %v1994_v41 = vadd.f32 %v9213_v61, %v1986_v11  ;;  %v2003_v46 = vmul.f32 0.01, %v1995_v40  ;;  %vm1999_vm13 = vcmp.ge.f32.partialorder %v1995_v40, 0.0  ;;  %v6453_v28 = vld [vmem:[%s10451_s4 + $0x80] sm:$0xff]  ;;  %v8314_v11 = vld [vmem:[%s10448_s1 + $0x68] sm:$0xf] }
 0x4d0   :  { %v1977_v36 = vpop.f32.mrf.mxu0 }
 0x4d1   :  { %v1997_v42 = vadd.f32 %v9213_v61, %v1989_v29  ;;  %v1988_v27 = vadd.f32 %v1977_v36, %v1879_v34  ;;  %v2002_v47 = vmul.f32 0.01, %v1994_v41  ;;  %vm1998_vm14 = vcmp.ge.f32.partialorder %v1994_v41, 0.0  ;;  %v8315_v29 = vld [vmem:[%s10448_s1 + $0x60] sm:$0xff]  ;;  %v8316_v34 = vld [vmem:[%s10448_s1 + $0x58] sm:$0xff]  ;;  %v8317_v36 = vld [vmem:[%s10448_s1 + $0x50] sm:$0xff] }
 0x4d2   :  { %v2007_v48 = vsel %vm1999_vm13, %v1995_v40, %v2003_v46  ;;  %v8318_v40 = vld [vmem:[%s10448_s1 + $0x48] sm:$0xff] }
 0x4d3   :  { %v2005_v43 = vmul.f32 0.01, %v1997_v42  ;;  %v1996_v39 = vadd.f32 %v9213_v61, %v1988_v27  ;;  %vm2001_vm5 = vcmp.ge.f32.partialorder %v1997_v42, 0.0  ;;  %v2006_v49 = vsel %vm1998_vm14, %v1994_v41, %v2002_v47  ;;  %v8320_v27 = vld [vmem:[%s10448_s1 + $0x38] sm:$0xff]  ;;  %v8321_v41 = vld [vmem:[%s10448_s1 + $0x30] sm:$0xff]  ;;  %v8326_v46 = vld [vmem:[%s10448_s1 + $0x8] sm:$0xff] }
 0x4d4   :  { %v8327_v47 = vld [vmem:[%s10448_s1] sm:$0xff] }
 0x4d5   :  { %v2009_v45 = vsel %vm2001_vm5, %v1997_v42, %v2005_v43  ;;  %vm2000_vm6 = vcmp.ge.f32.partialorder %v1996_v39, 0.0  ;;  %v2004_v31 = vmul.f32 0.01, %v1996_v39  ;;  %v8319_v42 = vld [vmem:[%s10448_s1 + $0x40] sm:$0xff]  ;;  %v8322_v43 = vld [vmem:[%s10448_s1 + $0x28] sm:$0xff]  ;;  %vm2570_vm5 = vcmask 72704  }
 0x4d6   :  { %7540 = vmatprep.subr.msk.mxu1 %vm1343_vm12, %v2009_v45 }
 0x4d7   :  { %7541 = vmatpush3.msk.msra.mxu1 %vm1343_vm12, %v2009_v45  ;;  %v2008_v37 = vsel %vm2000_vm6, %v1996_v39, %v2004_v31  ;;  %v8323_v39 = vld [vmem:[%s10448_s1 + $0x20] sm:$0xff]  ;;  %v8324_v45 = vld [vmem:[%s10448_s1 + $0x18] sm:$0xff]  ;;  %v8325_v31 = vld [vmem:[%s10448_s1 + $0x10] sm:$0xff] }
 0x4d8   :  { %7542 = vmatprep.subr.mxu1 %v2008_v37 }
 0x4d9   :  { %7543 = vmatpush3.msra.mxu1 %v2008_v37  ;;  %v6462_v37 = vld [vmem:[%s10447_s0 + $0x78] sm:$0xff] }
 0x4da   :  { %7544 = vmatprep.subr.mxu1 %v2007_v48 }
 0x4db   :  { %7545 = vmatpush3.msra.mxu1 %v2007_v48  ;;  %v8328_v48 = vld [vmem:[%s10449_s2 + $0xb8] sm:$0xff] }
 0x4dc   :  { %7546 = vmatprep.subr.mxu1 %v2006_v49 }
 0x4dd   :  { %7547 = vmatpush3.msra.mxu1 %v2006_v49  ;;  %v6463_v49 = vld [vmem:[%s10447_s0 + $0x80] sm:$0xff] }
 0x4de   :  { %7549 = vmatmul.mubr.msk.f32.vlgmr.msra.gmra.mxu1 %vm2014_vm4, %v2011_v33  ;;  %7565 = vmatprep.subr.mxu1 %v2120_v53  ;;  %v8329_v33 = vld [vmem:[%s10449_s2 + $0xb0] sm:$0xff] }
 0x4df   :  { %7551 = vmatprep.mubr.msk.f32.mxu1 %vm2014_vm4, %v2012_v51  ;;  %7566 = vmatpush3.msra.mxu1 %v2120_v53  ;;  %v8330_v51 = vld [vmem:[%s10449_s2 + $0xa8] sm:$0xff]  ;;  %v8331_v53 = vld [vmem:[%s10449_s2 + $0xa0] sm:$0xff] }
 0x4e0   :  { %7567 = vmatprep.subr.mxu1 %v2119_v54 }
 0x4e1   :  { %7568 = vmatpush3.msra.mxu1 %v2119_v54  ;;  %v8332_v54 = vld [vmem:[%s10449_s2 + $0x98] sm:$0xff] }
 0x4e2   :  { %7552 = vmatmul.mubr.msk.f32.gmra.mxu1 %vm2014_vm4, %v2013_v52  ;;  %7569 = vmatprep.subr.mxu1 %v2118_v56  ;;  %v6464_v52 = vld [vmem:[%s10447_s0 + $0x88] sm:$0xff] }
 0x4e3   :  { %7570 = vmatpush3.msra.mxu1 %v2118_v56  ;;  %v8333_v56 = vld [vmem:[%s10449_s2 + $0x90] sm:$0xff] }
 0x4e4   :  { %7571 = vmatprep.subr.mxu1 %v2117_v59 }
 0x4e5   :  { %7572 = vmatpush3.msra.mxu1 %v2117_v59  ;;  %v6466_v59 = vld [vmem:[%s10447_s0 + $0x98] sm:$0xff] }
 0x4e6   :  { %7587 = vmatprep.subr.mxu1 %v6450_v62 }
 0x59e   :  { %v7550_v63 = vpop.f32.mrf.mxu1 }
 0x5a0   :  { %v2096_v2 = vpop.f32.mrf.mxu1 }
 0x5a2   :  { %v7553_v44 = vpop.f32.mrf.mxu1 }
 0x5a3   :  { %v2116_v4 = vmax.f32 %v7550_v63, %v7553_v44  ;;  %v6469_v63 = vld [vmem:[%s10447_s0 + $0xb0] sm:$0xff]  ;;  %v6471_v44 = vld [vmem:[%s10447_s0 + $0xc0] sm:$0xff] }
 0x5a4   :  { %v2106_v5 = vpop.f32.mrf.mxu1 }
 0x5a5   :  { %v2115_v6 = vmax.f32 %v2096_v2, %v2106_v5  ;;  %v2129_v7 = vrot.slane %v2116_v4, 1  ;;  %v2384_v35 = vrot.slane %v2116_v4, 3  ;;  %v2295_v17 = vrot.slane %v2116_v4, 2  ;;  %v6470_v2 = vld [vmem:[%s10447_s0 + $0xb8] sm:$0xff]  ;;  %v6473_v5 = vld [vmem:[%s10447_s0 + $0xd0] sm:$0xff] }
 0x5a6   :  { %v2473_v10 = vrot.slane %v2116_v4, 4 }
 0x5a7   :  { %7573 = vmatprep.mubr.msk.f32.mxu1 %vm1476_vm15, %v2115_v6  ;;  %v2128_v50 = vrot.slane %v2115_v6, 1  ;;  %v2383_v9 = vrot.slane %v2115_v6, 3  ;;  %v2294_v12 = vrot.slane %v2115_v6, 2  ;;  %v2472_v21 = vrot.slane %v2115_v6, 4  ;;  %v6474_v6 = vld [vmem:[%s10447_s0 + $0xd8] sm:$0xff] }
 0x5a8   :  { %7574 = vmatmul.mubr.msk.f32.vlgmr.msra.gmra.mxu1 %vm1476_vm15, %v2116_v4  ;;  %v6472_v4 = vld [vmem:[%s10447_s0 + $0xc8] sm:$0xff] }
 0x5a9   :  { %7588 = vmatpush3.msra.mxu1 %v6450_v62  ;;  %v2130_v3 = vsel %vm554_vm7, %v2128_v50, %v2129_v7  ;;  %v2385_v13 = vsel %vm976_vm10, %v2383_v9, %v2384_v35  ;;  %v2296_v8 = vsel %vm822_vm9, %v2294_v12, %v2295_v17  ;;  %v2474_v25 = vsel %vm122_vm0, %v2472_v21, %v2473_v10  ;;  %v9421_v62 = vld [vmem:[%s10449_s2 + $0x138] sm:$0xff]  ;;  %v6476_v50 = vld [vmem:[%s10447_s0 + $0xe8] sm:$0xff] }
 0x5aa   :  { %7589 = vmatprep.subr.mxu1 %v6449_v38  ;;  %7562 = vmatprep.mubr.msk.f32.mxu0 %vm1476_vm15, %v2130_v3 }
 0x5ab   :  { %7590 = vmatpush3.msra.mxu1 %v6449_v38  ;;  %7595 = vmatprep.mubr.msk.f32.mxu1 %vm1476_vm15, %v2385_v13  ;;  %v6475_v38 = vld [vmem:[%s10447_s0 + $0xe0] sm:$0xff] }
 0x5ac   :  { %7563 = vmatmul.mubr.msk.f32.vlgmr.msra.gmra.mxu0 %vm1476_vm15, %v2129_v7  ;;  %7591 = vmatprep.subr.mxu1 %v6448_v16  ;;  %v2568_v7 = vld [vmem:[%s10455_s8] sm:$0xff] }
 0x5ad   :  { %7577 = vmatpush3.msra.mxu0 %v6444_v30  ;;  %7584 = vmatprep.mubr.msk.f32.mxu0 %vm1476_vm15, %v2296_v8  ;;  %v6468_v30 = vld [vmem:[%s10447_s0 + $0xa8] sm:$0xff] }
 0x5ae   :  { %7578 = vmatprep.subr.mxu0 %v6443_v18  ;;  %7592 = vmatpush3.msra.mxu1 %v6448_v16 }
 0x5af   :  { %7579 = vmatpush3.msra.mxu0 %v6443_v18  ;;  %7593 = vmatprep.subr.mxu1 %v6447_v19 }
 0x5b0   :  { %7580 = vmatprep.subr.mxu0 %v6442_v15  ;;  %7594 = vmatpush3.msra.mxu1 %v6447_v19  ;;  %v2558_v19 = vsub.s32 3, %v8701_v57 }
 0x5b1   :  { %7581 = vmatpush3.msra.mxu0 %v6442_v15  ;;  %7596 = vmatmul.mubr.msk.f32.vlgmr.msra.gmra.mxu1 %vm1476_vm15, %v2384_v35 }
 0x5b2   :  { %7582 = vmatprep.subr.mxu0 %v6441_v20  ;;  %7613 = vmatprep.mubr.msk.f32.mxu1 %vm2570_vm5, %v2568_v7 }
 0x5b3   :  { %7583 = vmatpush3.msra.mxu0 %v6441_v20 }
 0x5b4   :  { %7585 = vmatmul.mubr.msk.f32.vlgmr.msra.gmra.mxu0 %vm1476_vm15, %v2295_v17  ;;  %7598 = vmatprep.subr.mxu0 %v6456_v22 }
 0x5b5   :  { %7599 = vmatpush3.msra.mxu0 %v6456_v22  ;;  %7606 = vmatprep.mubr.msk.f32.mxu0 %vm1476_vm15, %v2474_v25  ;;  %v9490_v22 = vrot.slane %v9210_v23, %v2558_v19 }
 0x5b6   :  { %7600 = vmatprep.subr.mxu0 %v6455_v24 }
 0x5b7   :  { %7601 = vmatpush3.msra.mxu0 %v6455_v24 }
 0x5b8   :  { %7602 = vmatprep.subr.mxu0 %v6454_v26 }
 0x5b9   :  { %7603 = vmatpush3.msra.mxu0 %v6454_v26 }
 0x5ba   :  { %7604 = vmatprep.subr.mxu0 %v6453_v28 }
 0x5bb   :  { %7605 = vmatpush3.msra.mxu0 %v6453_v28 }
 0x5bc   :  { %7607 = vmatmul.mubr.msk.f32.vlgmr.msra.gmra.mxu0 %vm1476_vm15, %v2473_v10  ;;  %7616 = vmatprep.subr.mxu0 %v8461_v1 }
 0x5bd   :  { %7617 = vmatpush3.msk.msra.mxu0 %vm122_vm0, %v8314_v11  ;;  %7644 = vmatprep.mubr.msk.f32.mxu0 %vm10460_vm1, %v8461_v1 }
 0x5be   :  { %7618 = vmatprep.subr.mxu0 %v8461_v1 }
 0x5bf   :  { %7619 = vmatpush3.msra.mxu0 %v8315_v29 }
 0x5c0   :  { %7620 = vmatprep.subr.mxu0 %v8461_v1 }
 0x5c1   :  { %7621 = vmatpush3.msra.mxu0 %v8316_v34 }
 0x5c2   :  { %7622 = vmatprep.subr.mxu0 %v8461_v1 }
 0x5c3   :  { %7623 = vmatpush3.msra.mxu0 %v8317_v36 }
 0x5c4   :  { %7624 = vmatprep.subr.mxu0 %v8461_v1 }
 0x5c5   :  { %7625 = vmatpush3.msra.mxu0 %v8318_v40 }
 0x5c6   :  { %7626 = vmatprep.subr.mxu0 %v8461_v1 }
 0x5c7   :  { %7627 = vmatpush3.msra.mxu0 %v8319_v42 }
 0x5c8   :  { %7628 = vmatprep.subr.mxu0 %v8461_v1 }
 0x5c9   :  { %7629 = vmatpush3.msra.mxu0 %v8320_v27  ;;  %v2569_v27 = vld [vmem:[%s10455_s8 + $0x8] sm:$0xff] }
 0x5ca   :  { %7630 = vmatprep.subr.mxu0 %v8461_v1 }
 0x5cb   :  { %7631 = vmatpush3.msra.mxu0 %v8321_v41  ;;  %v8337_v41 = vld [vmem:[%s10452_s5] sm:$0xff] }
 0x5cc   :  { %7632 = vmatprep.subr.mxu0 %v8461_v1 }
 0x5cd   :  { %7633 = vmatpush3.msra.mxu0 %v8322_v43 }
 0x5ce   :  { %7634 = vmatprep.subr.mxu0 %v8461_v1 }
 0x5cf   :  { %7635 = vmatpush3.msra.mxu0 %v8323_v39 }
 0x5d0   :  { %7636 = vmatprep.subr.mxu0 %v8461_v1 }
 0x5d1   :  { %7637 = vmatpush3.msra.mxu0 %v8324_v45 }
 0x5d2   :  { %7638 = vmatprep.subr.mxu0 %v8461_v1 }
 0x5d3   :  { %7639 = vmatpush3.msra.mxu0 %v8325_v31 }
 0x5d4   :  { %7640 = vmatprep.subr.mxu0 %v8461_v1 }
 0x5d5   :  { %7641 = vmatpush3.msra.mxu0 %v8326_v46 }
 0x5d6   :  { %7642 = vmatprep.subr.mxu0 %v8461_v1 }
 0x5d7   :  { %7643 = vmatpush3.msra.mxu0 %v8327_v47 }
 0x5d8   :  { %7645 = vmatmul.mubr.msk.f32.vlgmr.msra.gmra.mxu0 %vm76_vm2, %v6462_v37  ;;  %7799 = vmatprep.subr.mxu0 %v8328_v48 }
 0x5d9   :  { %7647 = vmatprep.mubr.msk.f32.mxu0 %vm10460_vm1, %v8461_v1  ;;  %7800 = vmatpush3.msra.mxu0 %v8328_v48 }
 0x5da   :  { %7801 = vmatprep.subr.mxu0 %v8329_v33 }
 0x5db   :  { %7802 = vmatpush3.msra.mxu0 %v8329_v33 }
 0x5dc   :  { %7648 = vmatmul.mubr.msk.f32.gmra.mxu0 %vm76_vm2, %v6463_v49  ;;  %7803 = vmatprep.subr.mxu0 %v8330_v51 }
 0x5dd   :  { %7650 = vmatprep.mubr.msk.f32.mxu0 %vm10460_vm1, %v8461_v1  ;;  %7804 = vmatpush3.msra.mxu0 %v8330_v51 }
 0x5de   :  { %7805 = vmatprep.subr.mxu0 %v8331_v53 }
 0x5df   :  { %7806 = vmatpush3.msra.mxu0 %v8331_v53 }
 0x5e0   :  { %7651 = vmatmul.mubr.msk.f32.gmra.mxu0 %vm76_vm2, %v6464_v52  ;;  %7807 = vmatprep.subr.mxu0 %v8332_v54 }
 0x5e1   :  { %7653 = vmatprep.mubr.msk.f32.mxu0 %vm10460_vm1, %v8461_v1  ;;  %7808 = vmatpush3.msra.mxu0 %v8332_v54 }
 0x5e2   :  { %7809 = vmatprep.subr.mxu0 %v8333_v56 }
 0x5e3   :  { %7810 = vmatpush3.msra.mxu0 %v8333_v56 }
 0x5e4   :  { %7654 = vmatmul.mubr.msk.f32.gmra.mxu0 %vm76_vm2, %v6465_v55  ;;  %7811 = vmatprep.subr.mxu0 %v8334_v58 }
 0x5e5   :  { %7656 = vmatprep.mubr.msk.f32.mxu0 %vm10460_vm1, %v8461_v1  ;;  %7812 = vmatpush3.msra.mxu0 %v8334_v58 }
 0x5e6   :  { %7813 = vmatprep.subr.mxu0 %v8335_v60 }
 0x5e7   :  { %7814 = vmatpush3.msra.mxu0 %v8335_v60 }
 0x5e8   :  { %7657 = vmatmul.mubr.msk.f32.gmra.mxu0 %vm76_vm2, %v6466_v59  ;;  %7855 = vmatprep.subr.mxu0 %v9421_v62 }
 0x5e9   :  { %7659 = vmatprep.mubr.msk.f32.mxu0 %vm10460_vm1, %v8461_v1 }
 0x5ec   :  { %7660 = vmatmul.mubr.msk.f32.gmra.mxu0 %vm76_vm2, %v6467_v32 }
 0x5ed   :  { %7662 = vmatprep.mubr.msk.f32.mxu0 %vm10460_vm1, %v8461_v1 }
 0x5f0   :  { %7663 = vmatmul.mubr.msk.f32.gmra.mxu0 %vm76_vm2, %v6468_v30 }
 0x5f1   :  { %7665 = vmatprep.mubr.msk.f32.mxu0 %vm10460_vm1, %v8461_v1 }
 0x5f4   :  { %7666 = vmatmul.mubr.msk.f32.gmra.mxu0 %vm76_vm2, %v6469_v63 }
 0x5f5   :  { %7668 = vmatprep.mubr.msk.f32.mxu0 %vm10460_vm1, %v8461_v1 }
 0x5f8   :  { %7669 = vmatmul.mubr.msk.f32.gmra.mxu0 %vm76_vm2, %v6470_v2 }
 0x5f9   :  { %7671 = vmatprep.mubr.msk.f32.mxu0 %vm10460_vm1, %v8461_v1 }
 0x5fc   :  { %7672 = vmatmul.mubr.msk.f32.gmra.mxu0 %vm76_vm2, %v6471_v44 }
 0x5fd   :  { %7674 = vmatprep.mubr.msk.f32.mxu0 %vm10460_vm1, %v8461_v1 }
 0x600   :  { %7675 = vmatmul.mubr.msk.f32.gmra.mxu0 %vm76_vm2, %v6472_v4 }
 0x601   :  { %7677 = vmatprep.mubr.msk.f32.mxu0 %vm10460_vm1, %v8461_v1 }
 0x604   :  { %7678 = vmatmul.mubr.msk.f32.gmra.mxu0 %vm76_vm2, %v6473_v5 }
 0x605   :  { %7680 = vmatprep.mubr.msk.f32.mxu0 %vm10460_vm1, %v8461_v1 }
 0x608   :  { %7681 = vmatmul.mubr.msk.f32.gmra.mxu0 %vm76_vm2, %v6474_v6 }
 0x609   :  { %7683 = vmatprep.mubr.msk.f32.mxu0 %vm10460_vm1, %v8461_v1 }
 0x60c   :  { %7684 = vmatmul.mubr.msk.f32.gmra.mxu0 %vm76_vm2, %v6475_v38 }
 0x60d   :  { %7686 = vmatprep.mubr.msk.f32.mxu0 %vm10460_vm1, %v8461_v1 }
 0x610   :  { %7687 = vmatmul.mubr.msk.f32.gmra.mxu0 %vm76_vm2, %v6476_v50 }
 0x668   :  { %v7575_v35 = vpop.f32.mrf.mxu1 }
 0x66a   :  { %v2280_v16 = vpop.f32.mrf.mxu1 }
 0x66c   :  { %v7564_v9 = vpop.f32.mrf.mxu0 }
 0x66d   :  { %v2286_v13 = vadd.f32 %v7575_v35, %v7564_v9 }
 0x66e   :  { %v2201_v12 = vpop.f32.mrf.mxu0 }
 0x66f   :  { %v2281_v18 = vadd.f32 %v2280_v16, %v2201_v12 }
 0x671   :  { %v7597_v15 = vpop.f32.mrf.mxu1 }
 0x673   :  { %v2456_v10 = vpop.f32.mrf.mxu1 }
 0x674   :  { %v7586_v3 = vpop.f32.mrf.mxu0 }
 0x675   :  { %v2377_v8 = vadd.f32 %v7586_v3, %v2286_v13 }
 0x676   :  { %v2367_v17 = vpop.f32.mrf.mxu0 }
 0x677   :  { %v2376_v20 = vadd.f32 %v2367_v17, %v2281_v18  ;;  %v2466_v21 = vadd.f32 %v7597_v15, %v2377_v8 }
 0x679   :  { %v2465_v26 = vadd.f32 %v2456_v10, %v2376_v20 }
 0x67c   :  { %v7608_v24 = vpop.f32.mrf.mxu0 }
 0x67d   :  { %v2555_v25 = vadd.f32 %v7608_v24, %v2466_v21 }
 0x67e   :  { %v2545_v28 = vpop.f32.mrf.mxu0 }
 0x67f   :  { %v2561_v11 = vadd.f32 %v9490_v22, %v2555_v25  ;;  %v2554_v29 = vadd.f32 %v2545_v28, %v2465_v26 }
 0x681   :  { %v2565_v34 = vmul.f32 0.01, %v2561_v11  ;;  %v2560_v36 = vadd.f32 %v9490_v22, %v2554_v29  ;;  %vm2563_vm2 = vcmp.ge.f32.partialorder %v2561_v11, 0.0 }
 0x683   :  { %v2567_v40 = vsel %vm2563_vm2, %v2561_v11, %v2565_v34  ;;  %vm2562_vm6 = vcmp.ge.f32.partialorder %v2560_v36, 0.0  ;;  %v2564_v42 = vmul.f32 0.01, %v2560_v36 }
 0x684   :  { %7609 = vmatprep.subr.msk.mxu1 %vm1343_vm12, %v2567_v40 }
 0x685   :  { %7610 = vmatpush3.msk.msra.mxu1 %vm1343_vm12, %v2567_v40  ;;  %v2566_v23 = vsel %vm2562_vm6, %v2560_v36, %v2564_v42 }
 0x686   :  { %7611 = vmatprep.subr.mxu1 %v2566_v23 }
 0x687   :  { %7612 = vmatpush3.msra.mxu1 %v2566_v23 }
 0x688   :  { %7614 = vmatmul.mubr.msk.f32.vlgmr.msra.gmra.mxu1 %vm2570_vm5, %v2569_v27 }
 0x689   :  { %7719 = vmatprep.mubr.msk.f32.mxu1 %vm327_vm3, %v8337_v41 }
 0x698   :  { %v9504_v43 = vpop.f32.mrf.mxu0 }
 0x69a   :  { %v7646_v39 = vpop.f32.mrf.mxu0 }
 0x69c   :  { %v9506_v45 = vpop.f32.mrf.mxu0 }
 0x69e   :  { %v7649_v31 = vpop.f32.mrf.mxu0 }
 0x6a0   :  { %v9508_v46 = vpop.f32.mrf.mxu0 }
 0x6a2   :  { %v7652_v37 = vpop.f32.mrf.mxu0 }
 0x6a4   :  { %v9510_v47 = vpop.f32.mrf.mxu0 }
 0x6a5   :  { %v2799_v39 = vadd.f32 %v9510_v47, %v8710_v0  ;;  %v2784_v47 = vadd.f32 %v9504_v43, %v8710_v0  ;;  %v8338_v43 = vld [vmem:[%s10452_s5 + $0x8] sm:$0xff] }
 0x6a6   :  { %v7655_v48 = vpop.f32.mrf.mxu0 }
 0x6a7   :  { %v2794_v48 = vadd.f32 %v9508_v46, %v8710_v0 }
 0x6a8   :  { %v9512_v49 = vpop.f32.mrf.mxu0 }
 0x6a9   :  { %v2804_v23 = vadd.f32 %v9512_v49, %v8710_v0  ;;  %v2789_v49 = vadd.f32 %v9506_v45, %v8710_v0 }
 0x6aa   :  { %v7658_v33 = vpop.f32.mrf.mxu0 }
 0x6ab   :  { %v2876_v33 = vmul.f32 0.01, %v2804_v23  ;;  %v2873_v46 = vmul.f32 0.01, %v2789_v49 }
 0x6ac   :  { %v2808_v51 = vpop.f32.mrf.mxu0 }
 0x6ad   :  { %v2809_v36 = vadd.f32 %v2808_v51, %v8710_v0 }
 0x6ae   :  { %v7661_v52 = vpop.f32.mrf.mxu0 }
 0x6af   :  { %v2877_v31 = vmul.f32 0.01, %v2809_v36  ;;  %v2875_v52 = vmul.f32 0.01, %v2799_v39 }
 0x6b0   :  { %v2813_v53 = vpop.f32.mrf.mxu0 }
 0x6b1   :  { %v2814_v11 = vadd.f32 %v2813_v53, %v8710_v0 }
 0x6b2   :  { %v7664_v54 = vpop.f32.mrf.mxu0 }
 0x6b3   :  { %v2878_v27 = vmul.f32 0.01, %v2814_v11  ;;  %v2874_v54 = vmul.f32 0.01, %v2794_v48 }
 0x6b4   :  { %v2818_v55 = vpop.f32.mrf.mxu0 }
 0x6b5   :  { %v2819_v25 = vadd.f32 %v2818_v55, %v8710_v0 }
 0x6b6   :  { %v7667_v56 = vpop.f32.mrf.mxu0 }
 0x6b7   :  { %v2879_v40 = vmul.f32 0.01, %v2819_v25 }
 0x6b8   :  { %v2823_v58 = vpop.f32.mrf.mxu0 }
 0x6b9   :  { %v2824_v21 = vadd.f32 %v2823_v58, %v8710_v0  ;;  %v2872_v58 = vmul.f32 0.01, %v2784_v47 }
 0x6ba   :  { %v7670_v59 = vpop.f32.mrf.mxu0 }
 0x6bb   :  { %v2880_v29 = vmul.f32 0.01, %v2824_v21 }
 0x6bc   :  { %v2828_v60 = vpop.f32.mrf.mxu0 }
 0x6bd   :  { %v2829_v19 = vadd.f32 %v2828_v60, %v8710_v0  ;;  %v8339_v60 = vld [vmem:[%s10449_s2 + $0x78] sm:$0xff] }
 0x6be   :  { %v7673_v32 = vpop.f32.mrf.mxu0 }
 0x6bf   :  { %v2881_v26 = vmul.f32 0.01, %v2829_v19  ;;  %v8340_v32 = vld [vmem:[%s10452_s5 + $0x10] sm:$0xff] }
 0x6c0   :  { %v2833_v30 = vpop.f32.mrf.mxu0 }
 0x6c1   :  { %v2834_v17 = vadd.f32 %v2833_v30, %v8710_v0  ;;  %v8341_v30 = vld [vmem:[%s10449_s2 + $0x70] sm:$0xff] }
 0x6c2   :  { %v7676_v63 = vpop.f32.mrf.mxu0 }
 0x6c3   :  { %v2882_v10 = vmul.f32 0.01, %v2834_v17  ;;  %vm2867_vm1 = vcmp.ge.f32.partialorder %v2834_v17, 0.0  ;;  %v8342_v63 = vld [vmem:[%s10452_s5 + $0x18] sm:$0xff] }
 0x6c4   :  { %v2838_v2 = vpop.f32.mrf.mxu0 }
 0x6c5   :  { %v2839_v3 = vadd.f32 %v2838_v2, %v8710_v0  ;;  %v2897_v34 = vsel %vm2867_vm1, %v2834_v17, %v2882_v10  ;;  %vm2862_vm1 = vcmp.ge.f32.partialorder %v2809_v36, 0.0  ;;  %v8343_v2 = vld [vmem:[%s10449_s2 + $0x68] sm:$0xff]  ;;  %v8357_v17 = vld [vmem:[%s10452_s5 + $0x58] sm:$0xff] }
 0x6c6   :  { %v7679_v44 = vpop.f32.mrf.mxu0  ;;  %v2892_v53 = vsel %vm2862_vm1, %v2809_v36, %v2877_v31  ;;  %vm2857_vm1 = vcmp.ge.f32.partialorder %v2784_v47, 0.0 }
 0x6c7   :  { %v2883_v15 = vmul.f32 0.01, %v2839_v3  ;;  %vm2868_vm6 = vcmp.ge.f32.partialorder %v2839_v3, 0.0  ;;  %v8344_v44 = vld [vmem:[%s10452_s5 + $0x20] sm:$0xff] }
 0x6c8   :  { %v2843_v4 = vpop.f32.mrf.mxu0 }
 0x6c9   :  { %v2844_v9 = vadd.f32 %v2843_v4, %v8710_v0  ;;  %v2898_v28 = vsel %vm2868_vm6, %v2839_v3, %v2883_v15  ;;  %vm2863_vm6 = vcmp.ge.f32.partialorder %v2814_v11, 0.0  ;;  %v8345_v4 = vld [vmem:[%s10449_s2 + $0x60] sm:$0xff]  ;;  %v8354_v3 = vld [vmem:[%s10452_s5 + $0x48] sm:$0xff]  ;;  %v8361_v15 = vld [vmem:[%s10452_s5 + $0x78] sm:$0xff] }
 0x6ca   :  { %v7682_v5 = vpop.f32.mrf.mxu0  ;;  %v2893_v51 = vsel %vm2863_vm6, %v2814_v11, %v2878_v27  ;;  %vm2858_vm6 = vcmp.ge.f32.partialorder %v2789_v49, 0.0 }
 0x6cb   :  { %v2884_v18 = vmul.f32 0.01, %v2844_v9  ;;  %vm2869_vm2 = vcmp.ge.f32.partialorder %v2844_v9, 0.0  ;;  %v2888_v59 = vsel %vm2858_vm6, %v2789_v49, %v2873_v46  ;;  %v8346_v5 = vld [vmem:[%s10452_s5 + $0x28] sm:$0xff] }
 0x6cc   :  { %v2848_v6 = vpop.f32.mrf.mxu0 }
 0x6cd   :  { %v2849_v50 = vadd.f32 %v2848_v6, %v8710_v0  ;;  %v2899_v24 = vsel %vm2869_vm2, %v2844_v9, %v2884_v18  ;;  %vm2864_vm2 = vcmp.ge.f32.partialorder %v2819_v25, 0.0  ;;  %v8347_v6 = vld [vmem:[%s10449_s2 + $0x58] sm:$0xff]  ;;  %v8351_v9 = vld [vmem:[%s10449_s2 + $0x48] sm:$0xff]  ;;  %v8358_v18 = vld [vmem:[%s10452_s5 + $0x60] sm:$0xff] }
 0x6ce   :  { %v7685_v38 = vpop.f32.mrf.mxu0  ;;  %v2894_v37 = vsel %vm2864_vm2, %v2819_v25, %v2879_v40  ;;  %vm2859_vm2 = vcmp.ge.f32.partialorder %v2794_v48, 0.0 }
 0x6cf   :  { %v2885_v13 = vmul.f32 0.01, %v2849_v50  ;;  %vm2870_vm14 = vcmp.ge.f32.partialorder %v2849_v50, 0.0  ;;  %v2889_v45 = vsel %vm2859_vm2, %v2794_v48, %v2874_v54  ;;  %v8348_v38 = vld [vmem:[%s10452_s5 + $0x30] sm:$0xff] }
 0x6d0   :  { %v2853_v7 = vpop.f32.mrf.mxu0 }
 0x6d1   :  { %v2854_v35 = vadd.f32 %v2853_v7, %v8710_v0  ;;  %v2900_v20 = vsel %vm2870_vm14, %v2849_v50, %v2885_v13  ;;  %vm2865_vm14 = vcmp.ge.f32.partialorder %v2824_v21, 0.0  ;;  %v2887_v0 = vsel %vm2857_vm1, %v2784_v47, %v2872_v58  ;;  %v8349_v50 = vld [vmem:[%s10449_s2 + $0x50] sm:$0xff]  ;;  %v8350_v7 = vld [vmem:[%s10452_s5 + $0x38] sm:$0xff] }
 0x6d2   :  { %v7688_v12 = vpop.f32.mrf.mxu0  ;;  %v2895_v41 = vsel %vm2865_vm14, %v2824_v21, %v2880_v29  ;;  %vm2860_vm14 = vcmp.ge.f32.partialorder %v2799_v39, 0.0  ;;  %v8355_v13 = vld [vmem:[%s10449_s2 + $0x38] sm:$0xff] }
 0x6d3   :  { %v2886_v16 = vmul.f32 0.01, %v2854_v35  ;;  %vm2871_vm13 = vcmp.ge.f32.partialorder %v2854_v35, 0.0  ;;  %v2890_v56 = vsel %vm2860_vm14, %v2799_v39, %v2875_v52  ;;  %v8353_v12 = vld [vmem:[%s10449_s2 + $0x40] sm:$0xff] }
 0x6d5   :  { %v2901_v8 = vsel %vm2871_vm13, %v2854_v35, %v2886_v16  ;;  %vm2866_vm13 = vcmp.ge.f32.partialorder %v2829_v19, 0.0  ;;  %v8352_v35 = vld [vmem:[%s10452_s5 + $0x40] sm:$0xff]  ;;  %v8356_v16 = vld [vmem:[%s10452_s5 + $0x50] sm:$0xff] }
 0x6d6   :  { %7689 = vmatprep.subr.mxu1 %v2901_v8  ;;  %v2896_v42 = vsel %vm2866_vm13, %v2829_v19, %v2881_v26  ;;  %vm2861_vm13 = vcmp.ge.f32.partialorder %v2804_v23, 0.0  ;;  %v8360_v19 = vld [vmem:[%s10452_s5 + $0x70] sm:$0xff] }
 0x6d7   :  { %7690 = vmatpush3.msra.mxu1 %v2901_v8  ;;  %v2891_v55 = vsel %vm2861_vm13, %v2804_v23, %v2876_v33  ;;  %v8359_v8 = vld [vmem:[%s10452_s5 + $0x68] sm:$0xff] }
 0x6d8   :  { %7691 = vmatprep.subr.mxu1 %v2900_v20 }
 0x6d9   :  { %7692 = vmatpush3.msra.mxu1 %v2900_v20 }
 0x6da   :  { %7693 = vmatprep.subr.mxu1 %v2899_v24 }
 0x6db   :  { %7694 = vmatpush3.msra.mxu1 %v2899_v24 }
 0x6dc   :  { %7695 = vmatprep.subr.mxu1 %v2898_v28 }
 0x6dd   :  { %7696 = vmatpush3.msra.mxu1 %v2898_v28 }
 0x6de   :  { %7697 = vmatprep.subr.mxu1 %v2897_v34 }
 0x6df   :  { %7698 = vmatpush3.msra.mxu1 %v2897_v34 }
 0x6e0   :  { %7699 = vmatprep.subr.mxu1 %v2896_v42 }
 0x6e1   :  { %7700 = vmatpush3.msra.mxu1 %v2896_v42 }
 0x6e2   :  { %7701 = vmatprep.subr.mxu1 %v2895_v41 }
 0x6e3   :  { %7702 = vmatpush3.msra.mxu1 %v2895_v41 }
 0x6e4   :  { %7703 = vmatprep.subr.mxu1 %v2894_v37 }
 0x6e5   :  { %7704 = vmatpush3.msra.mxu1 %v2894_v37 }
 0x6e6   :  { %7705 = vmatprep.subr.mxu1 %v2893_v51 }
 0x6e7   :  { %7706 = vmatpush3.msra.mxu1 %v2893_v51 }
 0x6e8   :  { %7707 = vmatprep.subr.mxu1 %v2892_v53 }
 0x6e9   :  { %7708 = vmatpush3.msra.mxu1 %v2892_v53 }
 0x6ea   :  { %7709 = vmatprep.subr.mxu1 %v2891_v55 }
 0x6eb   :  { %7710 = vmatpush3.msra.mxu1 %v2891_v55 }
 0x6ec   :  { %7711 = vmatprep.subr.mxu1 %v2890_v56 }
 0x6ed   :  { %7712 = vmatpush3.msra.mxu1 %v2890_v56 }
 0x6ee   :  { %7713 = vmatprep.subr.mxu1 %v2889_v45 }
 0x6ef   :  { %7714 = vmatpush3.msra.mxu1 %v2889_v45 }
 0x6f0   :  { %7715 = vmatprep.subr.mxu1 %v2888_v59 }
 0x6f1   :  { %7716 = vmatpush3.msra.mxu1 %v2888_v59 }
 0x6f2   :  { %7717 = vmatprep.subr.mxu1 %v2887_v0 }
 0x6f3   :  { %7718 = vmatpush3.msra.mxu1 %v2887_v0 }
 0x6f4   :  { %7720 = vmatmul.mubr.msk.f32.vlgmr.msra.gmra.mxu1 %vm327_vm3, %v8338_v43  ;;  %7743 = vmatprep.subr.mxu1 %v8339_v60 }
 0x6f5   :  { %7722 = vmatprep.mubr.msk.f32.mxu1 %vm327_vm3, %v8340_v32  ;;  %7744 = vmatpush3.msra.mxu1 %v8339_v60 }
 0x6f6   :  { %7745 = vmatprep.subr.mxu1 %v8341_v30 }
 0x6f7   :  { %7746 = vmatpush3.msra.mxu1 %v8341_v30 }
 0x6f8   :  { %7723 = vmatmul.mubr.msk.f32.gmra.mxu1 %vm327_vm3, %v8342_v63  ;;  %7747 = vmatprep.subr.mxu1 %v8343_v2 }
 0x6f9   :  { %7725 = vmatprep.mubr.msk.f32.mxu1 %vm327_vm3, %v8344_v44  ;;  %7748 = vmatpush3.msra.mxu1 %v8343_v2 }
 0x6fa   :  { %7749 = vmatprep.subr.mxu1 %v8345_v4 }
 0x6fb   :  { %7750 = vmatpush3.msra.mxu1 %v8345_v4 }
 0x6fc   :  { %7726 = vmatmul.mubr.msk.f32.gmra.mxu1 %vm327_vm3, %v8346_v5  ;;  %7751 = vmatprep.subr.mxu1 %v8347_v6  ;;  %v8362_v5 = vld [vmem:[%s10449_s2 + $0x30] sm:$0xff] }
 0x6fd   :  { %7728 = vmatprep.mubr.msk.f32.mxu1 %vm327_vm3, %v8348_v38  ;;  %7752 = vmatpush3.msra.mxu1 %v8347_v6  ;;  %v8363_v6 = vld [vmem:[%s10449_s2 + $0x130] sm:$0xff] }
 0x6fe   :  { %7753 = vmatprep.subr.mxu1 %v8349_v50 }
 0x6ff   :  { %7754 = vmatpush3.msra.mxu1 %v8349_v50 }
 0x700   :  { %7729 = vmatmul.mubr.msk.f32.gmra.mxu1 %vm327_vm3, %v8350_v7  ;;  %7755 = vmatprep.subr.mxu1 %v8351_v9 }
 0x701   :  { %7731 = vmatprep.mubr.msk.f32.mxu1 %vm327_vm3, %v8352_v35  ;;  %7756 = vmatpush3.msra.mxu1 %v8351_v9  ;;  %v8364_v35 = vld [vmem:[%s10449_s2 + $0x28] sm:$0xff] }
 0x702   :  { %7757 = vmatprep.subr.mxu1 %v8353_v12 }
 0x703   :  { %7758 = vmatpush3.msra.mxu1 %v8353_v12 }
 0x704   :  { %7732 = vmatmul.mubr.msk.f32.gmra.mxu1 %vm327_vm3, %v8354_v3  ;;  %7771 = vmatprep.subr.mxu1 %v8355_v13 }
 0x705   :  { %7734 = vmatprep.mubr.msk.f32.mxu1 %vm327_vm3, %v8356_v16  ;;  %v8365_v16 = vld [vmem:[%s10449_s2 + $0x128] sm:$0xff] }
 0x708   :  { %7735 = vmatmul.mubr.msk.f32.gmra.mxu1 %vm327_vm3, %v8357_v17 }
 0x709   :  { %7737 = vmatprep.mubr.msk.f32.mxu1 %vm327_vm3, %v8358_v18 }
 0x70c   :  { %7738 = vmatmul.mubr.msk.f32.gmra.mxu1 %vm327_vm3, %v8359_v8  ;;  %v8366_v8 = vld [vmem:[%s10449_s2 + $0x20] sm:$0xff] }
 0x70d   :  { %7740 = vmatprep.mubr.msk.f32.mxu1 %vm327_vm3, %v8360_v19  ;;  %v8367_v19 = vld [vmem:[%s10449_s2 + $0x120] sm:$0xff] }
 0x710   :  { %7741 = vmatmul.mubr.msk.f32.gmra.mxu1 %vm327_vm3, %v8361_v15 }
 0x748   :  { %v9621_v20 = vpop.f32.mrf.mxu1 }
 0x74a   :  { %v9623_v21 = vpop.f32.mrf.mxu1 }
 0x7b4   :  { %v7721_v10 = vpop.f32.mrf.mxu1 }
 0x7b6   :  { %v2968_v24 = vpop.f32.mrf.mxu1 }
 0x7b8   :  { %v7724_v25 = vpop.f32.mrf.mxu1 }
 0x7ba   :  { %v2978_v26 = vpop.f32.mrf.mxu1 }
 0x7bc   :  { %v7727_v28 = vpop.f32.mrf.mxu1 }
 0x7be   :  { %v2988_v11 = vpop.f32.mrf.mxu1 }
 0x7c0   :  { %v7730_v29 = vpop.f32.mrf.mxu1 }
 0x7c2   :  { %v2998_v34 = vpop.f32.mrf.mxu1 }
 0x7c4   :  { %v7733_v36 = vpop.f32.mrf.mxu1 }
 0x7c5   :  { %v9625_v40 = vmax.f32 %v7721_v10, %v7733_v36  ;;  %v8372_v36 = vld [vmem:[%s10449_s2 + $0x8] sm:$0xff] }
 0x7c6   :  { %v3008_v42 = vpop.f32.mrf.mxu1 }
 0x7c7   :  { %v9627_v23 = vmax.f32 %v2968_v24, %v3008_v42  ;;  %v3064_v41 = vrot.slane %v9625_v40, 1  ;;  %v3321_v48 = vrot.slane %v9625_v40, 2  ;;  %v3609_v42 = vrot.slane %v9625_v40, 4 }
 0x7c8   :  { %v7736_v27 = vpop.f32.mrf.mxu1 }
 0x7c9   :  { %v9630_v39 = vmax.f32 %v7724_v25, %v7736_v27  ;;  %v3063_v31 = vrot.slane %v9627_v23, 1  ;;  %v3320_v37 = vrot.slane %v9627_v23, 2  ;;  %v8368_v25 = vld [vmem:[%s10449_s2 + $0x18] sm:$0xff]  ;;  %v8373_v27 = vld [vmem:[%s10449_s2 + $0x108] sm:$0xff] }
 0x7ca   :  { %v3018_v33 = vpop.f32.mrf.mxu1 }
 0x7cb   :  { %v9635_v51 = vmax.f32 %v2978_v26, %v3018_v33  ;;  %v3065_v49 = vsel %vm554_vm7, %v3063_v31, %v3064_v41  ;;  %v3322_v52 = vsel %vm822_vm9, %v3320_v37, %v3321_v48  ;;  %v3068_v55 = vrot.slane %v9630_v39, 1  ;;  %v8374_v37 = vld [vmem:[%s10449_s2] sm:$0xff] }
 0x7cc   :  { %v7739_v53 = vpop.f32.mrf.mxu1  ;;  %7759 = vmatprep.mubr.msk.f32.mxu1 %vm570_vm8, %v3065_v49  ;;  %7815 = vmatprep.mubr.msk.f32.mxu0 %vm570_vm8, %v3322_v52  ;;  %v3325_v58 = vrot.slane %v9630_v39, 2  ;;  %v3613_v33 = vrot.slane %v9630_v39, 4  ;;  %v8376_v49 = vld [vmem:[%s10449_s2 + $0xf8] sm:$0xff] }
 0x7cd   :  { %v3066_v47 = vrot.slane %v9635_v51, 1  ;;  %v3323_v54 = vrot.slane %v9635_v51, 2  ;;  %v9644_v46 = vmax.f32 %v7727_v28, %v7739_v53  ;;  %v8369_v28 = vld [vmem:[%s10449_s2 + $0x118] sm:$0xff]  ;;  %v3611_v31 = vrot.slane %v9635_v51, 4 }
 0x7ce   :  { %v3028_v56 = vpop.f32.mrf.mxu1 }
 0x7cf   :  { %v9647_v45 = vmax.f32 %v2988_v11, %v3028_v56  ;;  %v3067_v59 = vsel %vm554_vm7, %v3064_v41, %v3066_v47  ;;  %v3324_v0 = vsel %vm822_vm9, %v3321_v48, %v3323_v54  ;;  %v3069_v43 = vsel %vm554_vm7, %v3066_v47, %v3068_v55  ;;  %v8370_v11 = vld [vmem:[%s10449_s2 + $0x10] sm:$0xff]  ;;  %v8375_v48 = vld [vmem:[%s10449_s2 + $0x100] sm:$0xff] }
 0x7d0   :  { %v7742_v60 = vpop.f32.mrf.mxu1  ;;  %7760 = vmatmul.mubr.msk.f32.vlgmr.msra.gmra.mxu1 %vm570_vm8, %v3067_v59  ;;  %7816 = vmatmul.mubr.msk.f32.vlgmr.msra.gmra.mxu0 %vm570_vm8, %v3324_v0  ;;  %v3326_v32 = vsel %vm822_vm9, %v3323_v54, %v3325_v58  ;;  %v3072_v44 = vrot.slane %v9644_v46, 1  ;;  %v3612_v52 = vsel %vm122_vm0, %v3609_v42, %v3611_v31  ;;  %v3614_v53 = vsel %vm122_vm0, %v3611_v31, %v3613_v33  ;;  %v8377_v54 = vld [vmem:[%s10449_s2 + $0xf0] sm:$0xff] }
 0x7d1   :  { %7762 = vmatprep.mubr.msk.f32.mxu1 %vm570_vm8, %v3069_v43  ;;  %7772 = vmatpush3.msra.mxu1 %v8355_v13  ;;  %v3070_v30 = vrot.slane %v9647_v45, 1  ;;  %v3327_v63 = vrot.slane %v9647_v45, 2  ;;  %v9672_v7 = vmax.f32 %v7730_v29, %v7742_v60  ;;  %v8371_v29 = vld [vmem:[%s10449_s2 + $0x110] sm:$0xff]  ;;  %v3615_v47 = vrot.slane %v9647_v45, 4  ;;  %v8380_v60 = vld [vmem:[%s10449_s2 + $0xe0] sm:$0xff] }
 0x7d2   :  { %7818 = vmatprep.mubr.msk.f32.mxu0 %vm570_vm8, %v3326_v32  ;;  %7856 = vmatpush3.msra.mxu0 %v9421_v62  ;;  %v3038_v2 = vpop.f32.mrf.mxu1  ;;  %v3329_v62 = vrot.slane %v9644_v46, 2  ;;  %v3617_v56 = vrot.slane %v9644_v46, 4  ;;  %v8381_v32 = vld [vmem:[%s10450_s3 + $0x30] sm:$0xff] }
 0x7d3   :  { %v9661_v4 = vmax.f32 %v2998_v34, %v3038_v2  ;;  %7773 = vmatprep.subr.mxu1 %v8362_v5  ;;  %7857 = vmatprep.subr.mxu0 %v8363_v6  ;;  %v3071_v38 = vsel %vm554_vm7, %v3068_v55, %v3070_v30  ;;  %v3328_v50 = vsel %vm822_vm9, %v3325_v58, %v3327_v63  ;;  %v3076_v18 = vrot.slane %v9672_v7, 1  ;;  %v8378_v55 = vld [vmem:[%s10450_s3 + $0x38] sm:$0xff]  ;;  %v8379_v58 = vld [vmem:[%s10449_s2 + $0xe8] sm:$0xff] }
 0x7d4   :  { %7774 = vmatpush3.msra.mxu1 %v8362_v5  ;;  %7858 = vmatpush3.msra.mxu0 %v8363_v6  ;;  %v3073_v9 = vsel %vm554_vm7, %v3070_v30, %v3072_v44  ;;  %v3330_v12 = vsel %vm822_vm9, %v3327_v63, %v3329_v62  ;;  %v3333_v10 = vrot.slane %v9672_v7, 2  ;;  %v3608_v34 = vrot.slane %v9627_v23, 4  ;;  %v8382_v63 = vld [vmem:[%s10449_s2 + $0xd8] sm:$0xff]  ;;  %v8383_v6 = vld [vmem:[%s10449_s2 + $0xd0] sm:$0xff] }
 0x7d5   :  { %7763 = vmatmul.mubr.msk.f32.gmra.mxu1 %vm570_vm8, %v3071_v38  ;;  %7775 = vmatprep.subr.mxu1 %v8364_v35  ;;  %v3074_v3 = vrot.slane %v9661_v4, 1  ;;  %v3331_v13 = vrot.slane %v9661_v4, 2  ;;  %v3616_v59 = vsel %vm122_vm0, %v3613_v33, %v3615_v47  ;;  %v3618_v0 = vsel %vm122_vm0, %v3615_v47, %v3617_v56  ;;  %v8384_v38 = vld [vmem:[%s10450_s3 + $0x28] sm:$0xff] }
 0x7d6   :  { %7819 = vmatmul.mubr.msk.f32.gmra.mxu0 %vm570_vm8, %v3328_v50  ;;  %7859 = vmatprep.subr.mxu0 %v8365_v16  ;;  %v3610_v41 = vsel %vm122_vm0, %v3608_v34, %v3609_v42  ;;  %v3619_v43 = vrot.slane %v9661_v4, 4  ;;  %v3621_v30 = vrot.slane %v9672_v7, 4  ;;  %v3464_v5 = vrot.slane %v9627_v23, 3 }
 0x7d7   :  { %7765 = vmatprep.mubr.msk.f32.mxu1 %vm570_vm8, %v3073_v9  ;;  %7776 = vmatpush3.msra.mxu1 %v8364_v35  ;;  %v3075_v17 = vsel %vm554_vm7, %v3072_v44, %v3074_v3  ;;  %v3332_v15 = vsel %vm822_vm9, %v3329_v62, %v3331_v13  ;;  %v3077_v24 = vsel %vm554_vm7, %v3074_v3, %v3076_v18  ;;  %v3465_v50 = vrot.slane %v9625_v40, 3  ;;  %v8387_v3 = vld [vmem:[%s10450_s3 + $0x20] sm:$0xff] }
 0x7d8   :  { %7821 = vmatprep.mubr.msk.f32.mxu0 %vm570_vm8, %v3330_v12  ;;  %7860 = vmatpush3.msra.mxu0 %v8365_v16  ;;  %v3334_v26 = vsel %vm822_vm9, %v3331_v13, %v3333_v10  ;;  %v3620_v2 = vsel %vm122_vm0, %v3617_v56, %v3619_v43  ;;  %v3622_v44 = vsel %vm122_vm0, %v3619_v43, %v3621_v30  ;;  %v3467_v62 = vrot.slane %v9635_v51, 3 }
 0x7d9   :  { %7777 = vmatprep.subr.mxu1 %v8366_v8  ;;  %7861 = vmatprep.subr.mxu0 %v8367_v19  ;;  %v3466_v9 = vsel %vm976_vm10, %v3464_v5, %v3465_v50  ;;  %v3471_v12 = vrot.slane %v9647_v45, 3 }
 0x7da   :  { %7778 = vmatpush3.msra.mxu1 %v8366_v8  ;;  %7862 = vmatpush3.msra.mxu0 %v8367_v19  ;;  %v3468_v35 = vsel %vm976_vm10, %v3465_v50, %v3467_v62  ;;  %v3477_v8 = vrot.slane %v9672_v7, 3 }
 0x7db   :  { %7766 = vmatmul.mubr.msk.f32.gmra.mxu1 %vm570_vm8, %v3075_v17  ;;  %7779 = vmatprep.subr.mxu1 %v8368_v25  ;;  %v3475_v17 = vrot.slane %v9661_v4, 3 }
 0x7dc   :  { %7822 = vmatmul.mubr.msk.f32.gmra.mxu0 %vm570_vm8, %v3332_v15  ;;  %7863 = vmatprep.subr.mxu0 %v8369_v28 }
 0x7dd   :  { %7768 = vmatprep.mubr.msk.f32.mxu1 %vm570_vm8, %v3077_v24  ;;  %7780 = vmatpush3.msra.mxu1 %v8368_v25  ;;  %v3478_v15 = vsel %vm976_vm10, %v3475_v17, %v3477_v8 }
 0x7de   :  { %7824 = vmatprep.mubr.msk.f32.mxu0 %vm570_vm8, %v3334_v26  ;;  %7864 = vmatpush3.msra.mxu0 %v8369_v28 }
 0x7df   :  { %7781 = vmatprep.subr.mxu1 %v8370_v11  ;;  %7865 = vmatprep.subr.mxu0 %v8371_v29 }
 0x7e0   :  { %7782 = vmatpush3.msra.mxu1 %v8370_v11  ;;  %7866 = vmatpush3.msra.mxu0 %v8371_v29 }
 0x7e1   :  { %7769 = vmatmul.mubr.msk.f32.gmra.mxu1 %vm570_vm8, %v3076_v18  ;;  %7783 = vmatprep.subr.mxu1 %v8372_v36 }
 0x7e2   :  { %7825 = vmatmul.mubr.msk.f32.gmra.mxu0 %vm570_vm8, %v3333_v10  ;;  %7867 = vmatprep.subr.mxu0 %v8373_v27 }
 0x7e3   :  { %7784 = vmatpush3.msra.mxu1 %v8372_v36  ;;  %7787 = vmatprep.mubr.msk.f32.mxu1 %vm570_vm8, %v9627_v23  ;;  %v8385_v23 = vld [vmem:[%s10449_s2 + $0xc8] sm:$0xff] }
 0x7e4   :  { %7868 = vmatpush3.msra.mxu0 %v8373_v27  ;;  %7871 = vmatprep.mubr.msk.f32.mxu0 %vm570_vm8, %v3610_v41 }
 0x7e5   :  { %7785 = vmatprep.subr.mxu1 %v8374_v37  ;;  %7869 = vmatprep.subr.mxu0 %v8375_v48 }
 0x7e6   :  { %7786 = vmatpush3.msra.mxu1 %v8374_v37  ;;  %7870 = vmatpush3.msra.mxu0 %v8375_v48 }
 0x7e7   :  { %7788 = vmatmul.mubr.msk.f32.vlgmr.msra.gmra.mxu1 %vm570_vm8, %v9625_v40  ;;  %7827 = vmatprep.subr.mxu1 %v8376_v49  ;;  %v8386_v40 = vld [vmem:[%s10449_s2 + $0xc0] sm:$0xff] }
 0x7e8   :  { %7872 = vmatmul.mubr.msk.f32.vlgmr.msra.gmra.mxu0 %vm570_vm8, %v3612_v52  ;;  %7790 = vmatprep.mubr.msk.f32.mxu1 %vm570_vm8, %v9635_v51  ;;  %v3469_v51 = vrot.slane %v9630_v39, 3 }
 0x7e9   :  { %7828 = vmatpush3.msra.mxu1 %v8376_v49  ;;  %7874 = vmatprep.mubr.msk.f32.mxu0 %vm570_vm8, %v3614_v53 }
 0x7ea   :  { %7829 = vmatprep.subr.mxu1 %v8377_v54  ;;  %7911 = vmatprep.subr.mxu0 %v8378_v55  ;;  %v3470_v13 = vsel %vm976_vm10, %v3467_v62, %v3469_v51  ;;  %v3472_v16 = vsel %vm976_vm10, %v3469_v51, %v3471_v12 }
 0x7eb   :  { %7830 = vmatpush3.msra.mxu1 %v8377_v54  ;;  %7912 = vmatpush3.msra.mxu0 %v8378_v55 }
 0x7ec   :  { %7791 = vmatmul.mubr.msk.f32.gmra.mxu1 %vm570_vm8, %v9630_v39  ;;  %7831 = vmatprep.subr.mxu1 %v8379_v58  ;;  %v9819_v39 = vld [vmem:[%s10450_s3 + $0x18] sm:$0xff] }
 0x7ed   :  { %7875 = vmatmul.mubr.msk.f32.gmra.mxu0 %vm570_vm8, %v3616_v59  ;;  %7793 = vmatprep.mubr.msk.f32.mxu1 %vm570_vm8, %v9647_v45  ;;  %v3473_v45 = vrot.slane %v9644_v46, 3 }
 0x7ee   :  { %7832 = vmatpush3.msra.mxu1 %v8379_v58  ;;  %7877 = vmatprep.mubr.msk.f32.mxu0 %vm570_vm8, %v3618_v0 }
 0x7ef   :  { %7833 = vmatprep.subr.mxu1 %v8380_v60  ;;  %7913 = vmatprep.subr.mxu0 %v8381_v32  ;;  %v3474_v18 = vsel %vm976_vm10, %v3471_v12, %v3473_v45  ;;  %v3476_v19 = vsel %vm976_vm10, %v3473_v45, %v3475_v17 }
 0x7f0   :  { %7834 = vmatpush3.msra.mxu1 %v8380_v60  ;;  %7914 = vmatpush3.msra.mxu0 %v8381_v32 }
 0x7f1   :  { %7794 = vmatmul.mubr.msk.f32.gmra.mxu1 %vm570_vm8, %v9644_v46  ;;  %7835 = vmatprep.subr.mxu1 %v8382_v63  ;;  %v8389_v46 = vld [vmem:[%s10453_s6] sm:$0xff] }
 0x7f2   :  { %7878 = vmatmul.mubr.msk.f32.gmra.mxu0 %vm570_vm8, %v3620_v2  ;;  %7796 = vmatprep.mubr.msk.f32.mxu1 %vm570_vm8, %v9661_v4 }
 0x7f3   :  { %7836 = vmatpush3.msra.mxu1 %v8382_v63  ;;  %7880 = vmatprep.mubr.msk.f32.mxu0 %vm570_vm8, %v3622_v44 }
 0x7f4   :  { %7837 = vmatprep.subr.mxu1 %v8383_v6  ;;  %7915 = vmatprep.subr.mxu0 %v8384_v38 }
 0x7f5   :  { %7838 = vmatpush3.msra.mxu1 %v8383_v6  ;;  %7916 = vmatpush3.msra.mxu0 %v8384_v38 }
 0x7f6   :  { %7797 = vmatmul.mubr.msk.f32.gmra.mxu1 %vm570_vm8, %v9672_v7  ;;  %7839 = vmatprep.subr.mxu1 %v8385_v23 }
 0x7f7   :  { %7881 = vmatmul.mubr.msk.f32.gmra.mxu0 %vm570_vm8, %v3621_v30  ;;  %7840 = vmatpush3.msra.mxu1 %v8385_v23 }
 0x7f8   :  { %7843 = vmatprep.mubr.msk.f32.mxu1 %vm570_vm8, %v3466_v9  ;;  %7841 = vmatprep.subr.mxu1 %v8386_v40 }
 0x7f9   :  { %7842 = vmatpush3.msra.mxu1 %v8386_v40  ;;  %7917 = vmatprep.subr.mxu0 %v8387_v3 }
 0x7fa   :  { %7844 = vmatmul.mubr.msk.f32.vlgmr.msra.gmra.mxu1 %vm570_vm8, %v3468_v35  ;;  %7918 = vmatpush3.msra.mxu0 %v8387_v3 }
 0x7fb   :  { %7846 = vmatprep.mubr.msk.f32.mxu1 %vm570_vm8, %v3470_v13  ;;  %7925 = vmatprep.subr.mxu0 %v9819_v39 }
 0x7fe   :  { %7847 = vmatmul.mubr.msk.f32.gmra.mxu1 %vm570_vm8, %v3472_v16 }
 0x7ff   :  { %7849 = vmatprep.mubr.msk.f32.mxu1 %vm570_vm8, %v3474_v18 }
 0x802   :  { %7850 = vmatmul.mubr.msk.f32.gmra.mxu1 %vm570_vm8, %v3476_v19 }
 0x803   :  { %7852 = vmatprep.mubr.msk.f32.mxu1 %vm570_vm8, %v3478_v15 }
 0x806   :  { %7853 = vmatmul.mubr.msk.f32.gmra.mxu1 %vm570_vm8, %v3477_v8 }
 0x807   :  { %7899 = vmatprep.mubr.msk.f32.mxu1 %vm1318_vm11, %v8389_v46 }
 0x890   :  { %v7761_v4 = vpop.f32.mrf.mxu1  ;;  %v7817_v10 = vpop.f32.mrf.mxu0 }
 0x892   :  { %v3160_v24 = vpop.f32.mrf.mxu1  ;;  %v3417_v7 = vpop.f32.mrf.mxu0 }
 0x895   :  { %v7764_v25 = vpop.f32.mrf.mxu1 }
 0x896   :  { %v7820_v26 = vpop.f32.mrf.mxu0 }
 0x897   :  { %v3170_v28 = vpop.f32.mrf.mxu1 }
 0x898   :  { %v3427_v11 = vpop.f32.mrf.mxu0 }
 0x89b   :  { %v7767_v29 = vpop.f32.mrf.mxu1 }
 0x89c   :  { %v7823_v36 = vpop.f32.mrf.mxu0 }
 0x89d   :  { %v3180_v34 = vpop.f32.mrf.mxu1 }
 0x89e   :  { %v3437_v27 = vpop.f32.mrf.mxu0 }
 0x8a1   :  { %v7770_v42 = vpop.f32.mrf.mxu1 }
 0x8a2   :  { %v7826_v31 = vpop.f32.mrf.mxu0 }
 0x8a3   :  { %v3190_v41 = vpop.f32.mrf.mxu1 }
 0x8a4   :  { %v3447_v33 = vpop.f32.mrf.mxu0 }
 0x8a7   :  { %v7789_v37 = vpop.f32.mrf.mxu1 }
 0x8a8   :  { %v7873_v52 = vpop.f32.mrf.mxu0  ;;  %v3287_v35 = vadd.f32 %v7789_v37, %v7761_v4 }
 0x8a9   :  { %v3281_v48 = vpop.f32.mrf.mxu1 }
 0x8aa   :  { %v3705_v54 = vpop.f32.mrf.mxu0  ;;  %v3282_v16 = vadd.f32 %v3281_v48, %v3160_v24 }
 0x8ac   :  { %v7792_v49 = vpop.f32.mrf.mxu1 }
 0x8ad   :  { %v7876_v56 = vpop.f32.mrf.mxu0  ;;  %v3297_v44 = vadd.f32 %v7792_v49, %v7764_v25 }
 0x8ae   :  { %v3291_v53 = vpop.f32.mrf.mxu1 }
 0x8af   :  { %v3715_v0 = vpop.f32.mrf.mxu0  ;;  %v3292_v50 = vadd.f32 %v3291_v53, %v3170_v28  ;;  %v3459_v12 = vadd.f32 %v7820_v26, %v3297_v44  ;;  %v3456_v26 = vadd.f32 %v3417_v7, %v3282_v16  ;;  %v8400_v16 = vld [vmem:[%s10453_s6 + $0x30] sm:$0xff] }
 0x8b1   :  { %v7795_v47 = vpop.f32.mrf.mxu1  ;;  %v3458_v8 = vadd.f32 %v3427_v11, %v3292_v50 }
 0x8b2   :  { %v3307_v32 = vadd.f32 %v7795_v47, %v7767_v29  ;;  %v7879_v30 = vpop.f32.mrf.mxu0  ;;  %v3457_v29 = vadd.f32 %v7817_v10, %v3287_v35  ;;  %v8395_v35 = vld [vmem:[%s10450_s3 + $0x48] sm:$0xff] }
 0x8b3   :  { %v3301_v55 = vpop.f32.mrf.mxu1 }
 0x8b4   :  { %v3302_v2 = vadd.f32 %v3301_v55, %v3180_v34  ;;  %v3461_v38 = vadd.f32 %v7823_v36, %v3307_v32  ;;  %v3725_v62 = vpop.f32.mrf.mxu0 }
 0x8b6   :  { %v7798_v58 = vpop.f32.mrf.mxu1  ;;  %v3460_v51 = vadd.f32 %v3437_v27, %v3302_v2 }
 0x8b7   :  { %v3317_v6 = vadd.f32 %v7798_v58, %v7770_v42  ;;  %v7882_v17 = vpop.f32.mrf.mxu0 }
 0x8b8   :  { %v3311_v59 = vpop.f32.mrf.mxu1 }
 0x8b9   :  { %v3312_v9 = vadd.f32 %v3311_v59, %v3190_v41  ;;  %v3463_v45 = vadd.f32 %v7826_v31, %v3317_v6  ;;  %v3735_v27 = vpop.f32.mrf.mxu0 }
 0x8ba   :  { %v7845_v43 = vpop.f32.mrf.mxu1 }
 0x8bb   :  { %v3462_v25 = vadd.f32 %v3447_v33, %v3312_v9  ;;  %v3601_v4 = vadd.f32 %v7845_v43, %v3457_v29  ;;  %v8392_v9 = vld [vmem:[%s10453_s6 + $0x10] sm:$0xff] }
 0x8bc   :  { %v3561_v60 = vpop.f32.mrf.mxu1 }
 0x8bd   :  { %v3600_v11 = vadd.f32 %v3561_v60, %v3456_v26  ;;  %v3745_v47 = vadd.f32 %v7873_v52, %v3601_v4 }
 0x8be   :  { %v7848_v63 = vpop.f32.mrf.mxu1 }
 0x8bf   :  { %v3603_v18 = vadd.f32 %v7848_v63, %v3459_v12  ;;  %v3744_v59 = vadd.f32 %v3705_v54, %v3600_v11  ;;  %v3753_v52 = vadd.f32 %v3745_v47, %v9040_v14  ;;  %v8396_v12 = vld [vmem:[%s10453_s6 + $0x20] sm:$0xff] }
 0x8c0   :  { %v3571_v5 = vpop.f32.mrf.mxu1 }
 0x8c1   :  { %v3602_v28 = vadd.f32 %v3571_v5, %v3458_v8  ;;  %v3747_v37 = vadd.f32 %v7876_v56, %v3603_v18  ;;  %v3752_v63 = vadd.f32 %v3744_v59, %v9040_v14  ;;  %v3769_v5 = vmul.f32 0.01, %v3753_v52 }
 0x8c2   :  { %v7851_v23 = vpop.f32.mrf.mxu1 }
 0x8c3   :  { %v3605_v40 = vadd.f32 %v7851_v23, %v3461_v38  ;;  %v3746_v49 = vadd.f32 %v3715_v0, %v3602_v28  ;;  %v3755_v55 = vadd.f32 %v3747_v37, %v9040_v14  ;;  %v3768_v38 = vmul.f32 0.01, %v3752_v63  ;;  %v8391_v23 = vld [vmem:[%s10450_s3 + $0x58] sm:$0xff] }
 0x8c4   :  { %v3581_v3 = vpop.f32.mrf.mxu1 }
 0x8c5   :  { %v3604_v13 = vadd.f32 %v3581_v3, %v3460_v51  ;;  %v3749_v15 = vadd.f32 %v7879_v30, %v3605_v40  ;;  %v3754_v43 = vadd.f32 %v3746_v49, %v9040_v14  ;;  %v3771_v30 = vmul.f32 0.01, %v3755_v55  ;;  %v8393_v40 = vld [vmem:[%s10450_s3 + $0x50] sm:$0xff]  ;;  %v8394_v51 = vld [vmem:[%s10453_s6 + $0x18] sm:$0xff]  ;;  %v8397_v3 = vld [vmem:[%s10450_s3 + $0x40] sm:$0xff] }
 0x8c6   :  { %v7854_v19 = vpop.f32.mrf.mxu1  ;;  %vm3763_vm6 = vcmp.ge.f32.partialorder %v3755_v55, 0.0 }
 0x8c7   :  { %v3607_v46 = vadd.f32 %v7854_v19, %v3463_v45  ;;  %v3748_v36 = vadd.f32 %v3725_v62, %v3604_v13  ;;  %v3757_v31 = vadd.f32 %v3749_v15, %v9040_v14  ;;  %v3770_v54 = vmul.f32 0.01, %v3754_v43  ;;  %v8390_v62 = vld [vmem:[%s10453_s6 + $0x8] sm:$0xff]  ;;  %v8399_v45 = vld [vmem:[%s10450_s3 + $0x98] sm:$0xff] }
 0x8c8   :  { %v3591_v34 = vpop.f32.mrf.mxu1  ;;  %vm3762_vm1 = vcmp.ge.f32.partialorder %v3754_v43, 0.0  ;;  %v3779_v44 = vsel %vm3763_vm6, %v3755_v55, %v3771_v30  ;;  %v8398_v13 = vld [vmem:[%s10453_s6 + $0x28] sm:$0xff] }
 0x8c9   :  { %v3751_v42 = vadd.f32 %v7882_v17, %v3607_v46  ;;  %v3606_v41 = vadd.f32 %v3591_v34, %v3462_v25  ;;  %v3756_v53 = vadd.f32 %v3748_v36, %v9040_v14  ;;  %v3773_v56 = vmul.f32 0.01, %v3757_v31  ;;  %v8401_v17 = vld [vmem:[%s10453_s6 + $0x38] sm:$0xff] }
 0x8ca   :  { %vm3765_vm14 = vcmp.ge.f32.partialorder %v3757_v31, 0.0  ;;  %v3778_v6 = vsel %vm3762_vm1, %v3754_v43, %v3770_v54  ;;  %v8405_v43 = vld [vmem:[%s10450_s3 + $0x88] sm:$0xff] }
 0x8cb   :  { %v3759_v24 = vadd.f32 %v3751_v42, %v9040_v14  ;;  %v3750_v48 = vadd.f32 %v3735_v27, %v3606_v41  ;;  %v3772_v60 = vmul.f32 0.01, %v3756_v53  ;;  %vm3764_vm2 = vcmp.ge.f32.partialorder %v3756_v53, 0.0 }
 0x8cc   :  { %v3781_v32 = vsel %vm3765_vm14, %v3757_v31, %v3773_v56 }
 0x8cd   :  { %v3758_v10 = vadd.f32 %v3750_v48, %v9040_v14  ;;  %vm3767_vm3 = vcmp.ge.f32.partialorder %v3759_v24, 0.0  ;;  %v3775_v33 = vmul.f32 0.01, %v3759_v24  ;;  %v3780_v2 = vsel %vm3764_vm2, %v3756_v53, %v3772_v60 }
 0x8cf   :  { %v3783_v58 = vsel %vm3767_vm3, %v3759_v24, %v3775_v33  ;;  %vm3766_vm13 = vcmp.ge.f32.partialorder %v3758_v10, 0.0  ;;  %v3774_v7 = vmul.f32 0.01, %v3758_v10  ;;  %vm3761_vm3 = vcmp.ge.f32.partialorder %v3753_v52, 0.0 }
 0x8d0   :  { %7883 = vmatprep.subr.msk.mxu1 %vm1343_vm12, %v3783_v58  ;;  %v3777_v50 = vsel %vm3761_vm3, %v3753_v52, %v3769_v5  ;;  %v8406_v52 = vld [vmem:[%s10450_s3] sm:$0xff]  ;;  %v8409_v5 = vld [vmem:[%s10450_s3 + $0x70] sm:$0xff] }
 0x8d1   :  { %7884 = vmatpush3.msk.msra.mxu1 %vm1343_vm12, %v3783_v58  ;;  %v3782_v0 = vsel %vm3766_vm13, %v3758_v10, %v3774_v7  ;;  %vm3760_vm13 = vcmp.ge.f32.partialorder %v3752_v63, 0.0  ;;  %v8402_v58 = vld [vmem:[%s10450_s3 + $0x10] sm:$0xff] }
 0x8d2   :  { %7885 = vmatprep.subr.mxu1 %v3782_v0  ;;  %v3776_v14 = vsel %vm3760_vm13, %v3752_v63, %v3768_v38  ;;  %v8403_v7 = vld [vmem:[%s10450_s3 + $0x90] sm:$0xff]  ;;  %v8408_v63 = vld [vmem:[%s10450_s3 + $0x78] sm:$0xff] }
 0x8d3   :  { %7886 = vmatpush3.msra.mxu1 %v3782_v0 }
 0x8d4   :  { %7887 = vmatprep.subr.mxu1 %v3781_v32 }
 0x8d5   :  { %7888 = vmatpush3.msra.mxu1 %v3781_v32  ;;  %v8407_v32 = vld [vmem:[%s10450_s3 + $0x80] sm:$0xff] }
 0x8d6   :  { %7889 = vmatprep.subr.mxu1 %v3780_v2 }
 0x8d7   :  { %7890 = vmatpush3.msra.mxu1 %v3780_v2 }
 0x8d8   :  { %7891 = vmatprep.subr.mxu1 %v3779_v44 }
 0x8d9   :  { %7892 = vmatpush3.msra.mxu1 %v3779_v44 }
 0x8da   :  { %7893 = vmatprep.subr.mxu1 %v3778_v6 }
 0x8db   :  { %7894 = vmatpush3.msra.mxu1 %v3778_v6  ;;  %v8410_v6 = vld [vmem:[%s10451_s4 + $0x38] sm:$0xff] }
 0x8dc   :  { %7895 = vmatprep.subr.mxu1 %v3777_v50 }
 0x8dd   :  { %7896 = vmatpush3.msra.mxu1 %v3777_v50 }
 0x8de   :  { %7897 = vmatprep.subr.mxu1 %v3776_v14 }
 0x8df   :  { %7898 = vmatpush3.msra.mxu1 %v3776_v14  ;;  %v8411_v14 = vld [vmem:[%s10450_s3 + $0x68] sm:$0xff] }
 0x8e0   :  { %7900 = vmatmul.mubr.msk.f32.vlgmr.msra.gmra.mxu1 %vm1318_vm11, %v8390_v62  ;;  %7939 = vmatprep.subr.mxu1 %v8391_v23 }
 0x8e1   :  { %7902 = vmatprep.mubr.msk.f32.mxu1 %vm1318_vm11, %v8392_v9  ;;  %7940 = vmatpush3.msra.mxu1 %v8391_v23  ;;  %v8412_v23 = vld [vmem:[%s10450_s3 + $0x60] sm:$0xff] }
 0x8e2   :  { %7941 = vmatprep.subr.mxu1 %v8393_v40 }
 0x8e3   :  { %7942 = vmatpush3.msra.mxu1 %v8393_v40 }
 0x8e4   :  { %7903 = vmatmul.mubr.msk.f32.gmra.mxu1 %vm1318_vm11, %v8394_v51  ;;  %7943 = vmatprep.subr.mxu1 %v8395_v35  ;;  %v8413_v51 = vld [vmem:[%s10451_s4 + $0x30] sm:$0xff] }
 0x8e5   :  { %7905 = vmatprep.mubr.msk.f32.mxu1 %vm1318_vm11, %v8396_v12  ;;  %7944 = vmatpush3.msra.mxu1 %v8395_v35  ;;  %v8414_v12 = vld [vmem:[%s10451_s4 + $0x28] sm:$0xff] }
 0x8e6   :  { %7945 = vmatprep.subr.mxu1 %v8397_v3 }
 0x8e7   :  { %7946 = vmatpush3.msra.mxu1 %v8397_v3  ;;  %v8415_v3 = vld [vmem:[%s10451_s4 + $0x20] sm:$0xff] }
 0x8e8   :  { %7906 = vmatmul.mubr.msk.f32.gmra.mxu1 %vm1318_vm11, %v8398_v13  ;;  %7967 = vmatprep.subr.mxu1 %v8399_v45  ;;  %v8416_v13 = vld [vmem:[%s10454_s7] sm:$0xff] }
 0x8e9   :  { %7908 = vmatprep.mubr.msk.f32.mxu1 %vm1318_vm11, %v8400_v16 }
 0x8ec   :  { %7909 = vmatmul.mubr.msk.f32.gmra.mxu1 %vm1318_vm11, %v8401_v17 }
 0x9a0   :  { %v7901_v18 = vpop.f32.mrf.mxu1 }
 0x9a2   :  { %v3853_v8 = vpop.f32.mrf.mxu1 }
 0x9a4   :  { %v7904_v19 = vpop.f32.mrf.mxu1 }
 0x9a6   :  { %v3863_v15 = vpop.f32.mrf.mxu1 }
 0x9a8   :  { %v7907_v46 = vpop.f32.mrf.mxu1 }
 0x9a9   :  { %v9891_v25 = vmax.f32 %v7901_v18, %v7907_v46 }
 0x9aa   :  { %v3873_v29 = vpop.f32.mrf.mxu1 }
 0x9ab   :  { %v9893_v28 = vmax.f32 %v3853_v8, %v3873_v29  ;;  %v3901_v36 = vrot.slane %v9891_v25, 1  ;;  %v4094_v4 = vrot.slane %v9891_v25, 2  ;;  %v4302_v59 = vrot.slane %v9891_v25, 4 }
 0x9ac   :  { %v7910_v34 = vpop.f32.mrf.mxu1  ;;  %v4198_v50 = vrot.slane %v9891_v25, 3 }
 0x9ad   :  { %v9896_v42 = vmax.f32 %v7904_v19, %v7910_v34  ;;  %v3900_v41 = vrot.slane %v9893_v28, 1  ;;  %v4093_v27 = vrot.slane %v9893_v28, 2  ;;  %v4301_v56 = vrot.slane %v9893_v28, 4 }
 0x9ae   :  { %v3883_v26 = vpop.f32.mrf.mxu1  ;;  %v4197_v44 = vrot.slane %v9893_v28, 3 }
 0x9af   :  { %v9901_v37 = vmax.f32 %v3863_v15, %v3883_v26  ;;  %v3902_v31 = vsel %vm554_vm7, %v3900_v41, %v3901_v36  ;;  %v4095_v24 = vsel %vm822_vm9, %v4093_v27, %v4094_v4  ;;  %v3905_v49 = vrot.slane %v9896_v42, 1 }
 0x9b0   :  { %7919 = vmatprep.mubr.msk.f32.mxu0 %vm1476_vm15, %v3902_v31  ;;  %7947 = vmatprep.mubr.msk.f32.mxu1 %vm1476_vm15, %v4095_v24  ;;  %v4098_v53 = vrot.slane %v9896_v42, 2  ;;  %v4303_v60 = vsel %vm122_vm0, %v4301_v56, %v4302_v59  ;;  %v4306_v30 = vrot.slane %v9896_v42, 4  ;;  %v4199_v62 = vsel %vm976_vm10, %v4197_v44, %v4198_v50 }
 0x9b1   :  { %v4096_v48 = vrot.slane %v9901_v37, 2  ;;  %v3903_v11 = vrot.slane %v9901_v37, 1  ;;  %v4304_v0 = vrot.slane %v9901_v37, 4  ;;  %v4200_v38 = vrot.slane %v9901_v37, 3 }
 0x9b2   :  { %v4202_v9 = vrot.slane %v9896_v42, 3 }
 0x9b3   :  { %v3904_v10 = vsel %vm554_vm7, %v3901_v36, %v3903_v11  ;;  %v4097_v33 = vsel %vm822_vm9, %v4094_v4, %v4096_v48  ;;  %v3906_v47 = vsel %vm554_vm7, %v3903_v11, %v3905_v49  ;;  %v4099_v55 = vsel %vm822_vm9, %v4096_v48, %v4098_v53 }
 0x9b4   :  { %7920 = vmatmul.mubr.msk.f32.vlgmr.msra.gmra.mxu0 %vm1476_vm15, %v3904_v10  ;;  %7948 = vmatmul.mubr.msk.f32.vlgmr.msra.gmra.mxu1 %vm1476_vm15, %v4097_v33  ;;  %v4305_v2 = vsel %vm122_vm0, %v4302_v59, %v4304_v0  ;;  %v4307_v54 = vsel %vm122_vm0, %v4304_v0, %v4306_v30  ;;  %v4201_v40 = vsel %vm976_vm10, %v4198_v50, %v4200_v38 }
 0x9b5   :  { %7922 = vmatprep.mubr.msk.f32.mxu0 %vm1476_vm15, %v3906_v47  ;;  %7926 = vmatpush3.msra.mxu0 %v9819_v39  ;;  %v8404_v39 = vld [vmem:[%s10450_s3 + $0x8] sm:$0xff]  ;;  %v4203_v35 = vsel %vm976_vm10, %v4200_v38, %v4202_v9 }
 0x9b6   :  { %7950 = vmatprep.mubr.msk.f32.mxu1 %vm1476_vm15, %v4099_v55  ;;  %7968 = vmatpush3.msra.mxu1 %v8399_v45  ;;  %v10001_v45 = vld [vmem:[%s10451_s4 + $0x58] sm:$0xff] }
 0x9b7   :  { %7927 = vmatprep.subr.mxu0 %v8402_v58  ;;  %7969 = vmatprep.subr.mxu1 %v8403_v7 }
 0x9b8   :  { %7928 = vmatpush3.msra.mxu0 %v8402_v58  ;;  %7970 = vmatpush3.msra.mxu1 %v8403_v7 }
 0x9b9   :  { %7923 = vmatmul.mubr.msk.f32.gmra.mxu0 %vm1476_vm15, %v3905_v49  ;;  %7929 = vmatprep.subr.mxu0 %v8404_v39 }
 0x9ba   :  { %7951 = vmatmul.mubr.msk.f32.gmra.mxu1 %vm1476_vm15, %v4098_v53  ;;  %7971 = vmatprep.subr.mxu1 %v8405_v43 }
 0x9bb   :  { %7930 = vmatpush3.msra.mxu0 %v8404_v39  ;;  %7933 = vmatprep.mubr.msk.f32.mxu0 %vm1476_vm15, %v9893_v28 }
 0x9bc   :  { %7972 = vmatpush3.msra.mxu1 %v8405_v43  ;;  %7975 = vmatprep.mubr.msk.f32.mxu1 %vm1476_vm15, %v4303_v60 }
 0x9bd   :  { %7931 = vmatprep.subr.mxu0 %v8406_v52  ;;  %7973 = vmatprep.subr.mxu1 %v8407_v32 }
 0x9be   :  { %7932 = vmatpush3.msra.mxu0 %v8406_v52  ;;  %7974 = vmatpush3.msra.mxu1 %v8407_v32 }
 0x9bf   :  { %7934 = vmatmul.mubr.msk.f32.vlgmr.msra.gmra.mxu0 %vm1476_vm15, %v9891_v25  ;;  %7953 = vmatprep.subr.mxu0 %v8408_v63 }
 0x9c0   :  { %7976 = vmatmul.mubr.msk.f32.vlgmr.msra.gmra.mxu1 %vm1476_vm15, %v4305_v2  ;;  %7936 = vmatprep.mubr.msk.f32.mxu0 %vm1476_vm15, %v9901_v37 }
 0x9c1   :  { %7954 = vmatpush3.msra.mxu0 %v8408_v63  ;;  %7978 = vmatprep.mubr.msk.f32.mxu1 %vm1476_vm15, %v4307_v54 }
 0x9c2   :  { %7955 = vmatprep.subr.mxu0 %v8409_v5  ;;  %7995 = vmatprep.subr.mxu1 %v8410_v6 }
 0x9c3   :  { %7956 = vmatpush3.msra.mxu0 %v8409_v5  ;;  %7996 = vmatpush3.msra.mxu1 %v8410_v6 }
 0x9c4   :  { %7937 = vmatmul.mubr.msk.f32.gmra.mxu0 %vm1476_vm15, %v9896_v42  ;;  %7957 = vmatprep.subr.mxu0 %v8411_v14 }
 0x9c5   :  { %7979 = vmatmul.mubr.msk.f32.gmra.mxu1 %vm1476_vm15, %v4306_v30  ;;  %7958 = vmatpush3.msra.mxu0 %v8411_v14  ;;  %v8418_v14 = vld [vmem:[%s10454_s7 + $0x8] sm:$0xff] }
 0x9c6   :  { %7961 = vmatprep.mubr.msk.f32.mxu0 %vm1476_vm15, %v4199_v62  ;;  %7959 = vmatprep.subr.mxu0 %v8412_v23  ;;  %v8419_v62 = vld [vmem:[%s10451_s4 + $0x18] sm:$0xff] }
 0x9c7   :  { %7960 = vmatpush3.msra.mxu0 %v8412_v23  ;;  %7997 = vmatprep.subr.mxu1 %v8413_v51  ;;  %v8420_v23 = vld [vmem:[%s10454_s7 + $0x10] sm:$0xff] }
 0x9c8   :  { %7962 = vmatmul.mubr.msk.f32.vlgmr.msra.gmra.mxu0 %vm1476_vm15, %v4201_v40  ;;  %7998 = vmatpush3.msra.mxu1 %v8413_v51  ;;  %v8422_v40 = vld [vmem:[%s10454_s7 + $0x18] sm:$0xff]  ;;  %v8423_v51 = vld [vmem:[%s10451_s4 + $0x8] sm:$0xff] }
 0x9c9   :  { %7964 = vmatprep.mubr.msk.f32.mxu0 %vm1476_vm15, %v4203_v35  ;;  %7999 = vmatprep.subr.mxu1 %v8414_v12  ;;  %v8424_v35 = vld [vmem:[%s10451_s4] sm:$0xff] }
 0x9ca   :  { %8000 = vmatpush3.msra.mxu1 %v8414_v12  ;;  %v8425_v12 = vld [vmem:[%s10451_s4 + $0x78] sm:$0xff] }
 0x9cb   :  { %8001 = vmatprep.subr.mxu1 %v8415_v3 }
 0x9cc   :  { %7965 = vmatmul.mubr.msk.f32.gmra.mxu0 %vm1476_vm15, %v4202_v9  ;;  %8002 = vmatpush3.msra.mxu1 %v8415_v3  ;;  %v8421_v9 = vld [vmem:[%s10451_s4 + $0x10] sm:$0xff] }
 0x9cd   :  { %7989 = vmatprep.mubr.msk.f32.mxu0 %vm2014_vm4, %v8416_v13  ;;  %8017 = vmatprep.subr.mxu1 %v10001_v45 }
 0xa74   :  { %v7921_v16 = vpop.f32.mrf.mxu0  ;;  %v7949_v17 = vpop.f32.mrf.mxu1 }
 0xa76   :  { %v3981_v18 = vpop.f32.mrf.mxu0  ;;  %v4174_v8 = vpop.f32.mrf.mxu1 }
 0xa79   :  { %v7924_v19 = vpop.f32.mrf.mxu0 }
 0xa7a   :  { %v7952_v46 = vpop.f32.mrf.mxu1 }
 0xa7b   :  { %v3991_v15 = vpop.f32.mrf.mxu0 }
 0xa7c   :  { %v4184_v29 = vpop.f32.mrf.mxu1 }
 0xa7f   :  { %v7935_v25 = vpop.f32.mrf.mxu0 }
 0xa80   :  { %v4080_v34 = vadd.f32 %v7935_v25, %v7921_v16  ;;  %v7977_v36 = vpop.f32.mrf.mxu1 }
 0xa81   :  { %v4074_v28 = vpop.f32.mrf.mxu0 }
 0xa82   :  { %v4075_v41 = vadd.f32 %v4074_v28, %v3981_v18  ;;  %v4194_v26 = vadd.f32 %v7949_v17, %v4080_v34  ;;  %v4382_v37 = vpop.f32.mrf.mxu1 }
 0xa84   :  { %v7938_v42 = vpop.f32.mrf.mxu0  ;;  %v4193_v11 = vadd.f32 %v4174_v8, %v4075_v41  ;;  %v8427_v41 = vld [vmem:[%s10451_s4 + $0x68] sm:$0xff] }
 0xa85   :  { %v4090_v4 = vadd.f32 %v7938_v42, %v7924_v19  ;;  %v7980_v33 = vpop.f32.mrf.mxu1 }
 0xa86   :  { %v4084_v27 = vpop.f32.mrf.mxu0 }
 0xa87   :  { %v4085_v24 = vadd.f32 %v4084_v27, %v3991_v15  ;;  %v4196_v10 = vadd.f32 %v7952_v46, %v4090_v4  ;;  %v4392_v0 = vpop.f32.mrf.mxu1  ;;  %v8428_v4 = vld [vmem:[%s10451_s4 + $0x50] sm:$0xff] }
 0xa88   :  { %v7963_v31 = vpop.f32.mrf.mxu0 }
 0xa89   :  { %v4298_v48 = vadd.f32 %v7963_v31, %v4194_v26  ;;  %v4195_v7 = vadd.f32 %v4184_v29, %v4085_v24  ;;  %v8429_v26 = vld [vmem:[%s10451_s4 + $0x60] sm:$0xff] }
 0xa8a   :  { %v4278_v49 = vpop.f32.mrf.mxu0  ;;  %v8431_v31 = vld [vmem:[%s10451_s4 + $0x40] sm:$0xff] }
 0xa8b   :  { %v4297_v53 = vadd.f32 %v4278_v49, %v4193_v11  ;;  %v4402_v55 = vadd.f32 %v7977_v36, %v4298_v48  ;;  %v8426_v36 = vld [vmem:[%s10451_s4 + $0x70] sm:$0xff]  ;;  %v8432_v48 = vld [vmem:[%s10455_s8] sm:$0xff]  ;;  %v8433_v11 = vld [vmem:[%s10451_s4 + $0x98] sm:$0xff] }
 0xa8c   :  { %v7966_v47 = vpop.f32.mrf.mxu0 }
 0xa8d   :  { %v4300_v58 = vadd.f32 %v7966_v47, %v4196_v10  ;;  %v4401_v39 = vadd.f32 %v4382_v37, %v4297_v53  ;;  %v4406_v60 = vadd.f32 %v4402_v55, %v9213_v61  ;;  %v8430_v37 = vld [vmem:[%s10451_s4 + $0x48] sm:$0xff]  ;;  %v8434_v53 = vld [vmem:[%s10451_s4 + $0x90] sm:$0xff] }
 0xa8e   :  { %v4288_v56 = vpop.f32.mrf.mxu0  ;;  %v8435_v10 = vld [vmem:[%s10451_s4 + $0x88] sm:$0xff] }
 0xa8f   :  { %v4404_v59 = vadd.f32 %v7980_v33, %v4300_v58  ;;  %v4299_v43 = vadd.f32 %v4288_v56, %v4195_v7  ;;  %v4405_v30 = vadd.f32 %v4401_v39, %v9213_v61  ;;  %v4414_v5 = vmul.f32 0.01, %v4406_v60  ;;  %v8436_v33 = vld [vmem:[%s10451_s4 + $0x80] sm:$0xff] }
 0xa90   :  { %vm4410_vm2 = vcmp.ge.f32.partialorder %v4406_v60, 0.0 }
 0xa91   :  { %v4408_v52 = vadd.f32 %v4404_v59, %v9213_v61  ;;  %v4403_v32 = vadd.f32 %v4392_v0, %v4299_v43  ;;  %v4413_v38 = vmul.f32 0.01, %v4405_v30  ;;  %vm4409_vm6 = vcmp.ge.f32.partialorder %v4405_v30, 0.0 }
 0xa92   :  { %v4418_v50 = vsel %vm4410_vm2, %v4406_v60, %v4414_v5 }
 0xa93   :  { %v4407_v63 = vadd.f32 %v4403_v32, %v9213_v61  ;;  %vm4412_vm11 = vcmp.ge.f32.partialorder %v4408_v52, 0.0  ;;  %v4416_v2 = vmul.f32 0.01, %v4408_v52  ;;  %v4417_v61 = vsel %vm4409_vm6, %v4405_v30, %v4413_v38 }
 0xa95   :  { %v4420_v54 = vsel %vm4412_vm11, %v4408_v52, %v4416_v2  ;;  %vm4411_vm14 = vcmp.ge.f32.partialorder %v4407_v63, 0.0  ;;  %v4415_v44 = vmul.f32 0.01, %v4407_v63 }
 0xa96   :  { %7981 = vmatprep.subr.msk.mxu0 %vm1343_vm12, %v4420_v54 }
 0xa97   :  { %7982 = vmatpush3.msk.msra.mxu0 %vm1343_vm12, %v4420_v54  ;;  %v4419_v6 = vsel %vm4411_vm14, %v4407_v63, %v4415_v44 }
 0xa98   :  { %7983 = vmatprep.subr.mxu0 %v4419_v6 }
 0xa99   :  { %7984 = vmatpush3.msra.mxu0 %v4419_v6 }
 0xa9a   :  { %7985 = vmatprep.subr.mxu0 %v4418_v50 }
 0xa9b   :  { %7986 = vmatpush3.msra.mxu0 %v4418_v50 }
 0xa9c   :  { %7987 = vmatprep.subr.mxu0 %v4417_v61 }
 0xa9d   :  { %7988 = vmatpush3.msra.mxu0 %v4417_v61 }
 0xa9e   :  { %7990 = vmatmul.mubr.msk.f32.vlgmr.msra.gmra.mxu0 %vm2014_vm4, %v8418_v14  ;;  %8006 = vmatprep.subr.mxu0 %v8419_v62 }
 0xa9f   :  { %7992 = vmatprep.mubr.msk.f32.mxu0 %vm2014_vm4, %v8420_v23  ;;  %8007 = vmatpush3.msra.mxu0 %v8419_v62  ;;  %v8437_v23 = vld [vmem:[%s10455_s8 + $0x8] sm:$0xff] }
 0xaa0   :  { %8008 = vmatprep.subr.mxu0 %v8421_v9 }
 0xaa1   :  { %8009 = vmatpush3.msra.mxu0 %v8421_v9  ;;  %v5013_v9 = vld [vmem:[%s10456_s9] sm:$0xff] }
 0xaa2   :  { %7993 = vmatmul.mubr.msk.f32.gmra.mxu0 %vm2014_vm4, %v8422_v40  ;;  %8010 = vmatprep.subr.mxu0 %v8423_v51  ;;  %v10106_v40 = vld [vmem:[%s10456_s9 + $0x28] sm:$0xff]  ;;  %vm5035_vm4 = vcmask 130048  }
 0xaa3   :  { %8011 = vmatpush3.msra.mxu0 %v8423_v51  ;;  %v10113_v51 = vld [vmem:[%s10456_s9 + $0x20] sm:$0xff] }
 0xaa4   :  { %8012 = vmatprep.subr.mxu0 %v8424_v35 }
 0xaa5   :  { %8013 = vmatpush3.msra.mxu0 %v8424_v35  ;;  %v10119_v35 = vld [vmem:[%s10456_s9 + $0x18] sm:$0xff] }
 0xaa6   :  { %8028 = vmatprep.subr.mxu0 %v8425_v12 }
 0xb5e   :  { %v7991_v3 = vpop.f32.mrf.mxu0 }
 0xb60   :  { %v4490_v13 = vpop.f32.mrf.mxu0 }
 0xb62   :  { %v7994_v16 = vpop.f32.mrf.mxu0 }
 0xb63   :  { %v4510_v17 = vmax.f32 %v7991_v3, %v7994_v16 }
 0xb64   :  { %v4500_v18 = vpop.f32.mrf.mxu0 }
 0xb65   :  { %v4509_v8 = vmax.f32 %v4490_v13, %v4500_v18  ;;  %v4514_v15 = vrot.slane %v4510_v17, 1  ;;  %v4759_v25 = vrot.slane %v4510_v17, 3  ;;  %v4675_v42 = vrot.slane %v4510_v17, 2 }
 0xb66   :  { %v4843_v24 = vrot.slane %v4510_v17, 4 }
 0xb67   :  { %8014 = vmatprep.mubr.msk.f32.mxu0 %vm1476_vm15, %v4509_v8  ;;  %v4513_v19 = vrot.slane %v4509_v8, 1  ;;  %v4758_v46 = vrot.slane %v4509_v8, 3  ;;  %v4674_v29 = vrot.slane %v4509_v8, 2 }
 0xb68   :  { %8015 = vmatmul.mubr.msk.f32.vlgmr.msra.gmra.mxu0 %vm1476_vm15, %v4510_v17  ;;  %v2655_v17 = vmax.f32 %v9623_v21, %v9621_v20 }
 0xb69   :  { %8029 = vmatpush3.msra.mxu0 %v8425_v12  ;;  %v4515_v28 = vsel %vm554_vm7, %v4513_v19, %v4514_v15  ;;  %v4760_v34 = vsel %vm976_vm10, %v4758_v46, %v4759_v25  ;;  %v4676_v27 = vsel %vm822_vm9, %v4674_v29, %v4675_v42  ;;  %vm10462_vm9 = vmmov 0   ;;  %v10126_v12 = vld [vmem:[%s10456_s9 + $0x10] sm:$0xff] }
 0xb6a   :  { %8030 = vmatprep.subr.mxu0 %v8426_v36  ;;  %8003 = vmatprep.mubr.msk.f32.mxu1 %vm1476_vm15, %v4515_v28  ;;  %v5033_v19 = vsub.s32 4, %v8701_v57 }
 0xb6b   :  { %8031 = vmatpush3.msra.mxu0 %v8426_v36  ;;  %8036 = vmatprep.mubr.msk.f32.mxu0 %vm1476_vm15, %v4760_v34 }
 0xb6c   :  { %8004 = vmatmul.mubr.msk.f32.vlgmr.msra.gmra.mxu1 %vm1476_vm15, %v4514_v15  ;;  %8032 = vmatprep.subr.mxu0 %v8427_v41  ;;  %v10152_v15 = vld [vmem:[%s10458_s11] sm:$0xff]  ;;  %s8463_s11 = smov 64  }
 0xb6d   :  { %8018 = vmatpush3.msra.mxu1 %v10001_v45  ;;  %8025 = vmatprep.mubr.msk.f32.mxu1 %vm1476_vm15, %v4676_v27  ;;  %v4842_v45 = vrot.slane %v4509_v8, 4  ;;  %v5034_v46 = vrot.slane %v10152_v15, %v5033_v19 }
 0xb6e   :  { %8019 = vmatprep.subr.mxu1 %v8428_v4  ;;  %8033 = vmatpush3.msra.mxu0 %v8427_v41 }
 0xb6f   :  { %8020 = vmatpush3.msra.mxu1 %v8428_v4  ;;  %8034 = vmatprep.subr.mxu0 %v8429_v26  ;;  %v4844_v49 = vsel %vm122_vm0, %v4842_v45, %v4843_v24 }
 0xb70   :  { %8021 = vmatprep.subr.mxu1 %v8430_v37  ;;  %8035 = vmatpush3.msra.mxu0 %v8429_v26 }
 0xb71   :  { %8022 = vmatpush3.msra.mxu1 %v8430_v37  ;;  %8037 = vmatmul.mubr.msk.f32.vlgmr.msra.gmra.mxu0 %vm1476_vm15, %v4759_v25 }
 0xb72   :  { %8023 = vmatprep.subr.mxu1 %v8431_v31  ;;  %8054 = vmatprep.mubr.msk.f32.mxu0 %vm2570_vm5, %v8432_v48 }
 0xb73   :  { %8024 = vmatpush3.msra.mxu1 %v8431_v31 }
 0xb74   :  { %8026 = vmatmul.mubr.msk.f32.vlgmr.msra.gmra.mxu1 %vm1476_vm15, %v4675_v42  ;;  %8039 = vmatprep.subr.mxu1 %v8433_v11 }
 0xb75   :  { %8040 = vmatpush3.msra.mxu1 %v8433_v11  ;;  %8047 = vmatprep.mubr.msk.f32.mxu1 %vm1476_vm15, %v4844_v49 }
 0xb76   :  { %8041 = vmatprep.subr.mxu1 %v8434_v53 }
 0xb77   :  { %8042 = vmatpush3.msra.mxu1 %v8434_v53 }
 0xb78   :  { %8043 = vmatprep.subr.mxu1 %v8435_v10 }
 0xb79   :  { %8044 = vmatpush3.msra.mxu1 %v8435_v10 }
 0xb7a   :  { %8045 = vmatprep.subr.mxu1 %v8436_v33 }
 0xb7b   :  { %8046 = vmatpush3.msra.mxu1 %v8436_v33 }
 0xb7c   :  { %8048 = vmatmul.mubr.msk.f32.vlgmr.msra.gmra.mxu1 %vm1476_vm15, %v4843_v24 }
 0xc28   :  { %v8016_v55 = vpop.f32.mrf.mxu0 }
 0xc2a   :  { %v4665_v39 = vpop.f32.mrf.mxu0 }
 0xc2c   :  { %v8005_v47 = vpop.f32.mrf.mxu1 }
 0xc2d   :  { %v4671_v56 = vadd.f32 %v8016_v55, %v8005_v47  ;;  %v10175_v55 = vld [vmem:[%s10456_s9 + $0x68] sm:$0xff] }
 0xc2e   :  { %v4586_v58 = vpop.f32.mrf.mxu1 }
 0xc2f   :  { %v4666_v43 = vadd.f32 %v4665_v39, %v4586_v58  ;;  %v10180_v58 = vld [vmem:[%s10456_s9 + $0x60] sm:$0xff]  ;;  %v10201_v39 = vld [vmem:[%s10456_s9 + $0x48] sm:$0xff] }
 0xc31   :  { %v8038_v60 = vpop.f32.mrf.mxu0 }
 0xc33   :  { %v4831_v30 = vpop.f32.mrf.mxu0 }
 0xc34   :  { %v8027_v7 = vpop.f32.mrf.mxu1 }
 0xc35   :  { %v4757_v0 = vadd.f32 %v8027_v7, %v4671_v56  ;;  %v10187_v7 = vld [vmem:[%s10456_s9 + $0x58] sm:$0xff]  ;;  %v10194_v56 = vld [vmem:[%s10456_s9 + $0x50] sm:$0xff] }
 0xc36   :  { %v4747_v59 = vpop.f32.mrf.mxu1 }
 0xc37   :  { %v4756_v52 = vadd.f32 %v4747_v59, %v4666_v43  ;;  %v4841_v32 = vadd.f32 %v8038_v60, %v4757_v0  ;;  %v10208_v59 = vld [vmem:[%s10456_s9 + $0x40] sm:$0xff]  ;;  %v10215_v0 = vld [vmem:[%s10456_s9 + $0x38] sm:$0xff]  ;;  %v10225_v60 = vld [vmem:[%s10456_s9 + $0x30] sm:$0xff] }
 0xc39   :  { %v4840_v54 = vadd.f32 %v4831_v30, %v4756_v52 }
 0xc3c   :  { %v8049_v63 = vpop.f32.mrf.mxu1 }
 0xc3d   :  { %v4925_v2 = vadd.f32 %v8049_v63, %v4841_v32 }
 0xc3e   :  { %v4915_v44 = vpop.f32.mrf.mxu1 }
 0xc3f   :  { %v4927_v5 = vadd.f32 %v4925_v2, %v9490_v22  ;;  %v4924_v6 = vadd.f32 %v4915_v44, %v4840_v54  ;;  %v5327_v2 = vsub.s32 5, %v8701_v57 }
 0xc41   :  { %v4931_v38 = vmul.f32 0.01, %v4927_v5  ;;  %v4926_v50 = vadd.f32 %v4924_v6, %v9490_v22  ;;  %vm4929_vm0 = vcmp.ge.f32.partialorder %v4927_v5, 0.0  ;;  %v5014_v22 = vld [vmem:[%s10456_s9 + $0x8] sm:$0xff] }
 0xc42   :  { %8057 = vmatprep.subr.mxu1 %v5014_v22 }
 0xc43   :  { %v4933_v61 = vsel %vm4929_vm0, %v4927_v5, %v4931_v38  ;;  %vm4928_vm7 = vcmp.ge.f32.partialorder %v4926_v50, 0.0  ;;  %v4930_v14 = vmul.f32 0.01, %v4926_v50  ;;  %8058 = vmatpush3.msra.mxu1 %v5014_v22  ;;  %v10257_v5 = vrot.slane %v10152_v15, %v5327_v2 }
 0xc44   :  { %8050 = vmatprep.subr.msk.mxu0 %vm1343_vm12, %v4933_v61  ;;  %8059 = vmatprep.subr.mxu1 %v5013_v9 }
 0xc45   :  { %8051 = vmatpush3.msk.msra.mxu0 %vm1343_vm12, %v4933_v61  ;;  %v4932_v62 = vsel %vm4928_vm7, %v4926_v50, %v4930_v14  ;;  %8060 = vmatpush3.msra.mxu1 %v5013_v9 }
 0xc46   :  { %8052 = vmatprep.subr.mxu0 %v4932_v62  ;;  %8075 = vmatprep.subr.mxu1 %v8461_v1 }
 0xc47   :  { %8053 = vmatpush3.msra.mxu0 %v4932_v62 }
 0xc48   :  { %8055 = vmatmul.mubr.msk.f32.vlgmr.msra.gmra.mxu0 %vm2570_vm5, %v8437_v23  ;;  %8064 = vmatprep.subr.mxu0 %v8461_v1 }
 0xc49   :  { %8072 = vmatprep.mubr.msk.f32.mxu0 %vm10462_vm9, %v8461_v1  ;;  %8065 = vmatpush3.msra.mxu0 %v10106_v40 }
 0xc4a   :  { %8066 = vmatprep.subr.mxu0 %v8461_v1 }
 0xc4b   :  { %8067 = vmatpush3.msra.mxu0 %v10113_v51 }
 0xc4c   :  { %8068 = vmatprep.subr.mxu0 %v8461_v1 }
 0xc4d   :  { %8069 = vmatpush3.msra.mxu0 %v10119_v35 }
 0xc4e   :  { %8070 = vmatprep.subr.mxu0 %v8461_v1 }
 0xc4f   :  { %8071 = vmatpush3.msra.mxu0 %v10126_v12 }
 0xc50   :  { %8073 = vmatmul.mubr.f32.vlgmr.msra.gmra.mxu0 %v8461_v1  ;;  %8086 = vmatprep.subr.mxu0 %v8461_v1 }
 0xc51   :  { %8102 = vmatprep.mubr.msk.f32.mxu0 %vm10462_vm9, %v8461_v1  ;;  %8087 = vmatpush3.msra.mxu0 %v10175_v55 }
 0xc52   :  { %8088 = vmatprep.subr.mxu0 %v8461_v1 }
 0xc53   :  { %8089 = vmatpush3.msra.mxu0 %v10180_v58 }
 0xc54   :  { %8090 = vmatprep.subr.mxu0 %v8461_v1 }
 0xc55   :  { %8091 = vmatpush3.msra.mxu0 %v10187_v7 }
 0xc56   :  { %8092 = vmatprep.subr.mxu0 %v8461_v1 }
 0xc57   :  { %8093 = vmatpush3.msra.mxu0 %v10194_v56 }
 0xc58   :  { %8094 = vmatprep.subr.mxu0 %v8461_v1 }
 0xc59   :  { %8095 = vmatpush3.msra.mxu0 %v10201_v39 }
 0xc5a   :  { %8096 = vmatprep.subr.mxu0 %v8461_v1 }
 0xc5b   :  { %8097 = vmatpush3.msra.mxu0 %v10208_v59 }
 0xc5c   :  { %8098 = vmatprep.subr.mxu0 %v8461_v1 }
 0xc5d   :  { %8099 = vmatpush3.msra.mxu0 %v10215_v0 }
 0xc5e   :  { %8100 = vmatprep.subr.mxu0 %v8461_v1 }
 0xc5f   :  { %8101 = vmatpush3.msra.mxu0 %v10225_v60 }
 0xc60   :  { %8135 = vmatprep.subr.mxu0 %v8461_v1 }
 0xd08   :  { %v8056_v3 = vpop.f32.mrf.mxu0 }
 0xd0a   :  { %v5003_v13 = vpop.f32.mrf.mxu0 }
 0xd0b   :  { %v5012_v16 = vmax.f32 %v5003_v13, %v8056_v3 }
 0xd0d   :  { %v5028_v18 = vrot.slane %v5012_v16, 3 }
 0xd0f   :  { %v5030_v8 = vsel %vm976_vm10, %v2655_v17, %v5028_v18 }
 0xd10   :  { %8061 = vmatprep.mubr.msk.f32.mxu1 %vm5035_vm4, %v5030_v8  ;;  %v5189_v20 = vpop.f32.mrf.mxu0 }
 0xd11   :  { %8062 = vmatmul.mubr.msk.f32.vlgmr.msra.gmra.mxu1 %vm5035_vm4, %v5028_v18 }
 0xd12   :  { %8076 = vmatpush3.msra.mxu1 %v10106_v40  ;;  %8083 = vmatprep.mubr.msk.f32.mxu1 %vm10462_vm9, %v8461_v1  ;;  %v8074_v21 = vpop.f32.mrf.mxu0 }
 0xd13   :  { %8077 = vmatprep.subr.mxu1 %v8461_v1 }
 0xd14   :  { %8078 = vmatpush3.msra.mxu1 %v10113_v51 }
 0xd15   :  { %8079 = vmatprep.subr.mxu1 %v8461_v1 }
 0xd16   :  { %8080 = vmatpush3.msra.mxu1 %v10119_v35 }
 0xd17   :  { %8081 = vmatprep.subr.mxu1 %v8461_v1 }
 0xd18   :  { %8082 = vmatpush3.msra.mxu1 %v10126_v12 }
 0xd19   :  { %8105 = vmatprep.subr.mxu1 %v8461_v1 }
 0xdd1   :  { %v8063_v25 = vpop.f32.mrf.mxu1 }
 0xdd2   :  { %v5113_v29 = vadd.f32 %v8063_v25, %v5034_v46 }
 0xdd3   :  { %v5107_v28 = vpop.f32.mrf.mxu1 }
 0xdd4   :  { %v10155_v34 = vadd.f32 %v5107_v28, %v5034_v46  ;;  %v5637_v42 = vrot.slane %v5113_v29, 7 }
 0xdd6   :  { %v5117_v36 = vrot.slane %v10155_v34, 4  ;;  %v5634_v41 = vrot.slane %v10155_v34, 3  ;;  %v5218_v54 = vrot.slane %v10155_v34, 1  ;;  %v5220_v44 = vrot.slane %v10155_v34, 5 }
 0xdd8   :  { %v5119_v27 = vsel %vm1343_vm12, %v10155_v34, %v5117_v36  ;;  %v10162_v4 = vsel %vm1343_vm12, %v5117_v36, %v5113_v29  ;;  %v10165_v37 = vsel %vm1343_vm12, %v5634_v41, %v5637_v42  ;;  %v5222_v6 = vsel %vm1343_vm12, %v5218_v54, %v5220_v44 }
 0xdd9   :  { %v5193_v26 = vadd.f32 %v5189_v20, %v5119_v27 }
 0xddb   :  { %8233 = vtanh.f32 %v5193_v26  ;;  %v6598_v31 = vmul.f32 -1.442695, %v5193_v26 }
 0xddd   :  { %8235 = vpow2.f32 %v6598_v31 }
 0xde8   :  { %v8234_v45 = vpop.eup %8233 }
 0xde9   :  { %5203 = vrot.lane.b32.xlu0 %v8234_v45, %s8463_s11 }
 0xdea   :  { %v8236_v24 = vpop.eup %8235 }
 0xdeb   :  { %v5197_v48 = vadd.f32 1.0, %v8236_v24 }
 0xded   :  { %8237 = vrcp.f32 %v5197_v48 }
 0xdfa   :  { %v8238_v11 = vpop.eup %8237 }
 0xdfb   :  { %v5201_v10 = vmul.f32 0.0, %v8238_v11 }
 0xe5b   :  { %v5204_v49 = vpop.permute.xlu0 %5203 }
 0xe5c   :  { %v5206_v53 = vmul.f32 %v8238_v11, %v5204_v49 }
 0xe5e   :  { %5208 = vrot.lane.b32.xlu0 %v5206_v53, %s8464_s27 }
 0xed0   :  { %v5209_v33 = vpop.permute.xlu0 %5208 }
 0xed1   :  { %v10169_v47 = vadd.f32 %v5209_v33, %v5201_v10 }
 0xed3   :  { %8239 = vtanh.f32 %v10169_v47 }
 0xee0   :  { %v8240_v43 = vpop.eup %8239 }
 0xee1   :  { %5214 = vrot.lane.b32.xlu1 %v8240_v43, %s8463_s11 }
 0xf53   :  { %v5215_v52 = vpop.permute.xlu1 %5214 }
 0xf54   :  { %v5217_v32 = vmul.f32 %v8238_v11, %v5215_v52 }
 0xf56   :  { %5224 = vrot.lane.b32.xlu1 %v5217_v32, %s8464_s27 }
 0xfc8   :  { %v5225_v30 = vpop.permute.xlu1 %5224 }
 0xfc9   :  { %v5324_v63 = vsel %vm1476_vm15, %v5225_v30, 0.0  ;;  %8084 = vmatmul.mubr.msk.f32.vlgmr.msra.gmra.mxu1 %vm1476_vm15, %v5225_v30 }
 0xfca   :  { %8103 = vmatmul.mubr.msk.f32.vlgmr.msra.gmra.mxu0 %vm570_vm8, %v5324_v63  ;;  %8106 = vmatpush3.msra.mxu1 %v10106_v40 }
 0xfcb   :  { %8107 = vmatprep.subr.mxu1 %v8461_v1  ;;  %8113 = vmatprep.mubr.msk.f32.mxu1 %vm10462_vm9, %v8461_v1 }
 0xfcc   :  { %8108 = vmatpush3.msra.mxu1 %v10113_v51  ;;  %8136 = vmatpush3.msra.mxu0 %v10106_v40 }
 0xfcd   :  { %8109 = vmatprep.subr.mxu1 %v8461_v1  ;;  %8137 = vmatprep.subr.mxu0 %v8461_v1 }
 0xfce   :  { %8110 = vmatpush3.msra.mxu1 %v10119_v35  ;;  %8138 = vmatpush3.msra.mxu0 %v10113_v51 }
 0xfcf   :  { %8111 = vmatprep.subr.mxu1 %v8461_v1  ;;  %8139 = vmatprep.subr.mxu0 %v8461_v1 }
 0xfd0   :  { %8112 = vmatpush3.msra.mxu1 %v10126_v12  ;;  %8140 = vmatpush3.msra.mxu0 %v10119_v35 }
 0xfd1   :  { %8116 = vmatprep.subr.mxu1 %v8461_v1  ;;  %8141 = vmatprep.subr.mxu0 %v8461_v1 }
 0xfd2   :  { %8142 = vmatpush3.msra.mxu0 %v10126_v12  ;;  %8143 = vmatprep.mubr.msk.f32.mxu0 %vm10462_vm9, %v8461_v1 }
 0xfd3   :  { %8146 = vmatprep.subr.mxu0 %v8461_v1 }
0x1089   :  { %v5294_v38 = vpop.f32.mrf.mxu1 }
0x108a   :  { %v5298_v50 = vadd.f32 %v5294_v38, %v5222_v6  ;;  %v5398_v61 = vpop.f32.mrf.mxu0 }
0x108b   :  { %v5399_v14 = vadd.f32 %v5398_v61, %v10257_v5  ;;  %v8085_v62 = vpop.f32.mrf.mxu1 }
0x108c   :  { %8241 = vtanh.f32 %v5298_v50  ;;  %v8104_v23 = vpop.f32.mrf.mxu0  ;;  %v6600_v3 = vmul.f32 -1.442695, %v5298_v50 }
0x108d   :  { %8243 = vtanh.f32 %v5399_v14  ;;  %v6602_v13 = vmul.f32 -1.442695, %v5399_v14 }
0x108e   :  { %8245 = vpow2.f32 %v6600_v3 }
0x108f   :  { %8247 = vpow2.f32 %v6602_v13 }
0x1099   :  { %v8242_v22 = vpop.eup %8241 }
0x109a   :  { %v8244_v9 = vpop.eup %8243  ;;  %5308 = vrot.lane.b32.xlu0 %v8242_v22, %s8463_s11 }
0x109b   :  { %5411 = vrot.lane.b32.xlu1 %v8244_v9, %s8463_s11  ;;  %v8246_v16 = vpop.eup %8245 }
0x109c   :  { %v8248_v17 = vpop.eup %8247  ;;  %v5302_v18 = vadd.f32 1.0, %v8246_v16 }
0x109d   :  { %v5405_v8 = vadd.f32 1.0, %v8248_v17 }
0x109e   :  { %8249 = vrcp.f32 %v5302_v18 }
0x109f   :  { %8251 = vrcp.f32 %v5405_v8 }
0x10ab   :  { %v8250_v20 = vpop.eup %8249 }
0x10ac   :  { %v8252_v19 = vpop.eup %8251  ;;  %v5306_v28 = vmul.f32 %v8250_v20, %v10169_v47  ;;  %v5426_v47 = vrot.slane %v10155_v34, 2 }
0x10ad   :  { %v5409_v42 = vmul.f32 0.0, %v8252_v19 }
0x110c   :  { %v5309_v21 = vpop.permute.xlu0 %5308 }
0x110d   :  { %v5311_v46 = vmul.f32 %v8250_v20, %v5309_v21  ;;  %v5412_v25 = vpop.permute.xlu1 %5411 }
0x110e   :  { %v5414_v29 = vmul.f32 %v8252_v19, %v5412_v25 }
0x110f   :  { %5313 = vrot.lane.b32.xlu0 %v5311_v46, %s8464_s27 }
0x1110   :  { %5416 = vrot.lane.b32.xlu1 %v5414_v29, %s8464_s27 }
0x1181   :  { %v5314_v36 = vpop.permute.xlu0 %5313 }
0x1182   :  { %v10266_v41 = vadd.f32 %v5314_v36, %v5306_v28  ;;  %v5417_v27 = vpop.permute.xlu1 %5416 }
0x1183   :  { %v10268_v26 = vadd.f32 %v5417_v27, %v5409_v42 }
0x1184   :  { %8253 = vtanh.f32 %v10266_v41 }
0x1185   :  { %8255 = vtanh.f32 %v10268_v26 }
0x1191   :  { %v8254_v45 = vpop.eup %8253 }
0x1192   :  { %v8256_v31 = vpop.eup %8255  ;;  %5319 = vrot.lane.b32.xlu0 %v8254_v45, %s8463_s11 }
0x1193   :  { %5422 = vrot.lane.b32.xlu1 %v8256_v31, %s8463_s11 }
0x1204   :  { %v5320_v24 = vpop.permute.xlu0 %5319 }
0x1205   :  { %v5322_v48 = vmul.f32 %v8250_v20, %v5320_v24  ;;  %v5423_v11 = vpop.permute.xlu1 %5422 }
0x1206   :  { %v5425_v49 = vmul.f32 %v8252_v19, %v5423_v11 }
0x1207   :  { %5432 = vrot.lane.b32.xlu0 %v5322_v48, %s8464_s27 }
0x1208   :  { %5533 = vrot.lane.b32.xlu1 %v5425_v49, %s8463_s11 }
0x1279   :  { %v5433_v53 = vpop.permute.xlu0 %5432 }
0x127a   :  { %8114 = vmatmul.mubr.msk.f32.vlgmr.msra.gmra.mxu1 %vm1476_vm15, %v5433_v53  ;;  %v5534_v10 = vpop.permute.xlu1 %5533 }
0x127b   :  { %8117 = vmatpush3.msra.mxu1 %v10175_v55  ;;  %8132 = vmatprep.mubr.msk.f32.mxu1 %vm10462_vm9, %v8461_v1  ;;  %v5536_v33 = vsel %vm1476_vm15, %v5433_v53, %v5534_v10 }
0x127c   :  { %8118 = vmatprep.subr.mxu1 %v8461_v1 }
0x127d   :  { %8119 = vmatpush3.msra.mxu1 %v10180_v58 }
0x127e   :  { %8120 = vmatprep.subr.mxu1 %v8461_v1 }
0x127f   :  { %8121 = vmatpush3.msra.mxu1 %v10187_v7 }
0x1280   :  { %8122 = vmatprep.subr.mxu1 %v8461_v1 }
0x1281   :  { %8123 = vmatpush3.msra.mxu1 %v10194_v56 }
0x1282   :  { %8124 = vmatprep.subr.mxu1 %v8461_v1 }
0x1283   :  { %8125 = vmatpush3.msra.mxu1 %v10201_v39 }
0x1284   :  { %8126 = vmatprep.subr.mxu1 %v8461_v1 }
0x1285   :  { %8127 = vmatpush3.msra.mxu1 %v10208_v59 }
0x1286   :  { %8128 = vmatprep.subr.mxu1 %v8461_v1 }
0x1287   :  { %8129 = vmatpush3.msra.mxu1 %v10215_v0 }
0x1288   :  { %8130 = vmatprep.subr.mxu1 %v8461_v1 }
0x1289   :  { %8131 = vmatpush3.msra.mxu1 %v10225_v60 }
0x128a   :  { %8133 = vmatmul.mubr.msk.f32.vlgmr.msra.gmra.mxu1 %vm570_vm8, %v5536_v33  ;;  %8165 = vmatprep.subr.mxu1 %v8461_v1 }
0x128b   :  { %8166 = vmatpush3.msra.mxu1 %v10106_v40  ;;  %8173 = vmatprep.mubr.msk.f32.mxu1 %vm10462_vm9, %v8461_v1  ;;  %v5428_v40 = vrot.slane %v10155_v34, 6 }
0x128c   :  { %8167 = vmatprep.subr.mxu1 %v8461_v1 }
0x128d   :  { %8168 = vmatpush3.msra.mxu1 %v10113_v51  ;;  %v5430_v43 = vsel %vm1343_vm12, %v5426_v47, %v5428_v40 }
0x128e   :  { %8169 = vmatprep.subr.mxu1 %v8461_v1 }
0x128f   :  { %8170 = vmatpush3.msra.mxu1 %v10119_v35 }
0x1290   :  { %8171 = vmatprep.subr.mxu1 %v8461_v1 }
0x1291   :  { %8172 = vmatpush3.msra.mxu1 %v10126_v12 }
0x1292   :  { %8176 = vmatprep.subr.mxu1 %v8461_v1 }
0x133a   :  { %v5502_v52 = vpop.f32.mrf.mxu1 }
0x133b   :  { %v5506_v32 = vadd.f32 %v5502_v52, %v5430_v43 }
0x133c   :  { %v8115_v30 = vpop.f32.mrf.mxu1 }
0x133d   :  { %8257 = vtanh.f32 %v5506_v32  ;;  %v6604_v54 = vmul.f32 -1.442695, %v5506_v32 }
0x134a   :  { %v8258_v51 = vpop.eup %8257  ;;  %v5606_v63 = vpop.f32.mrf.mxu1 }
0x134b   :  { %v5607_v35 = vadd.f32 %v5606_v63, %v10257_v5  ;;  %5516 = vrot.lane.b32.xlu0 %v8258_v51, %s8463_s11 }
0x134c   :  { %v8134_v2 = vpop.f32.mrf.mxu1 }
0x134d   :  { %8259 = vtanh.f32 %v5607_v35  ;;  %v6606_v34 = vmul.f32 -1.442695, %v5607_v35 }
0x134e   :  { %8261 = vpow2.f32 %v6604_v54 }
0x134f   :  { %8263 = vpow2.f32 %v6606_v34 }
0x135a   :  { %v8260_v12 = vpop.eup %8259 }
0x135b   :  { %5619 = vrot.lane.b32.xlu1 %v8260_v12, %s8463_s11  ;;  %v8262_v44 = vpop.eup %8261 }
0x135c   :  { %v5510_v6 = vadd.f32 1.0, %v8262_v44  ;;  %v8264_v38 = vpop.eup %8263 }
0x135d   :  { %v5613_v50 = vadd.f32 1.0, %v8264_v38 }
0x135e   :  { %8265 = vrcp.f32 %v5510_v6 }
0x135f   :  { %8267 = vrcp.f32 %v5613_v50 }
0x136b   :  { %v8266_v61 = vpop.eup %8265 }
0x136c   :  { %v8268_v23 = vpop.eup %8267  ;;  %v5514_v3 = vmul.f32 %v8266_v61, %v10266_v41 }
0x136d   :  { %v5617_v17 = vmul.f32 %v8268_v23, %v10268_v26 }
0x13bd   :  { %v5517_v14 = vpop.permute.xlu0 %5516 }
0x13be   :  { %v5519_v62 = vmul.f32 %v8266_v61, %v5517_v14 }
0x13c0   :  { %5521 = vrot.lane.b32.xlu0 %v5519_v62, %s8464_s27 }
0x13cd   :  { %v5620_v22 = vpop.permute.xlu1 %5619 }
0x13ce   :  { %v5622_v9 = vmul.f32 %v8268_v23, %v5620_v22 }
0x13d0   :  { %5624 = vrot.lane.b32.xlu1 %v5622_v9, %s8464_s27 }
0x1432   :  { %v5522_v13 = vpop.permute.xlu0 %5521 }
0x1433   :  { %v10316_v16 = vadd.f32 %v5522_v13, %v5514_v3 }
0x1435   :  { %8269 = vtanh.f32 %v10316_v16 }
0x1442   :  { %v8270_v18 = vpop.eup %8269  ;;  %v5625_v8 = vpop.permute.xlu1 %5624 }
0x1443   :  { %v10320_v20 = vadd.f32 %v5625_v8, %v5617_v17  ;;  %5527 = vrot.lane.b32.xlu0 %v8270_v18, %s8463_s11 }
0x1445   :  { %8271 = vtanh.f32 %v10320_v20 }
0x1452   :  { %v8272_v21 = vpop.eup %8271 }
0x1453   :  { %5630 = vrot.lane.b32.xlu1 %v8272_v21, %s8463_s11 }
0x14b5   :  { %v5528_v19 = vpop.permute.xlu0 %5527 }
0x14b6   :  { %v5530_v46 = vmul.f32 %v8266_v61, %v5528_v19 }
0x14b8   :  { %5641 = vrot.lane.b32.xlu0 %v5530_v46, %s8464_s27 }
0x14c5   :  { %v5631_v25 = vpop.permute.xlu1 %5630 }
0x14c6   :  { %v5633_v29 = vmul.f32 %v8268_v23, %v5631_v25 }
0x14c8   :  { %5742 = vrot.lane.b32.xlu1 %v5633_v29, %s8463_s11 }
0x152a   :  { %v5642_v28 = vpop.permute.xlu0 %5641 }
0x152b   :  { %8144 = vmatmul.mubr.msk.f32.vlgmr.msra.gmra.mxu0 %vm1476_vm15, %v5642_v28 }
0x152c   :  { %8147 = vmatpush3.msra.mxu0 %v10175_v55  ;;  %8162 = vmatprep.mubr.msk.f32.mxu0 %vm10462_vm9, %v8461_v1 }
0x152d   :  { %8148 = vmatprep.subr.mxu0 %v8461_v1 }
0x152e   :  { %8149 = vmatpush3.msra.mxu0 %v10180_v58 }
0x152f   :  { %8150 = vmatprep.subr.mxu0 %v8461_v1 }
0x1530   :  { %8151 = vmatpush3.msra.mxu0 %v10187_v7 }
0x1531   :  { %8152 = vmatprep.subr.mxu0 %v8461_v1 }
0x1532   :  { %8153 = vmatpush3.msra.mxu0 %v10194_v56 }
0x1533   :  { %8154 = vmatprep.subr.mxu0 %v8461_v1 }
0x1534   :  { %8155 = vmatpush3.msra.mxu0 %v10201_v39 }
0x1535   :  { %8156 = vmatprep.subr.mxu0 %v8461_v1 }
0x1536   :  { %8157 = vmatpush3.msra.mxu0 %v10208_v59 }
0x1537   :  { %8158 = vmatprep.subr.mxu0 %v8461_v1 }
0x1538   :  { %8159 = vmatpush3.msra.mxu0 %v10215_v0 }
0x1539   :  { %8160 = vmatprep.subr.mxu0 %v8461_v1 }
0x153a   :  { %v5743_v36 = vpop.permute.xlu1 %5742  ;;  %8161 = vmatpush3.msra.mxu0 %v10225_v60 }
0x153b   :  { %v5745_v42 = vsel %vm1476_vm15, %v5642_v28, %v5743_v36  ;;  %8195 = vmatprep.subr.mxu0 %v8461_v1 }
0x153c   :  { %8163 = vmatmul.mubr.msk.f32.vlgmr.msra.gmra.mxu0 %vm570_vm8, %v5745_v42 }
0x153d   :  { %8196 = vmatpush3.msra.mxu0 %v10175_v55  ;;  %8211 = vmatprep.mubr.msk.f32.mxu0 %vm10462_vm9, %v8461_v1 }
0x153e   :  { %8197 = vmatprep.subr.mxu0 %v8461_v1 }
0x153f   :  { %8198 = vmatpush3.msra.mxu0 %v10180_v58 }
0x1540   :  { %8199 = vmatprep.subr.mxu0 %v8461_v1 }
0x1541   :  { %8200 = vmatpush3.msra.mxu0 %v10187_v7 }
0x1542   :  { %8201 = vmatprep.subr.mxu0 %v8461_v1 }
0x1543   :  { %8202 = vmatpush3.msra.mxu0 %v10194_v56 }
0x1544   :  { %8203 = vmatprep.subr.mxu0 %v8461_v1 }
0x1545   :  { %8204 = vmatpush3.msra.mxu0 %v10201_v39 }
0x1546   :  { %8205 = vmatprep.subr.mxu0 %v8461_v1 }
0x1547   :  { %8206 = vmatpush3.msra.mxu0 %v10208_v59 }
0x1548   :  { %8207 = vmatprep.subr.mxu0 %v8461_v1 }
0x1549   :  { %8208 = vmatpush3.msra.mxu0 %v10215_v0 }
0x154a   :  { %8209 = vmatprep.subr.mxu0 %v8461_v1 }
0x154b   :  { %8210 = vmatpush3.msra.mxu0 %v10225_v60 }
0x15eb   :  { %v5711_v41 = vpop.f32.mrf.mxu0 }
0x15ec   :  { %v5715_v27 = vadd.f32 %v5711_v41, %v10165_v37 }
0x15ed   :  { %v8145_v26 = vpop.f32.mrf.mxu0 }
0x15ee   :  { %8273 = vtanh.f32 %v5715_v27  ;;  %v6608_v49 = vmul.f32 -1.442695, %v5715_v27 }
0x15fb   :  { %v8274_v45 = vpop.eup %8273 }
0x15fc   :  { %v5815_v31 = vpop.f32.mrf.mxu0  ;;  %5725 = vrot.lane.b32.xlu0 %v8274_v45, %s8463_s11 }
0x15fd   :  { %v5816_v24 = vadd.f32 %v5815_v31, %v10257_v5 }
0x15fe   :  { %v8164_v48 = vpop.f32.mrf.mxu0 }
0x15ff   :  { %8275 = vtanh.f32 %v5816_v24  ;;  %v6610_v10 = vmul.f32 -1.442695, %v5816_v24 }
0x1600   :  { %8277 = vpow2.f32 %v6608_v49 }
0x1601   :  { %8279 = vpow2.f32 %v6610_v10 }
0x160c   :  { %v8276_v11 = vpop.eup %8275 }
0x160d   :  { %5828 = vrot.lane.b32.xlu1 %v8276_v11, %s8463_s11  ;;  %v8278_v53 = vpop.eup %8277 }
0x160e   :  { %v5719_v33 = vadd.f32 1.0, %v8278_v53  ;;  %v8280_v37 = vpop.eup %8279 }
0x160f   :  { %v5822_v40 = vadd.f32 1.0, %v8280_v37 }
0x1610   :  { %8281 = vrcp.f32 %v5719_v33 }
0x1611   :  { %8283 = vrcp.f32 %v5822_v40 }
0x161d   :  { %v8282_v47 = vpop.eup %8281 }
0x161e   :  { %v8284_v32 = vpop.eup %8283  ;;  %v5723_v63 = vmul.f32 %v8282_v47, %v10316_v16 }
0x161f   :  { %v5826_v54 = vmul.f32 %v8284_v32, %v10320_v20 }
0x166e   :  { %v5726_v43 = vpop.permute.xlu0 %5725 }
0x166f   :  { %v5728_v52 = vmul.f32 %v8282_v47, %v5726_v43 }
0x1671   :  { %5730 = vrot.lane.b32.xlu0 %v5728_v52, %s8464_s27 }
0x167f   :  { %v5829_v30 = vpop.permute.xlu1 %5828 }
0x1680   :  { %v5831_v51 = vmul.f32 %v8284_v32, %v5829_v30 }
0x1682   :  { %5833 = vrot.lane.b32.xlu1 %v5831_v51, %s8464_s27 }
0x16e3   :  { %v5731_v35 = vpop.permute.xlu0 %5730 }
0x16e4   :  { %v10372_v2 = vadd.f32 %v5731_v35, %v5723_v63 }
0x16e6   :  { %8285 = vtanh.f32 %v10372_v2 }
0x16f3   :  { %v8286_v12 = vpop.eup %8285 }
0x16f4   :  { %v5834_v34 = vpop.permute.xlu1 %5833  ;;  %5736 = vrot.lane.b32.xlu0 %v8286_v12, %s8463_s11  ;;  %v6155_v12 = vld [vmem:[%s10457_s10 + $0x10] sm:$0xff] }
0x16f5   :  { %v10377_v44 = vadd.f32 %v5834_v34, %v5826_v54  ;;  %v6154_v54 = vld [vmem:[%s10457_s10 + $0x8] sm:$0xff]  ;;  %v6153_v34 = vld [vmem:[%s10457_s10] sm:$0xff] }
0x16f7   :  { %8287 = vtanh.f32 %v10377_v44 }
0x1704   :  { %v8288_v6 = vpop.eup %8287 }
0x1705   :  { %5839 = vrot.lane.b32.xlu1 %v8288_v6, %s8463_s11 }
0x1766   :  { %v5737_v38 = vpop.permute.xlu0 %5736 }
0x1767   :  { %v5739_v50 = vmul.f32 %v8282_v47, %v5737_v38 }
0x1769   :  { %5845 = vrot.lane.b32.xlu0 %v5739_v50, %s8464_s27 }
0x1777   :  { %v5840_v61 = vpop.permute.xlu1 %5839 }
0x1778   :  { %v5842_v14 = vmul.f32 %v8284_v32, %v5840_v61  ;;  %v8465_v61 = vmov 1966171168  }
0x177a   :  { %5946 = vrot.lane.b32.xlu1 %v5842_v14, %s8463_s11  ;;  %v6238_v14 = vunpack.c.l.s4 %v8465_v61 }
0x17db   :  { %v5846_v62 = vpop.permute.xlu0 %5845 }
0x17dc   :  { %8174 = vmatmul.mubr.msk.f32.vlgmr.msra.gmra.mxu1 %vm1476_vm15, %v5846_v62 }
0x17dd   :  { %8177 = vmatpush3.msra.mxu1 %v10175_v55  ;;  %8192 = vmatprep.mubr.msk.f32.mxu1 %vm10462_vm9, %v8461_v1 }
0x17de   :  { %8178 = vmatprep.subr.mxu1 %v8461_v1 }
0x17df   :  { %8179 = vmatpush3.msra.mxu1 %v10180_v58 }
0x17e0   :  { %8180 = vmatprep.subr.mxu1 %v8461_v1 }
0x17e1   :  { %8181 = vmatpush3.msra.mxu1 %v10187_v7 }
0x17e2   :  { %8182 = vmatprep.subr.mxu1 %v8461_v1 }
0x17e3   :  { %8183 = vmatpush3.msra.mxu1 %v10194_v56 }
0x17e4   :  { %8184 = vmatprep.subr.mxu1 %v8461_v1 }
0x17e5   :  { %8185 = vmatpush3.msra.mxu1 %v10201_v39 }
0x17e6   :  { %8186 = vmatprep.subr.mxu1 %v8461_v1 }
0x17e7   :  { %8187 = vmatpush3.msra.mxu1 %v10208_v59 }
0x17e8   :  { %8188 = vmatprep.subr.mxu1 %v8461_v1 }
0x17e9   :  { %8189 = vmatpush3.msra.mxu1 %v10215_v0 }
0x17ea   :  { %8190 = vmatprep.subr.mxu1 %v8461_v1 }
0x17eb   :  { %8191 = vmatpush3.msra.mxu1 %v10225_v60 }
0x17ec   :  { %v5947_v55 = vpop.permute.xlu1 %5946  ;;  %8214 = vmatprep.subr.mxu1 %v8461_v1 }
0x17ed   :  { %v5949_v58 = vsel %vm1476_vm15, %v5846_v62, %v5947_v55  ;;  %v6159_v62 = vsub.s32 6, %v8701_v57  ;;  %v6239_v55 = vunpack.c.0.s8 %v6238_v14 }
0x17ee   :  { %8193 = vmatmul.mubr.msk.f32.vlgmr.msra.gmra.mxu1 %vm570_vm8, %v5949_v58 }
0x17ef   :  { %8222 = vmatprep.mubr.msk.f32.mxu1 %vm10462_vm9, %v8461_v1  ;;  %v6160_v58 = vrot.slane %v10152_v15, %v6159_v62 }
0x189c   :  { %v5915_v7 = vpop.f32.mrf.mxu1 }
0x189d   :  { %v5919_v56 = vadd.f32 %v5915_v7, %v10162_v4 }
0x189e   :  { %v8175_v39 = vpop.f32.mrf.mxu1 }
0x189f   :  { %8289 = vtanh.f32 %v5919_v56  ;;  %v6612_v9 = vmul.f32 -1.442695, %v5919_v56 }
0x18ac   :  { %v8290_v59 = vpop.eup %8289 }
0x18ad   :  { %5929 = vrot.lane.b32.xlu0 %v8290_v59, %s8463_s11 }
0x18ae   :  { %v6019_v0 = vpop.f32.mrf.mxu1 }
0x18af   :  { %v6020_v60 = vadd.f32 %v6019_v0, %v10257_v5 }
0x18b0   :  { %v8194_v23 = vpop.f32.mrf.mxu1 }
0x18b1   :  { %8291 = vtanh.f32 %v6020_v60  ;;  %v6614_v13 = vmul.f32 -1.442695, %v6020_v60 }
0x18b2   :  { %8293 = vpow2.f32 %v6612_v9 }
0x18b3   :  { %8295 = vpow2.f32 %v6614_v13 }
0x18be   :  { %v8292_v22 = vpop.eup %8291 }
0x18bf   :  { %6032 = vrot.lane.b32.xlu1 %v8292_v22, %s8463_s11  ;;  %v8294_v3 = vpop.eup %8293 }
0x18c0   :  { %v5923_v16 = vadd.f32 1.0, %v8294_v3  ;;  %v8296_v4 = vpop.eup %8295 }
0x18c1   :  { %v6026_v20 = vadd.f32 1.0, %v8296_v4 }
0x18c2   :  { %8297 = vrcp.f32 %v5923_v16 }
0x18c3   :  { %8299 = vrcp.f32 %v6026_v20 }
0x18cf   :  { %v8298_v17 = vpop.eup %8297 }
0x18d0   :  { %v8300_v21 = vpop.eup %8299  ;;  %v5927_v25 = vmul.f32 %v8298_v17, %v10372_v2 }
0x18d1   :  { %v6030_v42 = vmul.f32 %v8300_v21, %v10377_v44 }
0x191f   :  { %v5930_v18 = vpop.permute.xlu0 %5929 }
0x1920   :  { %v5932_v8 = vmul.f32 %v8298_v17, %v5930_v18 }
0x1922   :  { %5934 = vrot.lane.b32.xlu0 %v5932_v8, %s8464_s27 }
0x1931   :  { %v6033_v19 = vpop.permute.xlu1 %6032 }
0x1932   :  { %v6035_v46 = vmul.f32 %v8300_v21, %v6033_v19 }
0x1934   :  { %6037 = vrot.lane.b32.xlu1 %v6035_v46, %s8464_s27 }
0x1994   :  { %v5935_v29 = vpop.permute.xlu0 %5934 }
0x1995   :  { %v5937_v28 = vadd.f32 %v5935_v29, %v5927_v25 }
0x1997   :  { %8301 = vtanh.f32 %v5937_v28 }
0x19a4   :  { %v8302_v36 = vpop.eup %8301 }
0x19a5   :  { %5940 = vrot.lane.b32.xlu0 %v8302_v36, %s8463_s11 }
0x19a6   :  { %v6038_v41 = vpop.permute.xlu1 %6037 }
0x19a7   :  { %v6040_v27 = vadd.f32 %v6038_v41, %v6030_v42 }
0x19a9   :  { %8303 = vtanh.f32 %v6040_v27 }
0x19b6   :  { %v8304_v26 = vpop.eup %8303 }
0x19b7   :  { %6043 = vrot.lane.b32.xlu1 %v8304_v26, %s8463_s11 }
0x1a17   :  { %v5941_v45 = vpop.permute.xlu0 %5940 }
0x1a18   :  { %v5943_v31 = vmul.f32 %v8298_v17, %v5941_v45 }
0x1a1a   :  { %6048 = vrot.lane.b32.xlu0 %v5943_v31, %s8464_s27 }
0x1a29   :  { %v6044_v24 = vpop.permute.xlu1 %6043 }
0x1a2a   :  { %v6046_v48 = vmul.f32 %v8300_v21, %v6044_v24 }
0x1a2c   :  { %6052 = vrot.lane.b32.xlu1 %v6046_v48, %s8463_s11 }
0x1a8c   :  { %v6049_v11 = vpop.permute.xlu0 %6048 }
0x1a9e   :  { %v6053_v49 = vpop.permute.xlu1 %6052 }
0x1a9f   :  { %v6055_v53 = vsel %vm1476_vm15, %v6049_v11, %v6053_v49 }
0x1aa0   :  { %8212 = vmatmul.mubr.msk.f32.vlgmr.msra.gmra.mxu0 %vm570_vm8, %v6055_v53 }
0x1b60   :  { %v6125_v10 = vpop.f32.mrf.mxu0 }
0x1b61   :  { %v6126_v33 = vadd.f32 %v6125_v10, %v10257_v5  ;;  %v6156_v5 = vld [vmem:[%s10457_s10 + $0x18] sm:$0xff]  ;;  %s8466_s10 = smov [#allocation2]  }
0x1b62   :  { %v8213_v37 = vpop.f32.mrf.mxu0  ;;  %8215 = vmatpush3.msra.mxu1 %v6156_v5  ;;  %s6268_s5 = sshll.u32 %s8466_s10, 4  ;;  %s6269_s5 = int_to_ptr.vmem [resolvable:$true] %s6268_s5 }
0x1b63   :  { %8305 = vtanh.f32 %v6126_v33  ;;  %v6616_v40 = vmul.f32 -1.442695, %v6126_v33  ;;  %8216 = vmatprep.subr.mxu1 %v8461_v1  ;;  %s8439_s25 = scalar_lea.vmem %s6269_s5, 32  ;;  %p8444_p1 = scmp.lt.s32.totalorder %s6269_s5, %s6269_s5 }
0x1b64   :  { %8217 = vmatpush3.msra.mxu1 %v6155_v12  ;;  %p8440_p0 = scmp.ne.s32.totalorder %s6269_s5, %s8439_s25  ;;  %p8445_p2 = scmp.lt.s32.totalorder %s8439_s25, %s8439_s25 }
0x1b65   :  { %8307 = vpow2.f32 %v6616_v40  ;;  %8218 = vmatprep.subr.mxu1 %v8461_v1 }
0x1b66   :  { %8219 = vmatpush3.msra.mxu1 %v6154_v54  ;;  %p8446_p3 = por %p8445_p2, %p8444_p1 }
0x1b67   :  { %8220 = vmatprep.subr.mxu1 %v8461_v1  ;;  %v6242_v1 = vsub.s32 %v6239_v55, %v8701_v57 }
0x1b68   :  { %8221 = vmatpush3.msra.mxu1 %v6153_v34  ;;  %p8447_p4 = pnand %p8446_p3, %p8440_p0 }
0x1b70   :  { %v8306_v47 = vpop.eup %8305 }
0x1b71   :  { %6138 = vrot.lane.b32.xlu0 %v8306_v47, %s8463_s11 }
0x1b72   :  { %v8308_v43 = vpop.eup %8307 }
0x1b73   :  { %v6132_v52 = vadd.f32 1.0, %v8308_v43 }
0x1b75   :  { %8309 = vrcp.f32 %v6132_v52 }
0x1b82   :  { %v8310_v32 = vpop.eup %8309 }
0x1b83   :  { %v6136_v63 = vmul.f32 %v8310_v32, %v6040_v27 }
0x1be3   :  { %v6139_v30 = vpop.permute.xlu0 %6138 }
0x1be4   :  { %v6141_v51 = vmul.f32 %v8310_v32, %v6139_v30 }
0x1be6   :  { %6143 = vrot.lane.b32.xlu1 %v6141_v51, %s8464_s27 }
0x1c58   :  { %v6144_v35 = vpop.permute.xlu1 %6143 }
0x1c59   :  { %v6146_v2 = vadd.f32 %v6144_v35, %v6136_v63 }
0x1c5b   :  { %8311 = vtanh.f32 %v6146_v2 }
0x1c68   :  { %v8312_v44 = vpop.eup %8311 }
0x1c69   :  { %6149 = vrot.lane.b32.xlu0 %v8312_v44, %s8463_s11 }
0x1cdb   :  { %v6150_v6 = vpop.permute.xlu0 %6149 }
0x1cdc   :  { %v6152_v38 = vmul.f32 %v8310_v32, %v6150_v6 }
0x1cde   :  { %6162 = vrot.lane.b32.xlu1 %v6152_v38, %s8464_s27 }
0x1d50   :  { %v6163_v50 = vpop.permute.xlu1 %6162 }
0x1d51   :  { %8223 = vmatmul.mubr.msk.f32.vlgmr.msra.gmra.mxu1 %vm1476_vm15, %v6163_v50 }
0x1e11   :  { %v6232_v7 = vpop.f32.mrf.mxu1 }
0x1e12   :  { %v6233_v56 = vadd.f32 %v6232_v7, %v6160_v58 }
0x1e13   :  { %v8224_v39 = vpop.f32.mrf.mxu1 }
0x1e14   :  { %v6243_v59 = vrot.slane %v6233_v56, %v6242_v1 }
0x1e16   :  { %v6244_v0 = vcombine.high %v6243_v59, %v6243_v59  ;;  %6618 = vst.sshfl [vmem:[#allocation2] sm:$0x1 pattern:$0x73625140] %v6243_v59 }
0x1e18   :  { %6619 = vst.sshfl [vmem:[#allocation2 + $0x1] sm:$0x1 pattern:$0x73625140] %v6244_v0 }
0x1e19   :  { %8450 = shalt.err (!%p8447_p4)
}
0x1e1a   :  { %s8467_s26 = smov 16   ;;  %s8468_s11 = smov 1  }
0x1e1b   :  { %6274 = dma.vmem_to_hbm [thread:$0]  %s6269_s5, 32, %s10459_s12, [#allocation3], %s8467_s26, %s8467_s26, %s8468_s11  }
0x1e1c   :  { %8459 = dma.done.wait [#allocation3], 32  }
0x1e1d   :  { %8460 = vsyncadd [#allocation3], 4294967264 }
0x1e1e   :  { %6278 = vsyncpa [#allocation3], 1 }

</bundles_post_ra>
